<compile_context>
chip_gen: v5e
topology: v5e:2x2
jax: 0.10.0
libtpu: 0.0.40
codegen_flags: <defaults>
</compile_context>

<pallas_src>
import functools

import numpy as np
import jax
import jax.numpy as jnp
from jax.experimental import pallas as pl
from jax.experimental.pallas import tpu as pltpu


def _round_up(n, m):
    return ((n + m - 1) // m) * m


# ---------------------------------------------------------------------------
# Fused kernel: the whole discriminator forward in one pallas_call.
# refs layout: [x, (T, W, vec_a, vec_b) * n_layers, out]
#   T     : (K, M_out, M_in)    f32   0/1 selection (stride / padding / batch blocks)
#   W     : (K, C_in, C_out)    bf16  per-tap conv weights (Cout padded to 128 on last layer)
#   vec_a : (1, C_out)          f32   conv bias  (no-BN layers)  |  BN gamma
#   vec_b : (1, C_out)          f32   zeros      (no-BN layers)  |  BN beta
# cfgs is static per-layer config (K, bn, leaky, m_true).
# ---------------------------------------------------------------------------
def _fused_dpatchgan_kernel(*refs, cfgs):
    out_ref = refs[-1]
    h = refs[0][...]                                   # (M0, C0) bf16
    idx = 1
    for cfg in cfgs:
        T_ref, W_ref, va_ref, vb_ref = refs[idx], refs[idx + 1], refs[idx + 2], refs[idx + 3]
        idx += 4
        hb = h.astype(jnp.bfloat16)                    # bf16 MXU operand (no-op for layer 1)
        acc = None
        for k in range(cfg["K"]):
            z = jnp.dot(hb, W_ref[k], preferred_element_type=jnp.float32)   # (M_in, C_out)
            t = jnp.dot(T_ref[k], z, preferred_element_type=jnp.float32)    # (M_out, C_out)
            acc = t if acc is None else acc + t
        y = acc
        if cfg["bn"]:
            # BatchNorm1d, training-mode batch stats over the true rows; padded rows are
            # exactly zero (no bias added), so plain sums / true count are exact.
            inv_m = 1.0 / cfg["m_true"]
            mean = jnp.sum(y, axis=0, keepdims=True) * inv_m
            msq = jnp.sum(y * y, axis=0, keepdims=True) * inv_m
            var = jnp.maximum(msq - mean * mean, 0.0)
            y = (y - mean) * jax.lax.rsqrt(var + 1e-5) * va_ref[...] + vb_ref[...]
        else:
            y = y + va_ref[...]                        # conv bias (BN layers: dropped, cancels)
        if cfg["leaky"]:
            y = jnp.where(y > 0.0, y, 0.2 * y)         # LeakyReLU(0.2)
        h = y
    out_ref[...] = h.astype(out_ref.dtype)


# ---------------------------------------------------------------------------
# Host-side (numpy) preparation of all constant kernel operands + static config.
# ---------------------------------------------------------------------------
def _build_fused_operands(params, B, L):
    operands = []
    cfgs = []
    flops = 0
    transcendentals = 0
    bytes_accessed = 0

    cur_L, cur_Lp = L, _round_up(L, 8)
    Cout_pad = 1
    for li, p in enumerate(params):
        w = np.asarray(p["w"], np.float32)             # (Cout, Cin, K) — PyTorch layout
        bias = np.asarray(p["b"], np.float32)
        gamma = np.asarray(p["gamma"], np.float32)
        beta = np.asarray(p["beta"], np.float32)
        Cout, Cin, K = w.shape
        stride, pad = int(p["stride"]), int(p["pad"])
        use_bn, use_leaky = bool(p["bn"]), bool(p["leaky"])
        is_last = li == len(params) - 1

        Lout = (cur_L + 2 * pad - K) // stride + 1
        Lp_out = _round_up(Lout, 8)
        # lane-dense final output: pad Cout=1 up to 128 columns (sliced off in the wrapper)
        Cout_pad = _round_up(Cout, 128) if is_last else Cout

        Wk = np.zeros((K, Cin, Cout_pad), np.float32)
        Wk[:, :, :Cout] = np.transpose(w, (2, 1, 0))   # (K, Cin, Cout)

        M_in, M_out = B * cur_Lp, B * Lp_out
        T = np.zeros((K, M_out, M_in), np.float32)
        for k in range(K):
            for b in range(B):
                for l in range(Lout):
                    src = stride * l + k - pad
                    if 0 <= src < cur_L:
                        T[k, b * Lp_out + l, b * cur_Lp + src] = 1.0

        va = np.zeros((1, Cout_pad), np.float32)
        vb = np.zeros((1, Cout_pad), np.float32)
        if use_bn:
            va[0, :Cout] = gamma
            vb[0, :Cout] = beta
        else:
            va[0, :Cout] = bias

        operands += [
            jnp.asarray(T, jnp.float32),
            jnp.asarray(Wk, jnp.bfloat16),
            jnp.asarray(va, jnp.float32),
            jnp.asarray(vb, jnp.float32),
        ]
        cfgs.append(dict(K=K, bn=use_bn, leaky=use_leaky, m_true=float(B * Lout)))

        flops += K * (2 * M_in * Cin * Cout_pad + 2 * M_out * M_in * Cout_pad)
        if use_bn:
            transcendentals += Cout_pad
        bytes_accessed += T.size * 4 + Wk.size * 2 + va.size * 4 + vb.size * 4

        cur_L, cur_Lp = Lout, Lp_out

    geom = dict(L_out=cur_L, Lp_out=cur_Lp, M_out=B * cur_Lp, C_out_pad=Cout_pad)
    bytes_accessed += B * _round_up(L, 8) * int(params[0]["w"].shape[1]) * 2   # input (bf16)
    bytes_accessed += geom["M_out"] * geom["C_out_pad"] * 4                    # output (f32)
    return operands, tuple(cfgs), geom, int(flops), int(transcendentals), int(bytes_accessed)


def d_patchgan_forward(params, x_ncl):
    """x_ncl: (B, 6, L) float32 (PyTorch NCL). Returns (B, 1, L_final) like PyTorch."""
    B, C0, L = x_ncl.shape
    const_ops, cfgs, geom, flops, trans, bytes_acc = _build_fused_operands(params, B, L)

    # NCL -> (B*Lpad, C) activation matrix (channels on the lane dim), bf16 MXU operand.
    x = jnp.transpose(x_ncl, (0, 2, 1)).astype(jnp.float32)      # (B, L, C0)
    Lp0 = _round_up(L, 8)
    if Lp0 != L:
        x = jnp.pad(x, ((0, 0), (0, Lp0 - L), (0, 0)))
    x2d = x.reshape(B * Lp0, C0).astype(jnp.bfloat16)

    n_ops = 1 + len(const_ops)
    out2d = pl.pallas_call(
        functools.partial(_fused_dpatchgan_kernel, cfgs=cfgs),
        out_shape=jax.ShapeDtypeStruct((geom["M_out"], geom["C_out_pad"]), jnp.float32),
        in_specs=[pl.BlockSpec(memory_space=pltpu.MemorySpace.VMEM)] * n_ops,
        out_specs=pl.BlockSpec(memory_space=pltpu.MemorySpace.VMEM),
        cost_estimate=pl.CostEstimate(flops=flops, transcendentals=trans,
                                      bytes_accessed=bytes_acc),
    )(x2d, *const_ops)

    # (B*Lp_out, 128) -> true rows, column 0 -> (B, 1, L_final)
    out = out2d.reshape(B, geom["Lp_out"], geom["C_out_pad"])[:, :geom["L_out"], 0:1]
    return jnp.transpose(out, (0, 2, 1))


# ---------------------------------------------------------------------------
# Parameter construction (deterministic, synthetic — matches D_patchgan shapes).
# Stored as numpy so the forward pass can bake them as constants under jit.
# ---------------------------------------------------------------------------
def init_d_patchgan_params(key):
    ndf = 64
    # (C_in, C_out, kernel, stride, padding, use_bn, use_leaky)
    layer_specs = [
        (6,       ndf,     4, 2, 1, False, True),   # conv1 + LeakyReLU(0.2)
        (ndf,     ndf * 2, 4, 2, 1, True,  True),   # ConvNormRelu n=0
        (ndf * 2, ndf * 4, 4, 2, 1, True,  True),   # ConvNormRelu n=1
        (ndf * 4, ndf * 4, 4, 1, 1, True,  True),   # ConvNormRelu (stride 1)
        (ndf * 4, 1,       4, 1, 1, False, False),  # final Conv1d -> 1 channel
    ]
    params = []
    for i, (cin, cout, k, s, p, bn, lk) in enumerate(layer_specs):
        lkey = jax.random.fold_in(key, i)
        kw, kb, kg, kbeta = jax.random.split(lkey, 4)
        fan_in = cin * k
        bound = 1.0 / (fan_in ** 0.5)
        w = jax.random.uniform(kw, (cout, cin, k), jnp.float32, -bound, bound)
        b = jax.random.uniform(kb, (cout,), jnp.float32, -bound, bound)
        if bn:
            gamma = 1.0 + 0.01 * jax.random.normal(kg, (cout,), jnp.float32)
            beta = 0.01 * jax.random.normal(kbeta, (cout,), jnp.float32)
        else:
            gamma = jnp.ones((cout,), jnp.float32)   # unused dummies
            beta = jnp.zeros((cout,), jnp.float32)
        params.append(dict(w=np.asarray(w), b=np.asarray(b),
                           gamma=np.asarray(gamma), beta=np.asarray(beta),
                           stride=s, pad=p, bn=bn, leaky=lk))
    return params


if __name__ == "__main__":
    key = jax.random.PRNGKey(0)
    pkey, xkey = jax.random.split(key)
    params = init_d_patchgan_params(pkey)

    B, C, L = 2, 6, 64
    x = jax.random.normal(xkey, (B, C, L), jnp.float32)

    fwd = jax.jit(functools.partial(d_patchgan_forward, params))
    out = jax.block_until_ready(fwd(x))

    # L: 64 -> 32 -> 16 -> 8 -> 7 -> 6
    assert out.shape == (B, 1, 6), out.shape
    assert bool(jnp.all(jnp.isfinite(out)))
    print("KERNEL_OK")
</pallas_src>

<mosaic_0001>
module attributes {stable_mosaic.version = 11 : i64} {
  func.func @_fused_dpatchgan_kernel(%arg0: memref<128x6xbf16, #tpu.memory_space<vmem>>, %arg1: memref<4x64x128xf32, #tpu.memory_space<vmem>>, %arg2: memref<4x6x64xbf16, #tpu.memory_space<vmem>>, %arg3: memref<1x64xf32, #tpu.memory_space<vmem>>, %arg4: memref<1x64xf32, #tpu.memory_space<vmem>>, %arg5: memref<4x32x64xf32, #tpu.memory_space<vmem>>, %arg6: memref<4x64x128xbf16, #tpu.memory_space<vmem>>, %arg7: memref<1x128xf32, #tpu.memory_space<vmem>>, %arg8: memref<1x128xf32, #tpu.memory_space<vmem>>, %arg9: memref<4x16x32xf32, #tpu.memory_space<vmem>>, %arg10: memref<4x128x256xbf16, #tpu.memory_space<vmem>>, %arg11: memref<1x256xf32, #tpu.memory_space<vmem>>, %arg12: memref<1x256xf32, #tpu.memory_space<vmem>>, %arg13: memref<4x16x16xf32, #tpu.memory_space<vmem>>, %arg14: memref<4x256x256xbf16, #tpu.memory_space<vmem>>, %arg15: memref<1x256xf32, #tpu.memory_space<vmem>>, %arg16: memref<1x256xf32, #tpu.memory_space<vmem>>, %arg17: memref<4x16x16xf32, #tpu.memory_space<vmem>>, %arg18: memref<4x256x128xbf16, #tpu.memory_space<vmem>>, %arg19: memref<1x128xf32, #tpu.memory_space<vmem>>, %arg20: memref<1x128xf32, #tpu.memory_space<vmem>>, %arg21: memref<16x128xf32, #tpu.memory_space<vmem>>) attributes {dimension_semantics = [], scalar_prefetch = 0 : i64, scratch_operands = 0 : i64, tpu.core_type = #tpu.core_type<tc>} {
    %c0 = arith.constant 0 : index
    %c0_0 = arith.constant 0 : index
    %0 = vector.load %arg0[%c0, %c0_0] : memref<128x6xbf16, #tpu.memory_space<vmem>>, vector<128x6xbf16>
    %c0_1 = arith.constant 0 : index
    %c0_2 = arith.constant 0 : index
    %c0_3 = arith.constant 0 : index
    %1 = vector.load %arg2[%c0_1, %c0_2, %c0_3] : memref<4x6x64xbf16, #tpu.memory_space<vmem>>, vector<1x6x64xbf16>
    %2 = vector.shape_cast %1 : vector<1x6x64xbf16> to vector<6x64xbf16>
    %cst = arith.constant dense<0.000000e+00> : vector<128x64xf32>
    %3 = tpu.matmul %0, %2, %cst {dimension_numbers = #tpu.dot_dimension_numbers<[1], [0], [0], [1], [0, 0, 1, 1], [], []>} : vector<128x6xbf16>, vector<6x64xbf16>, vector<128x64xf32> -> vector<128x64xf32>
    %c0_4 = arith.constant 0 : index
    %c0_5 = arith.constant 0 : index
    %c0_6 = arith.constant 0 : index
    %4 = vector.load %arg1[%c0_4, %c0_5, %c0_6] : memref<4x64x128xf32, #tpu.memory_space<vmem>>, vector<1x64x128xf32>
    %5 = vector.shape_cast %4 : vector<1x64x128xf32> to vector<64x128xf32>
    %cst_7 = arith.constant dense<0.000000e+00> : vector<64x64xf32>
    %6 = tpu.matmul %5, %3, %cst_7 {dimension_numbers = #tpu.dot_dimension_numbers<[1], [0], [0], [1], [0, 0, 1, 1], [], []>} : vector<64x128xf32>, vector<128x64xf32>, vector<64x64xf32> -> vector<64x64xf32>
    %c1 = arith.constant 1 : index
    %c0_8 = arith.constant 0 : index
    %c0_9 = arith.constant 0 : index
    %7 = vector.load %arg2[%c1, %c0_8, %c0_9] : memref<4x6x64xbf16, #tpu.memory_space<vmem>>, vector<1x6x64xbf16>
    %8 = vector.shape_cast %7 : vector<1x6x64xbf16> to vector<6x64xbf16>
    %cst_10 = arith.constant dense<0.000000e+00> : vector<128x64xf32>
    %9 = tpu.matmul %0, %8, %cst_10 {dimension_numbers = #tpu.dot_dimension_numbers<[1], [0], [0], [1], [0, 0, 1, 1], [], []>} : vector<128x6xbf16>, vector<6x64xbf16>, vector<128x64xf32> -> vector<128x64xf32>
    %c1_11 = arith.constant 1 : index
    %c0_12 = arith.constant 0 : index
    %c0_13 = arith.constant 0 : index
    %10 = vector.load %arg1[%c1_11, %c0_12, %c0_13] : memref<4x64x128xf32, #tpu.memory_space<vmem>>, vector<1x64x128xf32>
    %11 = vector.shape_cast %10 : vector<1x64x128xf32> to vector<64x128xf32>
    %cst_14 = arith.constant dense<0.000000e+00> : vector<64x64xf32>
    %12 = tpu.matmul %11, %9, %cst_14 {dimension_numbers = #tpu.dot_dimension_numbers<[1], [0], [0], [1], [0, 0, 1, 1], [], []>} : vector<64x128xf32>, vector<128x64xf32>, vector<64x64xf32> -> vector<64x64xf32>
    %13 = arith.addf %6, %12 : vector<64x64xf32>
    %c2 = arith.constant 2 : index
    %c0_15 = arith.constant 0 : index
    %c0_16 = arith.constant 0 : index
    %14 = vector.load %arg2[%c2, %c0_15, %c0_16] : memref<4x6x64xbf16, #tpu.memory_space<vmem>>, vector<1x6x64xbf16>
    %15 = vector.shape_cast %14 : vector<1x6x64xbf16> to vector<6x64xbf16>
    %cst_17 = arith.constant dense<0.000000e+00> : vector<128x64xf32>
    %16 = tpu.matmul %0, %15, %cst_17 {dimension_numbers = #tpu.dot_dimension_numbers<[1], [0], [0], [1], [0, 0, 1, 1], [], []>} : vector<128x6xbf16>, vector<6x64xbf16>, vector<128x64xf32> -> vector<128x64xf32>
    %c2_18 = arith.constant 2 : index
    %c0_19 = arith.constant 0 : index
    %c0_20 = arith.constant 0 : index
    %17 = vector.load %arg1[%c2_18, %c0_19, %c0_20] : memref<4x64x128xf32, #tpu.memory_space<vmem>>, vector<1x64x128xf32>
    %18 = vector.shape_cast %17 : vector<1x64x128xf32> to vector<64x128xf32>
    %cst_21 = arith.constant dense<0.000000e+00> : vector<64x64xf32>
    %19 = tpu.matmul %18, %16, %cst_21 {dimension_numbers = #tpu.dot_dimension_numbers<[1], [0], [0], [1], [0, 0, 1, 1], [], []>} : vector<64x128xf32>, vector<128x64xf32>, vector<64x64xf32> -> vector<64x64xf32>
    %20 = arith.addf %13, %19 : vector<64x64xf32>
    %c3 = arith.constant 3 : index
    %c0_22 = arith.constant 0 : index
    %c0_23 = arith.constant 0 : index
    %21 = vector.load %arg2[%c3, %c0_22, %c0_23] : memref<4x6x64xbf16, #tpu.memory_space<vmem>>, vector<1x6x64xbf16>
    %22 = vector.shape_cast %21 : vector<1x6x64xbf16> to vector<6x64xbf16>
    %cst_24 = arith.constant dense<0.000000e+00> : vector<128x64xf32>
    %23 = tpu.matmul %0, %22, %cst_24 {dimension_numbers = #tpu.dot_dimension_numbers<[1], [0], [0], [1], [0, 0, 1, 1], [], []>} : vector<128x6xbf16>, vector<6x64xbf16>, vector<128x64xf32> -> vector<128x64xf32>
    %c3_25 = arith.constant 3 : index
    %c0_26 = arith.constant 0 : index
    %c0_27 = arith.constant 0 : index
    %24 = vector.load %arg1[%c3_25, %c0_26, %c0_27] : memref<4x64x128xf32, #tpu.memory_space<vmem>>, vector<1x64x128xf32>
    %25 = vector.shape_cast %24 : vector<1x64x128xf32> to vector<64x128xf32>
    %cst_28 = arith.constant dense<0.000000e+00> : vector<64x64xf32>
    %26 = tpu.matmul %25, %23, %cst_28 {dimension_numbers = #tpu.dot_dimension_numbers<[1], [0], [0], [1], [0, 0, 1, 1], [], []>} : vector<64x128xf32>, vector<128x64xf32>, vector<64x64xf32> -> vector<64x64xf32>
    %27 = arith.addf %20, %26 : vector<64x64xf32>
    %c0_29 = arith.constant 0 : index
    %c0_30 = arith.constant 0 : index
    %28 = vector.load %arg3[%c0_29, %c0_30] : memref<1x64xf32, #tpu.memory_space<vmem>>, vector<1x64xf32>
    %29 = vector.broadcast %28 : vector<1x64xf32> to vector<64x64xf32>
    %30 = arith.addf %27, %29 : vector<64x64xf32>
    %cst_31 = arith.constant 0.000000e+00 : f32
    %31 = vector.broadcast %cst_31 : f32 to vector<64x64xf32>
    %32 = arith.cmpf ogt, %30, %31 : vector<64x64xf32>
    %cst_32 = arith.constant 2.000000e-01 : f32
    %33 = vector.broadcast %cst_32 : f32 to vector<64x64xf32>
    %34 = arith.mulf %33, %30 : vector<64x64xf32>
    %35 = arith.select %32, %30, %34 : vector<64x64xi1>, vector<64x64xf32>
    %36 = arith.truncf %35 : vector<64x64xf32> to vector<64x64xbf16>
    %c0_33 = arith.constant 0 : index
    %c0_34 = arith.constant 0 : index
    %c0_35 = arith.constant 0 : index
    %37 = vector.load %arg6[%c0_33, %c0_34, %c0_35] : memref<4x64x128xbf16, #tpu.memory_space<vmem>>, vector<1x64x128xbf16>
    %38 = vector.shape_cast %37 : vector<1x64x128xbf16> to vector<64x128xbf16>
    %cst_36 = arith.constant dense<0.000000e+00> : vector<64x128xf32>
    %39 = tpu.matmul %36, %38, %cst_36 {dimension_numbers = #tpu.dot_dimension_numbers<[1], [0], [0], [1], [0, 0, 1, 1], [], []>} : vector<64x64xbf16>, vector<64x128xbf16>, vector<64x128xf32> -> vector<64x128xf32>
    %c0_37 = arith.constant 0 : index
    %c0_38 = arith.constant 0 : index
    %c0_39 = arith.constant 0 : index
    %40 = vector.load %arg5[%c0_37, %c0_38, %c0_39] : memref<4x32x64xf32, #tpu.memory_space<vmem>>, vector<1x32x64xf32>
    %41 = vector.shape_cast %40 : vector<1x32x64xf32> to vector<32x64xf32>
    %cst_40 = arith.constant dense<0.000000e+00> : vector<32x128xf32>
    %42 = tpu.matmul %41, %39, %cst_40 {dimension_numbers = #tpu.dot_dimension_numbers<[1], [0], [0], [1], [0, 0, 1, 1], [], []>} : vector<32x64xf32>, vector<64x128xf32>, vector<32x128xf32> -> vector<32x128xf32>
    %c1_41 = arith.constant 1 : index
    %c0_42 = arith.constant 0 : index
    %c0_43 = arith.constant 0 : index
    %43 = vector.load %arg6[%c1_41, %c0_42, %c0_43] : memref<4x64x128xbf16, #tpu.memory_space<vmem>>, vector<1x64x128xbf16>
    %44 = vector.shape_cast %43 : vector<1x64x128xbf16> to vector<64x128xbf16>
    %cst_44 = arith.constant dense<0.000000e+00> : vector<64x128xf32>
    %45 = tpu.matmul %36, %44, %cst_44 {dimension_numbers = #tpu.dot_dimension_numbers<[1], [0], [0], [1], [0, 0, 1, 1], [], []>} : vector<64x64xbf16>, vector<64x128xbf16>, vector<64x128xf32> -> vector<64x128xf32>
    %c1_45 = arith.constant 1 : index
    %c0_46 = arith.constant 0 : index
    %c0_47 = arith.constant 0 : index
    %46 = vector.load %arg5[%c1_45, %c0_46, %c0_47] : memref<4x32x64xf32, #tpu.memory_space<vmem>>, vector<1x32x64xf32>
    %47 = vector.shape_cast %46 : vector<1x32x64xf32> to vector<32x64xf32>
    %cst_48 = arith.constant dense<0.000000e+00> : vector<32x128xf32>
    %48 = tpu.matmul %47, %45, %cst_48 {dimension_numbers = #tpu.dot_dimension_numbers<[1], [0], [0], [1], [0, 0, 1, 1], [], []>} : vector<32x64xf32>, vector<64x128xf32>, vector<32x128xf32> -> vector<32x128xf32>
    %49 = arith.addf %42, %48 : vector<32x128xf32>
    %c2_49 = arith.constant 2 : index
    %c0_50 = arith.constant 0 : index
    %c0_51 = arith.constant 0 : index
    %50 = vector.load %arg6[%c2_49, %c0_50, %c0_51] : memref<4x64x128xbf16, #tpu.memory_space<vmem>>, vector<1x64x128xbf16>
    %51 = vector.shape_cast %50 : vector<1x64x128xbf16> to vector<64x128xbf16>
    %cst_52 = arith.constant dense<0.000000e+00> : vector<64x128xf32>
    %52 = tpu.matmul %36, %51, %cst_52 {dimension_numbers = #tpu.dot_dimension_numbers<[1], [0], [0], [1], [0, 0, 1, 1], [], []>} : vector<64x64xbf16>, vector<64x128xbf16>, vector<64x128xf32> -> vector<64x128xf32>
    %c2_53 = arith.constant 2 : index
    %c0_54 = arith.constant 0 : index
    %c0_55 = arith.constant 0 : index
    %53 = vector.load %arg5[%c2_53, %c0_54, %c0_55] : memref<4x32x64xf32, #tpu.memory_space<vmem>>, vector<1x32x64xf32>
    %54 = vector.shape_cast %53 : vector<1x32x64xf32> to vector<32x64xf32>
    %cst_56 = arith.constant dense<0.000000e+00> : vector<32x128xf32>
    %55 = tpu.matmul %54, %52, %cst_56 {dimension_numbers = #tpu.dot_dimension_numbers<[1], [0], [0], [1], [0, 0, 1, 1], [], []>} : vector<32x64xf32>, vector<64x128xf32>, vector<32x128xf32> -> vector<32x128xf32>
    %56 = arith.addf %49, %55 : vector<32x128xf32>
    %c3_57 = arith.constant 3 : index
    %c0_58 = arith.constant 0 : index
    %c0_59 = arith.constant 0 : index
    %57 = vector.load %arg6[%c3_57, %c0_58, %c0_59] : memref<4x64x128xbf16, #tpu.memory_space<vmem>>, vector<1x64x128xbf16>
    %58 = vector.shape_cast %57 : vector<1x64x128xbf16> to vector<64x128xbf16>
    %cst_60 = arith.constant dense<0.000000e+00> : vector<64x128xf32>
    %59 = tpu.matmul %36, %58, %cst_60 {dimension_numbers = #tpu.dot_dimension_numbers<[1], [0], [0], [1], [0, 0, 1, 1], [], []>} : vector<64x64xbf16>, vector<64x128xbf16>, vector<64x128xf32> -> vector<64x128xf32>
    %c3_61 = arith.constant 3 : index
    %c0_62 = arith.constant 0 : index
    %c0_63 = arith.constant 0 : index
    %60 = vector.load %arg5[%c3_61, %c0_62, %c0_63] : memref<4x32x64xf32, #tpu.memory_space<vmem>>, vector<1x32x64xf32>
    %61 = vector.shape_cast %60 : vector<1x32x64xf32> to vector<32x64xf32>
    %cst_64 = arith.constant dense<0.000000e+00> : vector<32x128xf32>
    %62 = tpu.matmul %61, %59, %cst_64 {dimension_numbers = #tpu.dot_dimension_numbers<[1], [0], [0], [1], [0, 0, 1, 1], [], []>} : vector<32x64xf32>, vector<64x128xf32>, vector<32x128xf32> -> vector<32x128xf32>
    %63 = arith.addf %56, %62 : vector<32x128xf32>
    %cst_65 = arith.constant dense<0.000000e+00> : vector<128xf32>
    %64 = vector.multi_reduction <add>, %63, %cst_65 [0] : vector<32x128xf32> to vector<128xf32>
    %65 = vector.shape_cast %64 : vector<128xf32> to vector<1x128xf32>
    %cst_66 = arith.constant 3.125000e-02 : f32
    %66 = vector.broadcast %cst_66 : f32 to vector<1x128xf32>
    %67 = arith.mulf %65, %66 : vector<1x128xf32>
    %68 = arith.mulf %63, %63 : vector<32x128xf32>
    %cst_67 = arith.constant dense<0.000000e+00> : vector<128xf32>
    %69 = vector.multi_reduction <add>, %68, %cst_67 [0] : vector<32x128xf32> to vector<128xf32>
    %70 = vector.shape_cast %69 : vector<128xf32> to vector<1x128xf32>
    %cst_68 = arith.constant 3.125000e-02 : f32
    %71 = vector.broadcast %cst_68 : f32 to vector<1x128xf32>
    %72 = arith.mulf %70, %71 : vector<1x128xf32>
    %73 = arith.mulf %67, %67 : vector<1x128xf32>
    %74 = arith.subf %72, %73 : vector<1x128xf32>
    %cst_69 = arith.constant 0.000000e+00 : f32
    %75 = vector.broadcast %cst_69 : f32 to vector<1x128xf32>
    %76 = arith.maximumf %74, %75 : vector<1x128xf32>
    %77 = vector.broadcast %67 : vector<1x128xf32> to vector<32x128xf32>
    %78 = arith.subf %63, %77 : vector<32x128xf32>
    %cst_70 = arith.constant 9.99999974E-6 : f32
    %79 = vector.broadcast %cst_70 : f32 to vector<1x128xf32>
    %80 = arith.addf %76, %79 : vector<1x128xf32>
    %81 = math.rsqrt %80 : vector<1x128xf32>
    %82 = vector.broadcast %81 : vector<1x128xf32> to vector<32x128xf32>
    %83 = arith.mulf %78, %82 : vector<32x128xf32>
    %c0_71 = arith.constant 0 : index
    %c0_72 = arith.constant 0 : index
    %84 = vector.load %arg7[%c0_71, %c0_72] : memref<1x128xf32, #tpu.memory_space<vmem>>, vector<1x128xf32>
    %85 = vector.broadcast %84 : vector<1x128xf32> to vector<32x128xf32>
    %86 = arith.mulf %83, %85 : vector<32x128xf32>
    %c0_73 = arith.constant 0 : index
    %c0_74 = arith.constant 0 : index
    %87 = vector.load %arg8[%c0_73, %c0_74] : memref<1x128xf32, #tpu.memory_space<vmem>>, vector<1x128xf32>
    %88 = vector.broadcast %87 : vector<1x128xf32> to vector<32x128xf32>
    %89 = arith.addf %86, %88 : vector<32x128xf32>
    %cst_75 = arith.constant 0.000000e+00 : f32
    %90 = vector.broadcast %cst_75 : f32 to vector<32x128xf32>
    %91 = arith.cmpf ogt, %89, %90 : vector<32x128xf32>
    %cst_76 = arith.constant 2.000000e-01 : f32
    %92 = vector.broadcast %cst_76 : f32 to vector<32x128xf32>
    %93 = arith.mulf %92, %89 : vector<32x128xf32>
    %94 = arith.select %91, %89, %93 : vector<32x128xi1>, vector<32x128xf32>
    %95 = arith.truncf %94 : vector<32x128xf32> to vector<32x128xbf16>
    %c0_77 = arith.constant 0 : index
    %c0_78 = arith.constant 0 : index
    %c0_79 = arith.constant 0 : index
    %96 = vector.load %arg10[%c0_77, %c0_78, %c0_79] : memref<4x128x256xbf16, #tpu.memory_space<vmem>>, vector<1x128x256xbf16>
    %97 = vector.shape_cast %96 : vector<1x128x256xbf16> to vector<128x256xbf16>
    %cst_80 = arith.constant dense<0.000000e+00> : vector<32x256xf32>
    %98 = tpu.matmul %95, %97, %cst_80 {dimension_numbers = #tpu.dot_dimension_numbers<[1], [0], [0], [1], [0, 0, 1, 1], [], []>} : vector<32x128xbf16>, vector<128x256xbf16>, vector<32x256xf32> -> vector<32x256xf32>
    %c0_81 = arith.constant 0 : index
    %c0_82 = arith.constant 0 : index
    %c0_83 = arith.constant 0 : index
    %99 = vector.load %arg9[%c0_81, %c0_82, %c0_83] : memref<4x16x32xf32, #tpu.memory_space<vmem>>, vector<1x16x32xf32>
    %100 = vector.shape_cast %99 : vector<1x16x32xf32> to vector<16x32xf32>
    %cst_84 = arith.constant dense<0.000000e+00> : vector<16x256xf32>
    %101 = tpu.matmul %100, %98, %cst_84 {dimension_numbers = #tpu.dot_dimension_numbers<[1], [0], [0], [1], [0, 0, 1, 1], [], []>} : vector<16x32xf32>, vector<32x256xf32>, vector<16x256xf32> -> vector<16x256xf32>
    %c1_85 = arith.constant 1 : index
    %c0_86 = arith.constant 0 : index
    %c0_87 = arith.constant 0 : index
    %102 = vector.load %arg10[%c1_85, %c0_86, %c0_87] : memref<4x128x256xbf16, #tpu.memory_space<vmem>>, vector<1x128x256xbf16>
    %103 = vector.shape_cast %102 : vector<1x128x256xbf16> to vector<128x256xbf16>
    %cst_88 = arith.constant dense<0.000000e+00> : vector<32x256xf32>
    %104 = tpu.matmul %95, %103, %cst_88 {dimension_numbers = #tpu.dot_dimension_numbers<[1], [0], [0], [1], [0, 0, 1, 1], [], []>} : vector<32x128xbf16>, vector<128x256xbf16>, vector<32x256xf32> -> vector<32x256xf32>
    %c1_89 = arith.constant 1 : index
    %c0_90 = arith.constant 0 : index
    %c0_91 = arith.constant 0 : index
    %105 = vector.load %arg9[%c1_89, %c0_90, %c0_91] : memref<4x16x32xf32, #tpu.memory_space<vmem>>, vector<1x16x32xf32>
    %106 = vector.shape_cast %105 : vector<1x16x32xf32> to vector<16x32xf32>
    %cst_92 = arith.constant dense<0.000000e+00> : vector<16x256xf32>
    %107 = tpu.matmul %106, %104, %cst_92 {dimension_numbers = #tpu.dot_dimension_numbers<[1], [0], [0], [1], [0, 0, 1, 1], [], []>} : vector<16x32xf32>, vector<32x256xf32>, vector<16x256xf32> -> vector<16x256xf32>
    %108 = arith.addf %101, %107 : vector<16x256xf32>
    %c2_93 = arith.constant 2 : index
    %c0_94 = arith.constant 0 : index
    %c0_95 = arith.constant 0 : index
    %109 = vector.load %arg10[%c2_93, %c0_94, %c0_95] : memref<4x128x256xbf16, #tpu.memory_space<vmem>>, vector<1x128x256xbf16>
    %110 = vector.shape_cast %109 : vector<1x128x256xbf16> to vector<128x256xbf16>
    %cst_96 = arith.constant dense<0.000000e+00> : vector<32x256xf32>
    %111 = tpu.matmul %95, %110, %cst_96 {dimension_numbers = #tpu.dot_dimension_numbers<[1], [0], [0], [1], [0, 0, 1, 1], [], []>} : vector<32x128xbf16>, vector<128x256xbf16>, vector<32x256xf32> -> vector<32x256xf32>
    %c2_97 = arith.constant 2 : index
    %c0_98 = arith.constant 0 : index
    %c0_99 = arith.constant 0 : index
    %112 = vector.load %arg9[%c2_97, %c0_98, %c0_99] : memref<4x16x32xf32, #tpu.memory_space<vmem>>, vector<1x16x32xf32>
    %113 = vector.shape_cast %112 : vector<1x16x32xf32> to vector<16x32xf32>
    %cst_100 = arith.constant dense<0.000000e+00> : vector<16x256xf32>
    %114 = tpu.matmul %113, %111, %cst_100 {dimension_numbers = #tpu.dot_dimension_numbers<[1], [0], [0], [1], [0, 0, 1, 1], [], []>} : vector<16x32xf32>, vector<32x256xf32>, vector<16x256xf32> -> vector<16x256xf32>
    %115 = arith.addf %108, %114 : vector<16x256xf32>
    %c3_101 = arith.constant 3 : index
    %c0_102 = arith.constant 0 : index
    %c0_103 = arith.constant 0 : index
    %116 = vector.load %arg10[%c3_101, %c0_102, %c0_103] : memref<4x128x256xbf16, #tpu.memory_space<vmem>>, vector<1x128x256xbf16>
    %117 = vector.shape_cast %116 : vector<1x128x256xbf16> to vector<128x256xbf16>
    %cst_104 = arith.constant dense<0.000000e+00> : vector<32x256xf32>
    %118 = tpu.matmul %95, %117, %cst_104 {dimension_numbers = #tpu.dot_dimension_numbers<[1], [0], [0], [1], [0, 0, 1, 1], [], []>} : vector<32x128xbf16>, vector<128x256xbf16>, vector<32x256xf32> -> vector<32x256xf32>
    %c3_105 = arith.constant 3 : index
    %c0_106 = arith.constant 0 : index
    %c0_107 = arith.constant 0 : index
    %119 = vector.load %arg9[%c3_105, %c0_106, %c0_107] : memref<4x16x32xf32, #tpu.memory_space<vmem>>, vector<1x16x32xf32>
    %120 = vector.shape_cast %119 : vector<1x16x32xf32> to vector<16x32xf32>
    %cst_108 = arith.constant dense<0.000000e+00> : vector<16x256xf32>
    %121 = tpu.matmul %120, %118, %cst_108 {dimension_numbers = #tpu.dot_dimension_numbers<[1], [0], [0], [1], [0, 0, 1, 1], [], []>} : vector<16x32xf32>, vector<32x256xf32>, vector<16x256xf32> -> vector<16x256xf32>
    %122 = arith.addf %115, %121 : vector<16x256xf32>
    %cst_109 = arith.constant dense<0.000000e+00> : vector<256xf32>
    %123 = vector.multi_reduction <add>, %122, %cst_109 [0] : vector<16x256xf32> to vector<256xf32>
    %124 = vector.shape_cast %123 : vector<256xf32> to vector<1x256xf32>
    %cst_110 = arith.constant 6.250000e-02 : f32
    %125 = vector.broadcast %cst_110 : f32 to vector<1x256xf32>
    %126 = arith.mulf %124, %125 : vector<1x256xf32>
    %127 = arith.mulf %122, %122 : vector<16x256xf32>
    %cst_111 = arith.constant dense<0.000000e+00> : vector<256xf32>
    %128 = vector.multi_reduction <add>, %127, %cst_111 [0] : vector<16x256xf32> to vector<256xf32>
    %129 = vector.shape_cast %128 : vector<256xf32> to vector<1x256xf32>
    %cst_112 = arith.constant 6.250000e-02 : f32
    %130 = vector.broadcast %cst_112 : f32 to vector<1x256xf32>
    %131 = arith.mulf %129, %130 : vector<1x256xf32>
    %132 = arith.mulf %126, %126 : vector<1x256xf32>
    %133 = arith.subf %131, %132 : vector<1x256xf32>
    %cst_113 = arith.constant 0.000000e+00 : f32
    %134 = vector.broadcast %cst_113 : f32 to vector<1x256xf32>
    %135 = arith.maximumf %133, %134 : vector<1x256xf32>
    %136 = vector.broadcast %126 : vector<1x256xf32> to vector<16x256xf32>
    %137 = arith.subf %122, %136 : vector<16x256xf32>
    %cst_114 = arith.constant 9.99999974E-6 : f32
    %138 = vector.broadcast %cst_114 : f32 to vector<1x256xf32>
    %139 = arith.addf %135, %138 : vector<1x256xf32>
    %140 = math.rsqrt %139 : vector<1x256xf32>
    %141 = vector.broadcast %140 : vector<1x256xf32> to vector<16x256xf32>
    %142 = arith.mulf %137, %141 : vector<16x256xf32>
    %c0_115 = arith.constant 0 : index
    %c0_116 = arith.constant 0 : index
    %143 = vector.load %arg11[%c0_115, %c0_116] : memref<1x256xf32, #tpu.memory_space<vmem>>, vector<1x256xf32>
    %144 = vector.broadcast %143 : vector<1x256xf32> to vector<16x256xf32>
    %145 = arith.mulf %142, %144 : vector<16x256xf32>
    %c0_117 = arith.constant 0 : index
    %c0_118 = arith.constant 0 : index
    %146 = vector.load %arg12[%c0_117, %c0_118] : memref<1x256xf32, #tpu.memory_space<vmem>>, vector<1x256xf32>
    %147 = vector.broadcast %146 : vector<1x256xf32> to vector<16x256xf32>
    %148 = arith.addf %145, %147 : vector<16x256xf32>
    %cst_119 = arith.constant 0.000000e+00 : f32
    %149 = vector.broadcast %cst_119 : f32 to vector<16x256xf32>
    %150 = arith.cmpf ogt, %148, %149 : vector<16x256xf32>
    %cst_120 = arith.constant 2.000000e-01 : f32
    %151 = vector.broadcast %cst_120 : f32 to vector<16x256xf32>
    %152 = arith.mulf %151, %148 : vector<16x256xf32>
    %153 = arith.select %150, %148, %152 : vector<16x256xi1>, vector<16x256xf32>
    %154 = arith.truncf %153 : vector<16x256xf32> to vector<16x256xbf16>
    %c0_121 = arith.constant 0 : index
    %c0_122 = arith.constant 0 : index
    %c0_123 = arith.constant 0 : index
    %155 = vector.load %arg14[%c0_121, %c0_122, %c0_123] : memref<4x256x256xbf16, #tpu.memory_space<vmem>>, vector<1x256x256xbf16>
    %156 = vector.shape_cast %155 : vector<1x256x256xbf16> to vector<256x256xbf16>
    %cst_124 = arith.constant dense<0.000000e+00> : vector<16x256xf32>
    %157 = tpu.matmul %154, %156, %cst_124 {dimension_numbers = #tpu.dot_dimension_numbers<[1], [0], [0], [1], [0, 0, 1, 1], [], []>} : vector<16x256xbf16>, vector<256x256xbf16>, vector<16x256xf32> -> vector<16x256xf32>
    %c0_125 = arith.constant 0 : index
    %c0_126 = arith.constant 0 : index
    %c0_127 = arith.constant 0 : index
    %158 = vector.load %arg13[%c0_125, %c0_126, %c0_127] : memref<4x16x16xf32, #tpu.memory_space<vmem>>, vector<1x16x16xf32>
    %159 = vector.shape_cast %158 : vector<1x16x16xf32> to vector<16x16xf32>
    %cst_128 = arith.constant dense<0.000000e+00> : vector<16x256xf32>
    %160 = tpu.matmul %159, %157, %cst_128 {dimension_numbers = #tpu.dot_dimension_numbers<[1], [0], [0], [1], [0, 0, 1, 1], [], []>} : vector<16x16xf32>, vector<16x256xf32>, vector<16x256xf32> -> vector<16x256xf32>
    %c1_129 = arith.constant 1 : index
    %c0_130 = arith.constant 0 : index
    %c0_131 = arith.constant 0 : index
    %161 = vector.load %arg14[%c1_129, %c0_130, %c0_131] : memref<4x256x256xbf16, #tpu.memory_space<vmem>>, vector<1x256x256xbf16>
    %162 = vector.shape_cast %161 : vector<1x256x256xbf16> to vector<256x256xbf16>
    %cst_132 = arith.constant dense<0.000000e+00> : vector<16x256xf32>
    %163 = tpu.matmul %154, %162, %cst_132 {dimension_numbers = #tpu.dot_dimension_numbers<[1], [0], [0], [1], [0, 0, 1, 1], [], []>} : vector<16x256xbf16>, vector<256x256xbf16>, vector<16x256xf32> -> vector<16x256xf32>
    %c1_133 = arith.constant 1 : index
    %c0_134 = arith.constant 0 : index
    %c0_135 = arith.constant 0 : index
    %164 = vector.load %arg13[%c1_133, %c0_134, %c0_135] : memref<4x16x16xf32, #tpu.memory_space<vmem>>, vector<1x16x16xf32>
    %165 = vector.shape_cast %164 : vector<1x16x16xf32> to vector<16x16xf32>
    %cst_136 = arith.constant dense<0.000000e+00> : vector<16x256xf32>
    %166 = tpu.matmul %165, %163, %cst_136 {dimension_numbers = #tpu.dot_dimension_numbers<[1], [0], [0], [1], [0, 0, 1, 1], [], []>} : vector<16x16xf32>, vector<16x256xf32>, vector<16x256xf32> -> vector<16x256xf32>
    %167 = arith.addf %160, %166 : vector<16x256xf32>
    %c2_137 = arith.constant 2 : index
    %c0_138 = arith.constant 0 : index
    %c0_139 = arith.constant 0 : index
    %168 = vector.load %arg14[%c2_137, %c0_138, %c0_139] : memref<4x256x256xbf16, #tpu.memory_space<vmem>>, vector<1x256x256xbf16>
    %169 = vector.shape_cast %168 : vector<1x256x256xbf16> to vector<256x256xbf16>
    %cst_140 = arith.constant dense<0.000000e+00> : vector<16x256xf32>
    %170 = tpu.matmul %154, %169, %cst_140 {dimension_numbers = #tpu.dot_dimension_numbers<[1], [0], [0], [1], [0, 0, 1, 1], [], []>} : vector<16x256xbf16>, vector<256x256xbf16>, vector<16x256xf32> -> vector<16x256xf32>
    %c2_141 = arith.constant 2 : index
    %c0_142 = arith.constant 0 : index
    %c0_143 = arith.constant 0 : index
    %171 = vector.load %arg13[%c2_141, %c0_142, %c0_143] : memref<4x16x16xf32, #tpu.memory_space<vmem>>, vector<1x16x16xf32>
    %172 = vector.shape_cast %171 : vector<1x16x16xf32> to vector<16x16xf32>
    %cst_144 = arith.constant dense<0.000000e+00> : vector<16x256xf32>
    %173 = tpu.matmul %172, %170, %cst_144 {dimension_numbers = #tpu.dot_dimension_numbers<[1], [0], [0], [1], [0, 0, 1, 1], [], []>} : vector<16x16xf32>, vector<16x256xf32>, vector<16x256xf32> -> vector<16x256xf32>
    %174 = arith.addf %167, %173 : vector<16x256xf32>
    %c3_145 = arith.constant 3 : index
    %c0_146 = arith.constant 0 : index
    %c0_147 = arith.constant 0 : index
    %175 = vector.load %arg14[%c3_145, %c0_146, %c0_147] : memref<4x256x256xbf16, #tpu.memory_space<vmem>>, vector<1x256x256xbf16>
    %176 = vector.shape_cast %175 : vector<1x256x256xbf16> to vector<256x256xbf16>
    %cst_148 = arith.constant dense<0.000000e+00> : vector<16x256xf32>
    %177 = tpu.matmul %154, %176, %cst_148 {dimension_numbers = #tpu.dot_dimension_numbers<[1], [0], [0], [1], [0, 0, 1, 1], [], []>} : vector<16x256xbf16>, vector<256x256xbf16>, vector<16x256xf32> -> vector<16x256xf32>
    %c3_149 = arith.constant 3 : index
    %c0_150 = arith.constant 0 : index
    %c0_151 = arith.constant 0 : index
    %178 = vector.load %arg13[%c3_149, %c0_150, %c0_151] : memref<4x16x16xf32, #tpu.memory_space<vmem>>, vector<1x16x16xf32>
    %179 = vector.shape_cast %178 : vector<1x16x16xf32> to vector<16x16xf32>
    %cst_152 = arith.constant dense<0.000000e+00> : vector<16x256xf32>
    %180 = tpu.matmul %179, %177, %cst_152 {dimension_numbers = #tpu.dot_dimension_numbers<[1], [0], [0], [1], [0, 0, 1, 1], [], []>} : vector<16x16xf32>, vector<16x256xf32>, vector<16x256xf32> -> vector<16x256xf32>
    %181 = arith.addf %174, %180 : vector<16x256xf32>
    %cst_153 = arith.constant dense<0.000000e+00> : vector<256xf32>
    %182 = vector.multi_reduction <add>, %181, %cst_153 [0] : vector<16x256xf32> to vector<256xf32>
    %183 = vector.shape_cast %182 : vector<256xf32> to vector<1x256xf32>
    %cst_154 = arith.constant 0.0714285746 : f32
    %184 = vector.broadcast %cst_154 : f32 to vector<1x256xf32>
    %185 = arith.mulf %183, %184 : vector<1x256xf32>
    %186 = arith.mulf %181, %181 : vector<16x256xf32>
    %cst_155 = arith.constant dense<0.000000e+00> : vector<256xf32>
    %187 = vector.multi_reduction <add>, %186, %cst_155 [0] : vector<16x256xf32> to vector<256xf32>
    %188 = vector.shape_cast %187 : vector<256xf32> to vector<1x256xf32>
    %cst_156 = arith.constant 0.0714285746 : f32
    %189 = vector.broadcast %cst_156 : f32 to vector<1x256xf32>
    %190 = arith.mulf %188, %189 : vector<1x256xf32>
    %191 = arith.mulf %185, %185 : vector<1x256xf32>
    %192 = arith.subf %190, %191 : vector<1x256xf32>
    %cst_157 = arith.constant 0.000000e+00 : f32
    %193 = vector.broadcast %cst_157 : f32 to vector<1x256xf32>
    %194 = arith.maximumf %192, %193 : vector<1x256xf32>
    %195 = vector.broadcast %185 : vector<1x256xf32> to vector<16x256xf32>
    %196 = arith.subf %181, %195 : vector<16x256xf32>
    %cst_158 = arith.constant 9.99999974E-6 : f32
    %197 = vector.broadcast %cst_158 : f32 to vector<1x256xf32>
    %198 = arith.addf %194, %197 : vector<1x256xf32>
    %199 = math.rsqrt %198 : vector<1x256xf32>
    %200 = vector.broadcast %199 : vector<1x256xf32> to vector<16x256xf32>
    %201 = arith.mulf %196, %200 : vector<16x256xf32>
    %c0_159 = arith.constant 0 : index
    %c0_160 = arith.constant 0 : index
    %202 = vector.load %arg15[%c0_159, %c0_160] : memref<1x256xf32, #tpu.memory_space<vmem>>, vector<1x256xf32>
    %203 = vector.broadcast %202 : vector<1x256xf32> to vector<16x256xf32>
    %204 = arith.mulf %201, %203 : vector<16x256xf32>
    %c0_161 = arith.constant 0 : index
    %c0_162 = arith.constant 0 : index
    %205 = vector.load %arg16[%c0_161, %c0_162] : memref<1x256xf32, #tpu.memory_space<vmem>>, vector<1x256xf32>
    %206 = vector.broadcast %205 : vector<1x256xf32> to vector<16x256xf32>
    %207 = arith.addf %204, %206 : vector<16x256xf32>
    %cst_163 = arith.constant 0.000000e+00 : f32
    %208 = vector.broadcast %cst_163 : f32 to vector<16x256xf32>
    %209 = arith.cmpf ogt, %207, %208 : vector<16x256xf32>
    %cst_164 = arith.constant 2.000000e-01 : f32
    %210 = vector.broadcast %cst_164 : f32 to vector<16x256xf32>
    %211 = arith.mulf %210, %207 : vector<16x256xf32>
    %212 = arith.select %209, %207, %211 : vector<16x256xi1>, vector<16x256xf32>
    %213 = arith.truncf %212 : vector<16x256xf32> to vector<16x256xbf16>
    %c0_165 = arith.constant 0 : index
    %c0_166 = arith.constant 0 : index
    %c0_167 = arith.constant 0 : index
    %214 = vector.load %arg18[%c0_165, %c0_166, %c0_167] : memref<4x256x128xbf16, #tpu.memory_space<vmem>>, vector<1x256x128xbf16>
    %215 = vector.shape_cast %214 : vector<1x256x128xbf16> to vector<256x128xbf16>
    %cst_168 = arith.constant dense<0.000000e+00> : vector<16x128xf32>
    %216 = tpu.matmul %213, %215, %cst_168 {dimension_numbers = #tpu.dot_dimension_numbers<[1], [0], [0], [1], [0, 0, 1, 1], [], []>} : vector<16x256xbf16>, vector<256x128xbf16>, vector<16x128xf32> -> vector<16x128xf32>
    %c0_169 = arith.constant 0 : index
    %c0_170 = arith.constant 0 : index
    %c0_171 = arith.constant 0 : index
    %217 = vector.load %arg17[%c0_169, %c0_170, %c0_171] : memref<4x16x16xf32, #tpu.memory_space<vmem>>, vector<1x16x16xf32>
    %218 = vector.shape_cast %217 : vector<1x16x16xf32> to vector<16x16xf32>
    %cst_172 = arith.constant dense<0.000000e+00> : vector<16x128xf32>
    %219 = tpu.matmul %218, %216, %cst_172 {dimension_numbers = #tpu.dot_dimension_numbers<[1], [0], [0], [1], [0, 0, 1, 1], [], []>} : vector<16x16xf32>, vector<16x128xf32>, vector<16x128xf32> -> vector<16x128xf32>
    %c1_173 = arith.constant 1 : index
    %c0_174 = arith.constant 0 : index
    %c0_175 = arith.constant 0 : index
    %220 = vector.load %arg18[%c1_173, %c0_174, %c0_175] : memref<4x256x128xbf16, #tpu.memory_space<vmem>>, vector<1x256x128xbf16>
    %221 = vector.shape_cast %220 : vector<1x256x128xbf16> to vector<256x128xbf16>
    %cst_176 = arith.constant dense<0.000000e+00> : vector<16x128xf32>
    %222 = tpu.matmul %213, %221, %cst_176 {dimension_numbers = #tpu.dot_dimension_numbers<[1], [0], [0], [1], [0, 0, 1, 1], [], []>} : vector<16x256xbf16>, vector<256x128xbf16>, vector<16x128xf32> -> vector<16x128xf32>
    %c1_177 = arith.constant 1 : index
    %c0_178 = arith.constant 0 : index
    %c0_179 = arith.constant 0 : index
    %223 = vector.load %arg17[%c1_177, %c0_178, %c0_179] : memref<4x16x16xf32, #tpu.memory_space<vmem>>, vector<1x16x16xf32>
    %224 = vector.shape_cast %223 : vector<1x16x16xf32> to vector<16x16xf32>
    %cst_180 = arith.constant dense<0.000000e+00> : vector<16x128xf32>
    %225 = tpu.matmul %224, %222, %cst_180 {dimension_numbers = #tpu.dot_dimension_numbers<[1], [0], [0], [1], [0, 0, 1, 1], [], []>} : vector<16x16xf32>, vector<16x128xf32>, vector<16x128xf32> -> vector<16x128xf32>
    %226 = arith.addf %219, %225 : vector<16x128xf32>
    %c2_181 = arith.constant 2 : index
    %c0_182 = arith.constant 0 : index
    %c0_183 = arith.constant 0 : index
    %227 = vector.load %arg18[%c2_181, %c0_182, %c0_183] : memref<4x256x128xbf16, #tpu.memory_space<vmem>>, vector<1x256x128xbf16>
    %228 = vector.shape_cast %227 : vector<1x256x128xbf16> to vector<256x128xbf16>
    %cst_184 = arith.constant dense<0.000000e+00> : vector<16x128xf32>
    %229 = tpu.matmul %213, %228, %cst_184 {dimension_numbers = #tpu.dot_dimension_numbers<[1], [0], [0], [1], [0, 0, 1, 1], [], []>} : vector<16x256xbf16>, vector<256x128xbf16>, vector<16x128xf32> -> vector<16x128xf32>
    %c2_185 = arith.constant 2 : index
    %c0_186 = arith.constant 0 : index
    %c0_187 = arith.constant 0 : index
    %230 = vector.load %arg17[%c2_185, %c0_186, %c0_187] : memref<4x16x16xf32, #tpu.memory_space<vmem>>, vector<1x16x16xf32>
    %231 = vector.shape_cast %230 : vector<1x16x16xf32> to vector<16x16xf32>
    %cst_188 = arith.constant dense<0.000000e+00> : vector<16x128xf32>
    %232 = tpu.matmul %231, %229, %cst_188 {dimension_numbers = #tpu.dot_dimension_numbers<[1], [0], [0], [1], [0, 0, 1, 1], [], []>} : vector<16x16xf32>, vector<16x128xf32>, vector<16x128xf32> -> vector<16x128xf32>
    %233 = arith.addf %226, %232 : vector<16x128xf32>
    %c3_189 = arith.constant 3 : index
    %c0_190 = arith.constant 0 : index
    %c0_191 = arith.constant 0 : index
    %234 = vector.load %arg18[%c3_189, %c0_190, %c0_191] : memref<4x256x128xbf16, #tpu.memory_space<vmem>>, vector<1x256x128xbf16>
    %235 = vector.shape_cast %234 : vector<1x256x128xbf16> to vector<256x128xbf16>
    %cst_192 = arith.constant dense<0.000000e+00> : vector<16x128xf32>
    %236 = tpu.matmul %213, %235, %cst_192 {dimension_numbers = #tpu.dot_dimension_numbers<[1], [0], [0], [1], [0, 0, 1, 1], [], []>} : vector<16x256xbf16>, vector<256x128xbf16>, vector<16x128xf32> -> vector<16x128xf32>
    %c3_193 = arith.constant 3 : index
    %c0_194 = arith.constant 0 : index
    %c0_195 = arith.constant 0 : index
    %237 = vector.load %arg17[%c3_193, %c0_194, %c0_195] : memref<4x16x16xf32, #tpu.memory_space<vmem>>, vector<1x16x16xf32>
    %238 = vector.shape_cast %237 : vector<1x16x16xf32> to vector<16x16xf32>
    %cst_196 = arith.constant dense<0.000000e+00> : vector<16x128xf32>
    %239 = tpu.matmul %238, %236, %cst_196 {dimension_numbers = #tpu.dot_dimension_numbers<[1], [0], [0], [1], [0, 0, 1, 1], [], []>} : vector<16x16xf32>, vector<16x128xf32>, vector<16x128xf32> -> vector<16x128xf32>
    %240 = arith.addf %233, %239 : vector<16x128xf32>
    %c0_197 = arith.constant 0 : index
    %c0_198 = arith.constant 0 : index
    %241 = vector.load %arg19[%c0_197, %c0_198] : memref<1x128xf32, #tpu.memory_space<vmem>>, vector<1x128xf32>
    %242 = vector.broadcast %241 : vector<1x128xf32> to vector<16x128xf32>
    %243 = arith.addf %240, %242 : vector<16x128xf32>
    %c0_199 = arith.constant 0 : index
    %c0_200 = arith.constant 0 : index
    %244 = vector.load %arg21[%c0_199, %c0_200] : memref<16x128xf32, #tpu.memory_space<vmem>>, vector<16x128xf32>
    tpu.vector_store %arg21[%c0_199, %c0_200], %243 {strides = array<i32>} : memref<16x128xf32, #tpu.memory_space<vmem>>, vector<16x128xf32>,
    return
  }
}

</mosaic_0001>

<bundles_post_ra>
// kernel: d_patchgan_forward.1
= control target key start
LH: loop header
LB: loop body
LE: loop exit
PB: predicated region body
PF: predicated region fallthrough
CT: control target
= control target key end

     0   :  { %s6727_s0 = inlined_call_operand.vmem [shape: bf16[128,6], index: 0, kind: input, shape index: {}]   ;;  %s6728_s1 = inlined_call_operand.hbm [shape: f32[4,64,128], index: 1, kind: input, shape index: {}]   ;;  %s6729_s2 = inlined_call_operand.vmem [shape: bf16[4,6,64], index: 2, kind: input, shape index: {}]   ;;  %s6730_s3 = inlined_call_operand.vmem [shape: f32[1,64], index: 3, kind: input, shape index: {}]   ;;  %s6731_s4 = inlined_call_operand.vmem [shape: f32[1,64], index: 4, kind: input, shape index: {}]   ;;  %s6732_s5 = inlined_call_operand.hbm [shape: f32[4,32,64], index: 5, kind: input, shape index: {}]   ;;  %s6733_s6 = inlined_call_operand.hbm [shape: bf16[4,64,128], index: 6, kind: input, shape index: {}]   ;;  %s6734_s7 = inlined_call_operand.vmem [shape: f32[1,128], index: 7, kind: input, shape index: {}]   ;;  %s6735_s8 = inlined_call_operand.vmem [shape: f32[1,128], index: 8, kind: input, shape index: {}]   ;;  %s6736_s9 = inlined_call_operand.hbm [shape: f32[4,16,32], index: 9, kind: input, shape index: {}]   ;;  %s6737_s10 = inlined_call_operand.hbm [shape: bf16[4,128,256], index: 10, kind: input, shape index: {}]   ;;  %s6738_s11 = inlined_call_operand.vmem [shape: f32[1,256], index: 11, kind: input, shape index: {}]   ;;  %s6739_s12 = inlined_call_operand.vmem [shape: f32[1,256], index: 12, kind: input, shape index: {}]   ;;  %s6740_s13 = inlined_call_operand.hbm [shape: f32[4,16,16], index: 13, kind: input, shape index: {}]   ;;  %s6741_s14 = inlined_call_operand.hbm [shape: bf16[4,256,256], index: 14, kind: input, shape index: {}]   ;;  %s6742_s15 = inlined_call_operand.vmem [shape: f32[1,256], index: 15, kind: input, shape index: {}]   ;;  %s6743_s16 = inlined_call_operand.vmem [shape: f32[1,256], index: 16, kind: input, shape index: {}]   ;;  %s6744_s17 = inlined_call_operand.vmem [shape: f32[4,16,16], index: 17, kind: input, shape index: {}]   ;;  %s6745_s18 = inlined_call_operand.hbm [shape: bf16[4,256,128], index: 18, kind: input, shape index: {}]   ;;  %s6746_s19 = inlined_call_operand.vmem [shape: f32[1,128], index: 19, kind: input, shape index: {}]   ;;  %s6747_s20 = inlined_call_operand.vmem [shape: f32[1,128], index: 20, kind: input, shape index: {}]   ;;  %s6748_s21 = inlined_call_operand.vmem [shape: f32[16,128], index: 21, kind: output, shape index: {}]  }
   0x1   :  { %6751 = sst [smem:[#allocation20_spill]] %s6727_s0 }
   0x2   :  { %6752 = sst [smem:[#allocation21_spill]] %s6728_s1 }
   0x3   :  { %6753 = sst [smem:[#allocation22_spill]] %s6729_s2 }
   0x4   :  { %6754 = sst [smem:[#allocation23_spill]] %s6730_s3 }
   0x5   :  { %6755 = sst [smem:[#allocation24_spill]] %s6732_s5 }
   0x6   :  { %26 = vsyncpa [#allocation3], 0 }
   0x7   :  { %27 = vsyncpa [#allocation5], 0 }
   0x8   :  { %28 = vsyncpa [#allocation8], 0 }
   0x9   :  { %29 = vsyncpa [#allocation11], 0 }
   0xa   :  { %30 = vsyncpa [#allocation14], 0  ;;  %s6756_s26 = sld [smem:[#allocation24_spill]]  ;;  %s5995_s3 = smov [#allocation4]  }
   0xb   :  { %s58_s28 = sshll.u32 %s5995_s3, 4  ;;  %s86_s20 = sshll.u32 %s6736_s9, 4  ;;  %s59_s28 = int_to_ptr.vmem [resolvable:$true] %s58_s28  ;;  %s87_s20 = int_to_ptr.hbm [resolvable:$true] %s86_s20 }
   0xc   :  { %s5996_s4 = smov 128   ;;  %s5997_s30 = smov 8  }
   0xd   :  { %s5998_s5 = smov [#allocation7]   ;;  %s116_s24 = sshll.u32 %s6740_s13, 4  ;;  %s117_s24 = int_to_ptr.hbm [resolvable:$true] %s116_s24 }
   0xe   :  { %s88_s22 = sshll.u32 %s5998_s5, 4  ;;  %s6757_s25 = sld [smem:[#allocation21_spill]]  ;;  %s89_s22 = int_to_ptr.vmem [resolvable:$true] %s88_s22 }
   0xf   :  { %94 = dma.hbm_to_vmem [thread:$0]  %s87_s20, 1024, %s89_s22, [#allocation8], %s5996_s4, %s5996_s4, %s5997_s30  }
  0x10   :  { %s56_s27 = sshll.u32 %s6756_s26, 4  ;;  %s5999_s3 = smov [#allocation10]   ;;  %s57_s27 = int_to_ptr.hbm [resolvable:$true] %s56_s27 }
  0x11   :  { %64 = dma.hbm_to_vmem [thread:$0]  %s57_s27, 2048, %s59_s28, [#allocation5], %s5996_s4, %s5996_s4, %s5997_s30  }
  0x12   :  { %s118_s29 = sshll.u32 %s5999_s3, 4  ;;  %s6000_s27 = smov [#allocation2]   ;;  %s119_s29 = int_to_ptr.vmem [resolvable:$true] %s118_s29 }
  0x13   :  { %124 = dma.hbm_to_vmem [thread:$0]  %s117_s24, 1024, %s119_s29, [#allocation11], %s5996_s4, %s5996_s4, %s5997_s30  }
  0x14   :  { %s37_s26 = sshll.u32 %s6757_s25, 4  ;;  %s39_s13 = sshll.u32 %s6000_s27, 4  ;;  %s38_s26 = int_to_ptr.hbm [resolvable:$true] %s37_s26  ;;  %s40_s13 = int_to_ptr.vmem [resolvable:$true] %s39_s13 }
  0x15   :  { %s69_s5 = sshll.u32 %s6733_s6, 4  ;;  %s6001_s20 = smov [#allocation6]   ;;  %s70_s5 = int_to_ptr.hbm [resolvable:$true] %s69_s5 }
  0x16   :  { %45 = dma.hbm_to_vmem [thread:$0]  %s38_s26, 4096, %s40_s13, [#allocation3], %s5996_s4, %s5996_s4, %s5997_s30  }
  0x17   :  { %s71_s22 = sshll.u32 %s6001_s20, 4  ;;  %s99_s9 = sshll.u32 %s6737_s10, 4  ;;  %s72_s22 = int_to_ptr.vmem [resolvable:$true] %s71_s22  ;;  %s100_s9 = int_to_ptr.hbm [resolvable:$true] %s99_s9 }
  0x18   :  { %s6002_s24 = smov 64   ;;  %s6003_s2 = smov 4  }
  0x19   :  { %77 = dma.hbm_to_vmem [thread:$0]  %s70_s5, 2048, %s72_s22, [#allocation5], %s6002_s24, %s6002_s24, %s6003_s2  }
  0x1a   :  { %s6004_s25 = smov [#allocation9]   ;;  %s129_s27 = sshll.u32 %s6741_s14, 4  ;;  %s130_s27 = int_to_ptr.hbm [resolvable:$true] %s129_s27 }
  0x1b   :  { %s101_s3 = sshll.u32 %s6004_s25, 4  ;;  %s148_s10 = sshll.u32 %s6745_s18, 4  ;;  %s102_s3 = int_to_ptr.vmem [resolvable:$true] %s101_s3  ;;  %s149_s10 = int_to_ptr.hbm [resolvable:$true] %s148_s10 }
  0x1c   :  { %107 = dma.hbm_to_vmem [thread:$0]  %s100_s9, 8192, %s102_s3, [#allocation8], %s5996_s4, %s5996_s4, %s5997_s30  }
  0x1d   :  { %s6005_s28 = smov [#allocation12]   ;;  %s6006_s5 = smov [#allocation13]  }
  0x1e   :  { %s131_s0 = sshll.u32 %s6005_s28, 4  ;;  %s150_s14 = sshll.u32 %s6006_s5, 4  ;;  %s132_s0 = int_to_ptr.vmem [resolvable:$true] %s131_s0  ;;  %s151_s14 = int_to_ptr.vmem [resolvable:$true] %s150_s14 }
  0x1f   :  { %137 = dma.hbm_to_vmem [thread:$0]  %s130_s27, 16384, %s132_s0, [#allocation11], %s5996_s4, %s5996_s4, %s5997_s30  }
  0x20   :  { %156 = dma.hbm_to_vmem [thread:$0]  %s149_s10, 8192, %s151_s14, [#allocation14], %s6002_s24, %s6002_s24, %s6003_s2  }
  0x21   :  { %5985 = dma.done.wait [#allocation3], 4096  }
  0x22   :  { %5986 = vsyncadd [#allocation3], 4294963200 }
  0x23   :  { %5987 = dma.done.wait [#allocation5], 4096  }
  0x24   :  { %5988 = vsyncadd [#allocation5], 4294963200 }
  0x25   :  { %5989 = dma.done.wait [#allocation8], 9216  }
  0x26   :  { %5990 = vsyncadd [#allocation8], 4294958080 }
  0x27   :  { %5991 = dma.done.wait [#allocation11], 17408  }
  0x28   :  { %5992 = vsyncadd [#allocation11], 4294949888 }
  0x29   :  { %5993 = dma.done.wait [#allocation14], 8192  }
  0x2a   :  { %5994 = vsyncadd [#allocation14], 4294959104  ;;  %vm276_vm0 = vcmask 1042432   ;;  %s6758_s22 = sld [smem:[#allocation22_spill]]  ;;  %vm251_vm1 = vcmask 48128   ;;  %v392_v46 = vld [vmem:[#allocation2 + $0x40] sm:$0xff] }
  0x2b   :  { %s6759_s9 = sld [smem:[#allocation20_spill]]  ;;  %v329_v47 = vld [vmem:[#allocation2] sm:$0xff]  ;;  %v393_v48 = vld [vmem:[#allocation2 + $0x48] sm:$0xff]  ;;  %v394_v50 = vld [vmem:[#allocation2 + $0x50] sm:$0xff]  ;;  %vm778_vm4 = vcmask 523264  }
  0x2c   :  { %v330_v49 = vld [vmem:[#allocation2 + $0x8] sm:$0xff]  ;;  %v331_v51 = vld [vmem:[#allocation2 + $0x10] sm:$0xff]  ;;  %v395_v53 = vld [vmem:[#allocation2 + $0x58] sm:$0xff]  ;;  %s6760_s1 = sld [smem:[#allocation23_spill]] }
  0x2d   :  { %v332_v54 = vld [vmem:[#allocation2 + $0x18] sm:$0xff]  ;;  %v396_v58 = vld [vmem:[#allocation2 + $0x60] sm:$0xff]  ;;  %v397_v61 = vld [vmem:[#allocation2 + $0x68] sm:$0xff] }
  0x2e   :  { %v333_v59 = vld [vmem:[#allocation2 + $0x20] sm:$0xff]  ;;  %v334_v62 = vld [vmem:[#allocation2 + $0x28] sm:$0xff] }
  0x30   :  { %v210_v0 = vld [vmem:[%s6758_s22] sm:$0x7]  ;;  %v4290_v1 = vld [vmem:[%s6758_s22 + $0x4] sm:$0x7]  ;;  %v4308_v24 = vld [vmem:[%s6758_s22 + $0xc] sm:$0x7] }
  0x31   :  { %v278_v2 = vsel %vm276_vm0, %v210_v0, 0  ;;  %v340_v3 = vsel %vm276_vm0, %v4290_v1, 0  ;;  %v6170_v4 = vld [vmem:[%s6759_s9] sm:$0xff]  ;;  %v6179_v5 = vld [vmem:[%s6759_s9 + $0x8] sm:$0xff]  ;;  %v6188_v6 = vld [vmem:[%s6759_s9 + $0x10] sm:$0xff]  ;;  %v597_v25 = vsel %vm276_vm0, %v4308_v24, 0 }
  0x32   :  { %287 = vmatpush.bf16.msra.mxu0 %v278_v2  ;;  %349 = vmatpush.bf16.msra.mxu1 %v340_v3  ;;  %v6197_v7 = vld [vmem:[%s6759_s9 + $0x18] sm:$0xff]  ;;  %v6206_v8 = vld [vmem:[%s6759_s9 + $0x20] sm:$0xff]  ;;  %v6215_v9 = vld [vmem:[%s6759_s9 + $0x28] sm:$0xff] }
  0x33   :  { %v6224_v10 = vld [vmem:[%s6759_s9 + $0x30] sm:$0xff]  ;;  %v6233_v11 = vld [vmem:[%s6759_s9 + $0x38] sm:$0xff]  ;;  %v4299_v55 = vld [vmem:[%s6758_s22 + $0x8] sm:$0x7] }
  0x34   :  { %v485_v56 = vsel %vm276_vm0, %v4299_v55, 0  ;;  %v398_v0 = vld [vmem:[#allocation2 + $0x70] sm:$0xff]  ;;  %v399_v3 = vld [vmem:[#allocation2 + $0x78] sm:$0xff] }
  0x35   :  { %4282 = vmatmul.msk.bf16.vlgmr.msra.gmra.mxu0 %vm251_vm1, %v6170_v4  ;;  %4291 = vmatmul.msk.bf16.vlgmr.msra.gmra.mxu1 %vm251_vm1, %v6170_v4  ;;  %v335_v1 = vld [vmem:[#allocation2 + $0x30] sm:$0xff] }
  0x36   :  { %606 = vmatpush.bf16.msrb.mxu0 %v597_v25 }
  0x45   :  { %4283 = vmatmul.msk.bf16.gmra.mxu0 %vm251_vm1, %v6179_v5  ;;  %4292 = vmatmul.msk.bf16.gmra.mxu1 %vm251_vm1, %v6179_v5 }
  0x55   :  { %4284 = vmatmul.msk.bf16.gmra.mxu0 %vm251_vm1, %v6188_v6  ;;  %4293 = vmatmul.msk.bf16.gmra.mxu1 %vm251_vm1, %v6188_v6 }
  0x65   :  { %4285 = vmatmul.msk.bf16.gmra.mxu0 %vm251_vm1, %v6197_v7  ;;  %4294 = vmatmul.msk.bf16.gmra.mxu1 %vm251_vm1, %v6197_v7 }
  0x75   :  { %4286 = vmatmul.msk.bf16.gmra.mxu0 %vm251_vm1, %v6206_v8  ;;  %4295 = vmatmul.msk.bf16.gmra.mxu1 %vm251_vm1, %v6206_v8 }
  0x85   :  { %4287 = vmatmul.msk.bf16.gmra.mxu0 %vm251_vm1, %v6215_v9  ;;  %4296 = vmatmul.msk.bf16.gmra.mxu1 %vm251_vm1, %v6215_v9 }
  0x95   :  { %4288 = vmatmul.msk.bf16.gmra.mxu0 %vm251_vm1, %v6224_v10  ;;  %4297 = vmatmul.msk.bf16.gmra.mxu1 %vm251_vm1, %v6224_v10 }
  0xa5   :  { %4289 = vmatmul.msk.bf16.gmra.mxu0 %vm251_vm1, %v6233_v11  ;;  %4298 = vmatmul.msk.bf16.gmra.mxu1 %vm251_vm1, %v6233_v11 }
  0xb2   :  { %v6239_v12 = vpop.f32.mrf.mxu0  ;;  %v6241_v13 = vpop.f32.mrf.mxu1 }
  0xb5   :  { %4309 = vmatmul.msk.bf16.vlgmr.msrb.gmra.mxu0 %vm251_vm1, %v6170_v4 }
  0xba   :  { %v6243_v14 = vpop.f32.mrf.mxu0  ;;  %v6245_v15 = vpop.f32.mrf.mxu1 }
  0xc2   :  { %v6247_v16 = vpop.f32.mrf.mxu0  ;;  %v356_v17 = vpop.f32.mrf.mxu1 }
  0xc5   :  { %4310 = vmatmul.msk.bf16.gmra.mxu0 %vm251_vm1, %v6179_v5 }
  0xca   :  { %v296_v18 = vpop.f32.mrf.mxu0  ;;  %v358_v19 = vpop.f32.mrf.mxu1 }
  0xd2   :  { %v299_v20 = vpop.f32.mrf.mxu0  ;;  %v361_v21 = vpop.f32.mrf.mxu1 }
  0xd5   :  { %4311 = vmatmul.msk.bf16.gmra.mxu0 %vm251_vm1, %v6188_v6 }
  0xda   :  { %v301_v22 = vpop.f32.mrf.mxu0  ;;  %v363_v23 = vpop.f32.mrf.mxu1 }
  0xe2   :  { %v304_v26 = vpop.f32.mrf.mxu0  ;;  %v366_v27 = vpop.f32.mrf.mxu1 }
  0xe5   :  { %4312 = vmatmul.msk.bf16.gmra.mxu0 %vm251_vm1, %v6197_v7 }
  0xea   :  { %v306_v28 = vpop.f32.mrf.mxu0  ;;  %v368_v29 = vpop.f32.mrf.mxu1 }
  0xf2   :  { %v309_v30 = vpop.f32.mrf.mxu0  ;;  %v371_v31 = vpop.f32.mrf.mxu1 }
  0xf5   :  { %4313 = vmatmul.msk.bf16.gmra.mxu0 %vm251_vm1, %v6206_v8 }
  0xfa   :  { %v311_v32 = vpop.f32.mrf.mxu0  ;;  %v373_v33 = vpop.f32.mrf.mxu1 }
 0x102   :  { %v314_v34 = vpop.f32.mrf.mxu0  ;;  %v376_v35 = vpop.f32.mrf.mxu1 }
 0x105   :  { %4314 = vmatmul.msk.bf16.gmra.mxu0 %vm251_vm1, %v6215_v9 }
 0x10a   :  { %v316_v36 = vpop.f32.mrf.mxu0  ;;  %v378_v37 = vpop.f32.mrf.mxu1 }
 0x112   :  { %v319_v38 = vpop.f32.mrf.mxu0  ;;  %v381_v39 = vpop.f32.mrf.mxu1 }
 0x115   :  { %4315 = vmatmul.msk.bf16.gmra.mxu0 %vm251_vm1, %v6224_v10 }
 0x11a   :  { %v321_v40 = vpop.f32.mrf.mxu0  ;;  %v383_v41 = vpop.f32.mrf.mxu1 }
 0x122   :  { %v324_v42 = vpop.f32.mrf.mxu0  ;;  %v386_v43 = vpop.f32.mrf.mxu1 }
 0x125   :  { %4316 = vmatmul.msk.bf16.gmra.mxu0 %vm251_vm1, %v6233_v11 }
 0x12a   :  { %v326_v44 = vpop.f32.mrf.mxu0  ;;  %v388_v45 = vpop.f32.mrf.mxu1 }
 0x12b   :  { %400 = vmatpush.msra.mxu2 %v388_v45  ;;  %441 = vmatpush.msra.mxu3 %v326_v44  ;;  %v652_v44 = vld [vmem:[#allocation2 + $0xd8] sm:$0xff]  ;;  %v538_v45 = vld [vmem:[#allocation2 + $0x88] sm:$0xff] }
 0x12d   :  { %401 = vmatpush.msra.mxu2 %v386_v43  ;;  %442 = vmatpush.msra.mxu3 %v324_v42  ;;  %v651_v42 = vld [vmem:[#allocation2 + $0xd0] sm:$0xff]  ;;  %v537_v43 = vld [vmem:[#allocation2 + $0x80] sm:$0xff] }
 0x12f   :  { %402 = vmatpush.msra.mxu2 %v383_v41  ;;  %443 = vmatpush.msra.mxu3 %v321_v40  ;;  %v649_v40 = vld [vmem:[#allocation2 + $0xc0] sm:$0xff]  ;;  %v650_v41 = vld [vmem:[#allocation2 + $0xc8] sm:$0xff] }
 0x131   :  { %403 = vmatpush.msra.mxu2 %v381_v39  ;;  %444 = vmatpush.msra.mxu3 %v319_v38 }
 0x132   :  { %v6274_v52 = vpop.f32.mrf.mxu0 }
 0x133   :  { %404 = vmatpush.msra.mxu2 %v378_v37  ;;  %445 = vmatpush.msra.mxu3 %v316_v36 }
 0x135   :  { %405 = vmatpush.msra.mxu2 %v376_v35  ;;  %446 = vmatpush.msra.mxu3 %v314_v34 }
 0x137   :  { %406 = vmatpush.msra.mxu2 %v373_v33  ;;  %447 = vmatpush.msra.mxu3 %v311_v32 }
 0x139   :  { %407 = vmatpush.msra.mxu2 %v371_v31  ;;  %448 = vmatpush.msra.mxu3 %v309_v30 }
 0x13a   :  { %v610_v57 = vpop.f32.mrf.mxu0 }
 0x13b   :  { %408 = vmatpush.msra.mxu2 %v368_v29  ;;  %449 = vmatpush.msra.mxu3 %v306_v28 }
 0x13d   :  { %409 = vmatpush.msra.mxu2 %v366_v27  ;;  %450 = vmatpush.msra.mxu3 %v304_v26 }
 0x13f   :  { %410 = vmatpush.msra.mxu2 %v363_v23  ;;  %451 = vmatpush.msra.mxu3 %v301_v22 }
 0x141   :  { %411 = vmatpush.msra.mxu2 %v361_v21  ;;  %452 = vmatpush.msra.mxu3 %v299_v20 }
 0x142   :  { %v613_v60 = vpop.f32.mrf.mxu0 }
 0x143   :  { %412 = vmatpush.msra.mxu2 %v358_v19  ;;  %453 = vmatpush.msra.mxu3 %v296_v18 }
 0x145   :  { %413 = vmatpush.msra.mxu2 %v356_v17  ;;  %454 = vmatpush.msra.mxu3 %v6247_v16 }
 0x147   :  { %414 = vmatpush.msra.mxu2 %v6245_v15  ;;  %455 = vmatpush.msra.mxu3 %v6243_v14 }
 0x149   :  { %415 = vmatpush.msra.mxu2 %v6241_v13  ;;  %456 = vmatpush.msra.mxu3 %v6239_v12  ;;  %v336_v12 = vld [vmem:[#allocation2 + $0x38] sm:$0xff] }
 0x14a   :  { %416 = vmatmul.f32.vlgmr.msra.gmra.mxu2 %v392_v46  ;;  %457 = vmatmul.f32.vlgmr.msra.gmra.mxu3 %v329_v47  ;;  %v615_v63 = vpop.f32.mrf.mxu0  ;;  %v653_v46 = vld [vmem:[#allocation2 + $0xe0] sm:$0xff]  ;;  %v539_v47 = vld [vmem:[#allocation2 + $0x90] sm:$0xff] }
 0x14b   :  { %494 = vmatpush.bf16.msrb.mxu2 %v485_v56  ;;  %v544_v56 = vld [vmem:[#allocation2 + $0xb8] sm:$0xff] }
 0x152   :  { %419 = vmatmul.f32.gmra.mxu2 %v393_v48  ;;  %460 = vmatmul.f32.gmra.mxu3 %v330_v49  ;;  %v618_v2 = vpop.f32.mrf.mxu0  ;;  %v654_v48 = vld [vmem:[#allocation2 + $0xe8] sm:$0xff]  ;;  %v540_v49 = vld [vmem:[#allocation2 + $0x98] sm:$0xff] }
 0x15a   :  { %422 = vmatmul.f32.gmra.mxu2 %v394_v50  ;;  %463 = vmatmul.f32.gmra.mxu3 %v331_v51  ;;  %v620_v13 = vpop.f32.mrf.mxu0  ;;  %v655_v50 = vld [vmem:[#allocation2 + $0xf0] sm:$0xff]  ;;  %v541_v51 = vld [vmem:[#allocation2 + $0xa0] sm:$0xff] }
 0x162   :  { %425 = vmatmul.f32.gmra.mxu2 %v395_v53  ;;  %466 = vmatmul.f32.gmra.mxu3 %v332_v54  ;;  %v623_v14 = vpop.f32.mrf.mxu0  ;;  %v542_v53 = vld [vmem:[#allocation2 + $0xa8] sm:$0xff]  ;;  %v543_v54 = vld [vmem:[#allocation2 + $0xb0] sm:$0xff] }
 0x16a   :  { %428 = vmatmul.f32.gmra.mxu2 %v396_v58  ;;  %469 = vmatmul.f32.gmra.mxu3 %v333_v59  ;;  %v625_v15 = vpop.f32.mrf.mxu0 }
 0x172   :  { %431 = vmatmul.f32.gmra.mxu2 %v397_v61  ;;  %472 = vmatmul.f32.gmra.mxu3 %v334_v62  ;;  %v628_v16 = vpop.f32.mrf.mxu0  ;;  %v5494_v61 = vld [vmem:[#allocation6 + $0x18] sm:$0xff] }
 0x173   :  { %v5498_v62 = vld [vmem:[#allocation6 + $0x38] sm:$0xff] }
 0x17a   :  { %434 = vmatmul.f32.gmra.mxu2 %v398_v0  ;;  %475 = vmatmul.f32.gmra.mxu3 %v335_v1  ;;  %v630_v17 = vpop.f32.mrf.mxu0  ;;  %v5506_v0 = vld [vmem:[#allocation6 + $0x78] sm:$0xff]  ;;  %v5493_v1 = vld [vmem:[#allocation6 + $0x10] sm:$0xff] }
 0x17b   :  { %1122 = vmatpush.bf16.msra.mxu0 %v5506_v0 }
 0x182   :  { %437 = vmatmul.f32.gmra.mxu2 %v399_v3  ;;  %478 = vmatmul.f32.gmra.mxu3 %v336_v12  ;;  %v633_v18 = vpop.f32.mrf.mxu0  ;;  %v5505_v3 = vld [vmem:[#allocation6 + $0x70] sm:$0xff]  ;;  %v5492_v12 = vld [vmem:[#allocation6 + $0x8] sm:$0xff] }
 0x183   :  { %1123 = vmatpush.bf16.msra.mxu0 %v5505_v3 }
 0x18a   :  { %4300 = vmatmul.msk.bf16.vlgmr.msrb.gmra.mxu2 %vm251_vm1, %v6170_v4  ;;  %v635_v19 = vpop.f32.mrf.mxu0 }
 0x192   :  { %v638_v20 = vpop.f32.mrf.mxu0 }
 0x19a   :  { %4301 = vmatmul.msk.bf16.gmra.mxu2 %vm251_vm1, %v6179_v5  ;;  %v640_v21 = vpop.f32.mrf.mxu0 }
 0x1a2   :  { %v643_v22 = vpop.f32.mrf.mxu0 }
 0x1aa   :  { %4302 = vmatmul.msk.bf16.gmra.mxu2 %vm251_vm1, %v6188_v6  ;;  %v645_v5 = vpop.f32.mrf.mxu0 }
 0x1ab   :  { %657 = vmatpush.msrb.mxu1 %v645_v5 }
 0x1ad   :  { %658 = vmatpush.msrb.mxu1 %v643_v22 }
 0x1af   :  { %659 = vmatpush.msrb.mxu1 %v640_v21 }
 0x1b1   :  { %660 = vmatpush.msrb.mxu1 %v638_v20 }
 0x1b3   :  { %661 = vmatpush.msrb.mxu1 %v635_v19 }
 0x1b5   :  { %662 = vmatpush.msrb.mxu1 %v633_v18  ;;  %v5503_v18 = vld [vmem:[#allocation6 + $0x60] sm:$0xff] }
 0x1b7   :  { %663 = vmatpush.msrb.mxu1 %v630_v17  ;;  %v5495_v17 = vld [vmem:[#allocation6 + $0x20] sm:$0xff] }
 0x1b9   :  { %664 = vmatpush.msrb.mxu1 %v628_v16  ;;  %v5491_v16 = vld [vmem:[#allocation6] sm:$0xff] }
 0x1ba   :  { %4303 = vmatmul.msk.bf16.gmra.mxu2 %vm251_vm1, %v6197_v7 }
 0x1bb   :  { %665 = vmatpush.msrb.mxu1 %v625_v15 }
 0x1bd   :  { %666 = vmatpush.msrb.mxu1 %v623_v14  ;;  %v5504_v14 = vld [vmem:[#allocation6 + $0x68] sm:$0xff] }
 0x1be   :  { %1124 = vmatpush.bf16.msra.mxu0 %v5504_v14 }
 0x1bf   :  { %667 = vmatpush.msrb.mxu1 %v620_v13  ;;  %v5496_v13 = vld [vmem:[#allocation6 + $0x28] sm:$0xff] }
 0x1c1   :  { %668 = vmatpush.msrb.mxu1 %v618_v2  ;;  %v5497_v2 = vld [vmem:[#allocation6 + $0x30] sm:$0xff] }
 0x1c2   :  { %1125 = vmatpush.bf16.msra.mxu0 %v5503_v18 }
 0x1c3   :  { %669 = vmatpush.msrb.mxu1 %v615_v63 }
 0x1c5   :  { %670 = vmatpush.msrb.mxu1 %v613_v60 }
 0x1c7   :  { %671 = vmatpush.msrb.mxu1 %v610_v57 }
 0x1c9   :  { %672 = vmatpush.msrb.mxu1 %v6274_v52  ;;  %v656_v52 = vld [vmem:[#allocation2 + $0xf8] sm:$0xff] }
 0x1ca   :  { %4304 = vmatmul.msk.bf16.gmra.mxu2 %vm251_vm1, %v6206_v8  ;;  %673 = vmatmul.f32.vlgmr.msrb.gmra.mxu1 %v649_v40 }
 0x1cb   :  { %861 = vmatpush.bf16.msra.mxu1 %v5498_v62 }
 0x1cd   :  { %v6290_v4 = vpop.f32.mrf.mxu2  ;;  %v458_v55 = vpop.f32.mrf.mxu3 }
 0x1ce   :  { %v459_v22 = vadd.f32 %v458_v55, %v6290_v4 }
 0x1cf   :  { %862 = vmatpush.bf16.msra.mxu1 %v5497_v2 }
 0x1d2   :  { %676 = vmatmul.f32.gmra.mxu1 %v650_v41 }
 0x1d3   :  { %863 = vmatpush.bf16.msra.mxu1 %v5496_v13 }
 0x1d5   :  { %v6292_v23 = vpop.f32.mrf.mxu2  ;;  %v461_v57 = vpop.f32.mrf.mxu3 }
 0x1d7   :  { %864 = vmatpush.bf16.msra.mxu1 %v5495_v17 }
 0x1da   :  { %4305 = vmatmul.msk.bf16.gmra.mxu2 %vm251_vm1, %v6215_v9  ;;  %679 = vmatmul.f32.gmra.mxu1 %v651_v42 }
 0x1dd   :  { %v6296_v6 = vpop.f32.mrf.mxu2  ;;  %v464_v58 = vpop.f32.mrf.mxu3 }
 0x1de   :  { %v465_v4 = vadd.f32 %v464_v58, %v6296_v6 }
 0x1e2   :  { %682 = vmatmul.f32.gmra.mxu1 %v652_v44 }
 0x1e5   :  { %v6298_v7 = vpop.f32.mrf.mxu2  ;;  %v467_v59 = vpop.f32.mrf.mxu3 }
 0x1e6   :  { %v468_v6 = vadd.f32 %v467_v59, %v6298_v7 }
 0x1ea   :  { %4306 = vmatmul.msk.bf16.gmra.mxu2 %vm251_vm1, %v6224_v10  ;;  %685 = vmatmul.f32.gmra.mxu1 %v653_v46 }
 0x1ed   :  { %v6302_v8 = vpop.f32.mrf.mxu2  ;;  %v6313_v60 = vpop.f32.mrf.mxu3 }
 0x1f2   :  { %688 = vmatmul.f32.gmra.mxu1 %v654_v48 }
 0x1f5   :  { %v6304_v9 = vpop.f32.mrf.mxu2  ;;  %v6315_v63 = vpop.f32.mrf.mxu3 }
 0x1fa   :  { %4307 = vmatmul.msk.bf16.gmra.mxu2 %vm251_vm1, %v6233_v11  ;;  %691 = vmatmul.f32.gmra.mxu1 %v655_v50 }
 0x1fd   :  { %v6309_v24 = vpop.f32.mrf.mxu2  ;;  %v6317_v15 = vpop.f32.mrf.mxu3 }
 0x202   :  { %694 = vmatmul.f32.gmra.mxu1 %v656_v52 }
 0x205   :  { %v6311_v25 = vpop.f32.mrf.mxu2  ;;  %v6319_v20 = vpop.f32.mrf.mxu3 }
 0x20d   :  { %v496_v26 = vpop.f32.mrf.mxu2 }
 0x215   :  { %v498_v10 = vpop.f32.mrf.mxu2 }
 0x21d   :  { %v501_v27 = vpop.f32.mrf.mxu2 }
 0x225   :  { %v503_v28 = vpop.f32.mrf.mxu2 }
 0x22d   :  { %v506_v29 = vpop.f32.mrf.mxu2 }
 0x235   :  { %v508_v30 = vpop.f32.mrf.mxu2 }
 0x23d   :  { %v511_v31 = vpop.f32.mrf.mxu2 }
 0x245   :  { %v513_v32 = vpop.f32.mrf.mxu2 }
 0x247   :  { %v674_v19 = vpop.f32.mrf.mxu1 }
 0x24d   :  { %v516_v33 = vpop.f32.mrf.mxu2 }
 0x24f   :  { %v677_v21 = vpop.f32.mrf.mxu1 }
 0x255   :  { %v518_v34 = vpop.f32.mrf.mxu2 }
 0x25d   :  { %v521_v35 = vpop.f32.mrf.mxu2 }
 0x265   :  { %v523_v36 = vpop.f32.mrf.mxu2 }
 0x26d   :  { %v526_v37 = vpop.f32.mrf.mxu2 }
 0x275   :  { %v528_v38 = vpop.f32.mrf.mxu2 }
 0x27d   :  { %v531_v39 = vpop.f32.mrf.mxu2 }
 0x285   :  { %v533_v11 = vpop.f32.mrf.mxu2 }
 0x286   :  { %545 = vmatpush.msrb.mxu3 %v533_v11 }
 0x288   :  { %546 = vmatpush.msrb.mxu3 %v531_v39 }
 0x28a   :  { %547 = vmatpush.msrb.mxu3 %v528_v38 }
 0x28c   :  { %548 = vmatpush.msrb.mxu3 %v526_v37 }
 0x28e   :  { %549 = vmatpush.msrb.mxu3 %v523_v36 }
 0x290   :  { %550 = vmatpush.msrb.mxu3 %v521_v35 }
 0x292   :  { %551 = vmatpush.msrb.mxu3 %v518_v34 }
 0x294   :  { %552 = vmatpush.msrb.mxu3 %v516_v33 }
 0x296   :  { %553 = vmatpush.msrb.mxu3 %v513_v32 }
 0x298   :  { %554 = vmatpush.msrb.mxu3 %v511_v31 }
 0x29a   :  { %555 = vmatpush.msrb.mxu3 %v508_v30 }
 0x29c   :  { %556 = vmatpush.msrb.mxu3 %v506_v29  ;;  %v462_v29 = vadd.f32 %v461_v57, %v6292_v23 }
 0x29e   :  { %557 = vmatpush.msrb.mxu3 %v503_v28  ;;  %v680_v28 = vpop.f32.mrf.mxu1 }
 0x2a0   :  { %558 = vmatpush.msrb.mxu3 %v501_v27  ;;  %v6325_v27 = vld [vmem:[%s6760_s1] ss:$0 sm:$0xff] }
 0x2a2   :  { %559 = vmatpush.msrb.mxu3 %v498_v10 }
 0x2a4   :  { %560 = vmatpush.msrb.mxu3 %v496_v26 }
 0x2a5   :  { %561 = vmatmul.f32.vlgmr.msrb.gmra.mxu3 %v537_v43 }
 0x2a6   :  { %795 = vmatpush.bf16.msra.mxu3 %v5494_v61  ;;  %v683_v38 = vpop.f32.mrf.mxu1 }
 0x2aa   :  { %796 = vmatpush.bf16.msra.mxu3 %v5493_v1  ;;  %v477_v1 = vadd.f32 %v6317_v15, %v6309_v24  ;;  %v480_v24 = vadd.f32 %v6319_v20, %v6311_v25 }
 0x2ad   :  { %564 = vmatmul.f32.gmra.mxu3 %v538_v45 }
 0x2ae   :  { %797 = vmatpush.bf16.msra.mxu3 %v5492_v12  ;;  %v686_v45 = vpop.f32.mrf.mxu1 }
 0x2b2   :  { %798 = vmatpush.bf16.msra.mxu3 %v5491_v16 }
 0x2b5   :  { %567 = vmatmul.f32.gmra.mxu3 %v539_v47 }
 0x2b6   :  { %v689_v55 = vpop.f32.mrf.mxu1 }
 0x2bd   :  { %570 = vmatmul.f32.gmra.mxu3 %v540_v49  ;;  %v471_v49 = vadd.f32 %v6313_v60, %v6302_v8  ;;  %v474_v8 = vadd.f32 %v6315_v63, %v6304_v9 }
 0x2be   :  { %v692_v0 = vpop.f32.mrf.mxu1 }
 0x2c5   :  { %573 = vmatmul.f32.gmra.mxu3 %v541_v51 }
 0x2c6   :  { %v695_v16 = vpop.f32.mrf.mxu1 }
 0x2cd   :  { %576 = vmatmul.f32.gmra.mxu3 %v542_v53 }
 0x2d5   :  { %579 = vmatmul.f32.gmra.mxu3 %v543_v54 }
 0x2dd   :  { %582 = vmatmul.f32.gmra.mxu3 %v544_v56 }
 0x328   :  { %v562_v5 = vpop.f32.mrf.mxu3 }
 0x329   :  { %v586_v26 = vadd.f32 %v562_v5, %v459_v22 }
 0x32b   :  { %v698_v10 = vadd.f32 %v674_v19, %v586_v26 }
 0x32d   :  { %v710_v31 = vadd.f32 %v6325_v27, %v698_v10 }
 0x32f   :  { %v726_v34 = vmul.f32 0.2, %v710_v31  ;;  %vm718_vm2 = vcmp.gt.f32.partialorder %v710_v31, 0.0 }
 0x330   :  { %v565_v30 = vpop.f32.mrf.mxu3 }
 0x331   :  { %v587_v32 = vadd.f32 %v565_v30, %v462_v29  ;;  %v734_v39 = vsel %vm718_vm2, %v710_v31, %v726_v34  ;;  %vm1547_vm2 = vcmask 261120  }
 0x333   :  { %v699_v33 = vadd.f32 %v677_v21, %v587_v32 }
 0x335   :  { %v711_v35 = vadd.f32 %v6325_v27, %v699_v33 }
 0x337   :  { %vm719_vm3 = vcmp.gt.f32.partialorder %v711_v35, 0.0  ;;  %v727_v36 = vmul.f32 0.2, %v711_v35 }
 0x338   :  { %v568_v37 = vpop.f32.mrf.mxu3 }
 0x339   :  { %v735_v11 = vsel %vm719_vm3, %v711_v35, %v727_v36  ;;  %v588_v40 = vadd.f32 %v568_v37, %v465_v4 }
 0x33a   :  { %v6331_v23 = vpack.c.bf16 %v735_v11, %v734_v39 }
 0x33b   :  { %v700_v41 = vadd.f32 %v680_v28, %v588_v40 }
 0x33c   :  { %4333 = vmatmul.msk.bf16.vlgmr.msra.gmra.mxu3 %vm778_vm4, %v6331_v23  ;;  %4353 = vmatmul.msk.bf16.vlgmr.msra.gmra.mxu1 %vm778_vm4, %v6331_v23 }
 0x33d   :  { %4405 = vmatmul.msk.bf16.vlgmr.msra.gmra.mxu0 %vm778_vm4, %v6331_v23  ;;  %v712_v43 = vadd.f32 %v6325_v27, %v700_v41 }
 0x33f   :  { %v728_v47 = vmul.f32 0.2, %v712_v43  ;;  %vm720_vm5 = vcmp.gt.f32.partialorder %v712_v43, 0.0 }
 0x340   :  { %v571_v42 = vpop.f32.mrf.mxu3 }
 0x341   :  { %v589_v44 = vadd.f32 %v571_v42, %v468_v6  ;;  %v736_v52 = vsel %vm720_vm5, %v712_v43, %v728_v47  ;;  %v887_v47 = vld [vmem:[#allocation4 + $0x20] sm:$0xff] }
 0x343   :  { %v701_v46 = vadd.f32 %v683_v38, %v589_v44 }
 0x345   :  { %v713_v48 = vadd.f32 %v6325_v27, %v701_v46 }
 0x347   :  { %vm721_vm6 = vcmp.gt.f32.partialorder %v713_v48, 0.0  ;;  %v729_v50 = vmul.f32 0.2, %v713_v48 }
 0x348   :  { %v574_v51 = vpop.f32.mrf.mxu3 }
 0x349   :  { %v737_v53 = vsel %vm721_vm6, %v713_v48, %v729_v50  ;;  %v590_v54 = vadd.f32 %v574_v51, %v471_v49  ;;  %v5502_v48 = vld [vmem:[#allocation6 + $0x58] sm:$0xff]  ;;  %v5501_v49 = vld [vmem:[#allocation6 + $0x50] sm:$0xff]  ;;  %v820_v50 = vld [vmem:[#allocation4] sm:$0xff] }
 0x34a   :  { %v6344_v7 = vpack.c.bf16 %v737_v53, %v736_v52  ;;  %v888_v51 = vld [vmem:[#allocation4 + $0x28] sm:$0xff]  ;;  %v5499_v53 = vld [vmem:[#allocation6 + $0x40] sm:$0xff] }
 0x34b   :  { %v702_v56 = vadd.f32 %v686_v45, %v590_v54  ;;  %v5500_v52 = vld [vmem:[#allocation6 + $0x48] sm:$0xff] }
 0x34c   :  { %4334 = vmatmul.msk.bf16.gmra.mxu3 %vm778_vm4, %v6344_v7  ;;  %4354 = vmatmul.msk.bf16.gmra.mxu1 %vm778_vm4, %v6344_v7  ;;  %v821_v54 = vld [vmem:[#allocation4 + $0x8] sm:$0xff] }
 0x34d   :  { %4406 = vmatmul.msk.bf16.gmra.mxu0 %vm778_vm4, %v6344_v7  ;;  %v714_v58 = vadd.f32 %v6325_v27, %v702_v56  ;;  %v822_v56 = vld [vmem:[#allocation4 + $0x10] sm:$0xff] }
 0x34f   :  { %v730_v61 = vmul.f32 0.2, %v714_v58  ;;  %vm722_vm7 = vcmp.gt.f32.partialorder %v714_v58, 0.0 }
 0x350   :  { %v577_v57 = vpop.f32.mrf.mxu3 }
 0x351   :  { %v591_v59 = vadd.f32 %v577_v57, %v474_v8  ;;  %v738_v12 = vsel %vm722_vm7, %v714_v58, %v730_v61  ;;  %v890_v8 = vld [vmem:[#allocation4 + $0x38] sm:$0xff] }
 0x352   :  { %v823_v57 = vld [vmem:[#allocation4 + $0x18] sm:$0xff] }
 0x353   :  { %v703_v60 = vadd.f32 %v689_v55, %v591_v59  ;;  %v889_v55 = vld [vmem:[#allocation4 + $0x30] sm:$0xff] }
 0x355   :  { %v715_v62 = vadd.f32 %v6325_v27, %v703_v60 }
 0x357   :  { %vm723_vm8 = vcmp.gt.f32.partialorder %v715_v62, 0.0  ;;  %v731_v2 = vmul.f32 0.2, %v715_v62 }
 0x358   :  { %v580_v3 = vpop.f32.mrf.mxu3 }
 0x359   :  { %v739_v13 = vsel %vm723_vm8, %v715_v62, %v731_v2  ;;  %v592_v14 = vadd.f32 %v580_v3, %v477_v1 }
 0x35a   :  { %v6358_v9 = vpack.c.bf16 %v739_v13, %v738_v12  ;;  %v1148_v13 = vld [vmem:[#allocation4 + $0x60] sm:$0xff] }
 0x35b   :  { %v704_v63 = vadd.f32 %v692_v0, %v592_v14  ;;  %v1149_v14 = vld [vmem:[#allocation4 + $0x68] sm:$0xff] }
 0x35c   :  { %4335 = vmatmul.msk.bf16.gmra.mxu3 %vm778_vm4, %v6358_v9  ;;  %4355 = vmatmul.msk.bf16.gmra.mxu1 %vm778_vm4, %v6358_v9 }
 0x35d   :  { %4407 = vmatmul.msk.bf16.gmra.mxu0 %vm778_vm4, %v6358_v9  ;;  %v716_v17 = vadd.f32 %v6325_v27, %v704_v63  ;;  %v1036_v63 = vld [vmem:[#allocation4 + $0x40] sm:$0xff] }
 0x35f   :  { %v732_v21 = vmul.f32 0.2, %v716_v17  ;;  %vm724_vm9 = vcmp.gt.f32.partialorder %v716_v17, 0.0 }
 0x360   :  { %v583_v15 = vpop.f32.mrf.mxu3 }
 0x361   :  { %v593_v18 = vadd.f32 %v583_v15, %v480_v24  ;;  %v740_v26 = vsel %vm724_vm9, %v716_v17, %v732_v21  ;;  %v1151_v24 = vld [vmem:[#allocation4 + $0x78] sm:$0xff]  ;;  %v1037_v15 = vld [vmem:[#allocation4 + $0x48] sm:$0xff] }
 0x362   :  { %v1039_v17 = vld [vmem:[#allocation4 + $0x58] sm:$0xff] }
 0x363   :  { %v705_v19 = vadd.f32 %v695_v16, %v593_v18  ;;  %v1038_v16 = vld [vmem:[#allocation4 + $0x50] sm:$0xff] }
 0x365   :  { %v717_v22 = vadd.f32 %v6325_v27, %v705_v19 }
 0x367   :  { %vm725_vm10 = vcmp.gt.f32.partialorder %v717_v22, 0.0  ;;  %v733_v5 = vmul.f32 0.2, %v717_v22 }
 0x369   :  { %v741_v10 = vsel %vm725_vm10, %v717_v22, %v733_v5 }
 0x36a   :  { %v6370_v28 = vpack.c.bf16 %v741_v10, %v740_v26 }
 0x36c   :  { %4336 = vmatmul.msk.bf16.gmra.mxu3 %vm778_vm4, %v6370_v28  ;;  %4356 = vmatmul.msk.bf16.gmra.mxu1 %vm778_vm4, %v6370_v28 }
 0x36d   :  { %4408 = vmatmul.msk.bf16.gmra.mxu0 %vm778_vm4, %v6370_v28 }
 0x3b9   :  { %v866_v25 = vpop.f32.mrf.mxu1 }
 0x3ba   :  { %v1127_v20 = vpop.f32.mrf.mxu0 }
 0x3bf   :  { %v800_v29 = vpop.f32.mrf.mxu3 }
 0x3c1   :  { %v868_v27 = vpop.f32.mrf.mxu1 }
 0x3c2   :  { %v1129_v30 = vpop.f32.mrf.mxu0 }
 0x3c7   :  { %v802_v31 = vpop.f32.mrf.mxu3 }
 0x3c9   :  { %v871_v32 = vpop.f32.mrf.mxu1 }
 0x3ca   :  { %v1132_v33 = vpop.f32.mrf.mxu0 }
 0x3cf   :  { %v805_v34 = vpop.f32.mrf.mxu3 }
 0x3d1   :  { %v873_v35 = vpop.f32.mrf.mxu1 }
 0x3d2   :  { %v1134_v4 = vpop.f32.mrf.mxu0 }
 0x3d7   :  { %v807_v36 = vpop.f32.mrf.mxu3 }
 0x3d9   :  { %v876_v37 = vpop.f32.mrf.mxu1 }
 0x3da   :  { %v1137_v38 = vpop.f32.mrf.mxu0 }
 0x3df   :  { %v810_v39 = vpop.f32.mrf.mxu3 }
 0x3e1   :  { %v878_v11 = vpop.f32.mrf.mxu1 }
 0x3e2   :  { %v1139_v40 = vpop.f32.mrf.mxu0 }
 0x3e7   :  { %v812_v41 = vpop.f32.mrf.mxu3 }
 0x3e9   :  { %v881_v6 = vpop.f32.mrf.mxu1 }
 0x3ea   :  { %v1142_v42 = vpop.f32.mrf.mxu0 }
 0x3ef   :  { %v815_v43 = vpop.f32.mrf.mxu3 }
 0x3f1   :  { %v883_v44 = vpop.f32.mrf.mxu1 }
 0x3f2   :  { %v1144_v45 = vpop.f32.mrf.mxu0  ;;  %911 = vmatpush.msra.mxu2 %v883_v44 }
 0x3f3   :  { %1172 = vmatpush.msrb.mxu1 %v1144_v45 }
 0x3f4   :  { %912 = vmatpush.msra.mxu2 %v881_v6  ;;  %v4473_v6 = vld [vmem:[#allocation9 + $0x78] sm:$0xf0] }
 0x3f5   :  { %1173 = vmatpush.msrb.mxu1 %v1142_v42  ;;  %v4535_v42 = vld [vmem:[#allocation9 + $0xf0] sm:$0xf] }
 0x3f6   :  { %913 = vmatpush.msra.mxu2 %v878_v11 }
 0x3f7   :  { %1174 = vmatpush.msrb.mxu1 %v1139_v40  ;;  %v817_v46 = vpop.f32.mrf.mxu3 }
 0x3f8   :  { %914 = vmatpush.msra.mxu2 %v876_v37  ;;  %952 = vmatpush.msrb.mxu3 %v817_v46  ;;  %v5522_v37 = vld [vmem:[#allocation9 + $0x74] sm:$0xf0] }
 0x3f9   :  { %1175 = vmatpush.msrb.mxu1 %v1137_v38  ;;  %v5521_v38 = vld [vmem:[#allocation9 + $0x74] sm:$0xf] }
 0x3fa   :  { %915 = vmatpush.msra.mxu2 %v873_v35  ;;  %953 = vmatpush.msrb.mxu3 %v815_v43  ;;  %v5538_v43 = vld [vmem:[#allocation9 + $0xf4] sm:$0xf0]  ;;  %v4476_v44 = vor.u32 %v5521_v38, %v4473_v6  ;;  %v5512_v6 = vld [vmem:[#allocation9 + $0x24] sm:$0xf0] }
 0x3fb   :  { %1176 = vmatpush.msrb.mxu1 %v1134_v4  ;;  %v4536_v45 = vor.u32 %v5538_v43, %v4535_v42  ;;  %v5511_v42 = vld [vmem:[#allocation9 + $0x24] sm:$0xf] }
 0x3fc   :  { %916 = vmatpush.msra.mxu2 %v871_v32  ;;  %954 = vmatpush.msrb.mxu3 %v812_v41 }
 0x3fd   :  { %1177 = vmatpush.msrb.mxu1 %v1132_v33 }
 0x3fe   :  { %917 = vmatpush.msra.mxu2 %v868_v27  ;;  %955 = vmatpush.msrb.mxu3 %v810_v39 }
 0x3ff   :  { %1178 = vmatpush.msrb.mxu1 %v1129_v30 }
 0x400   :  { %918 = vmatpush.msra.mxu2 %v866_v25  ;;  %956 = vmatpush.msrb.mxu3 %v807_v36  ;;  %v4471_v36 = vld [vmem:[#allocation9 + $0x70] sm:$0xf] }
 0x401   :  { %1179 = vmatpush.msrb.mxu1 %v1127_v20  ;;  %4357 = vmatmul.msk.f32.vlgmr.msra.gmra.mxu2 %vm778_vm4, %v887_v47  ;;  %v4472_v41 = vor.u32 %v5522_v37, %v4471_v36  ;;  %v5530_v37 = vld [vmem:[#allocation9 + $0xb4] sm:$0xf0] }
 0x402   :  { %957 = vmatpush.msrb.mxu3 %v805_v34  ;;  %1010 = vmatpush.bf16.msrb.mxu2 %v5502_v48 }
 0x403   :  { %4409 = vmatmul.msk.f32.vlgmr.msrb.gmra.mxu1 %vm778_vm4, %v1148_v13  ;;  %v5534_v13 = vld [vmem:[#allocation9 + $0xd4] sm:$0xf0] }
 0x404   :  { %958 = vmatpush.msrb.mxu3 %v802_v31  ;;  %1388 = vmatpush.bf16.msra.mxu1 %v4476_v44 }
 0x406   :  { %959 = vmatpush.msrb.mxu3 %v800_v29  ;;  %1011 = vmatpush.bf16.msrb.mxu2 %v5501_v49  ;;  %v4463_v49 = vld [vmem:[#allocation9 + $0x60] sm:$0xf] }
 0x407   :  { %4361 = vmatmul.msk.f32.vlgmr.msrb.gmra.mxu3 %vm778_vm4, %v820_v50  ;;  %v5520_v50 = vld [vmem:[#allocation9 + $0x64] sm:$0xf0] }
 0x409   :  { %4358 = vmatmul.msk.f32.gmra.mxu2 %vm778_vm4, %v888_v51  ;;  %v5519_v51 = vld [vmem:[#allocation9 + $0x64] sm:$0xf] }
 0x40a   :  { %1012 = vmatpush.bf16.msrb.mxu2 %v5500_v52 }
 0x40b   :  { %4410 = vmatmul.msk.f32.gmra.mxu1 %vm778_vm4, %v1149_v14 }
 0x40e   :  { %1013 = vmatpush.bf16.msrb.mxu2 %v5499_v53 }
 0x40f   :  { %4362 = vmatmul.msk.f32.gmra.mxu3 %vm778_vm4, %v821_v54  ;;  %v4464_v54 = vor.u32 %v5520_v50, %v4463_v49  ;;  %v5528_v49 = vld [vmem:[#allocation9 + $0xa4] sm:$0xf0] }
 0x411   :  { %4359 = vmatmul.msk.f32.gmra.mxu2 %vm778_vm4, %v889_v55  ;;  %v4465_v55 = vld [vmem:[#allocation9 + $0x68] sm:$0xf0] }
 0x412   :  { %1506 = vmatpush.bf16.msra.mxu2 %v4536_v45 }
 0x417   :  { %4363 = vmatmul.msk.f32.gmra.mxu3 %vm778_vm4, %v822_v56  ;;  %v4527_v56 = vld [vmem:[#allocation9 + $0xe0] sm:$0xf] }
 0x419   :  { %4360 = vmatmul.msk.f32.gmra.mxu2 %vm778_vm4, %v890_v8  ;;  %v5536_v8 = vld [vmem:[#allocation9 + $0xe4] sm:$0xf0] }
 0x41f   :  { %4364 = vmatmul.msk.f32.gmra.mxu3 %vm778_vm4, %v823_v57 }
 0x421   :  { %4381 = vmatmul.msk.bf16.vlgmr.msrb.gmra.mxu2 %vm778_vm4, %v6331_v23 }
 0x431   :  { %4382 = vmatmul.msk.bf16.gmra.mxu2 %vm778_vm4, %v6344_v7 }
 0x441   :  { %4383 = vmatmul.msk.bf16.gmra.mxu2 %vm778_vm4, %v6358_v9  ;;  %v1150_v9 = vld [vmem:[#allocation4 + $0x70] sm:$0xff] }
 0x442   :  { %4411 = vmatmul.msk.f32.gmra.mxu1 %vm778_vm4, %v1150_v9 }
 0x44a   :  { %4412 = vmatmul.msk.f32.gmra.mxu1 %vm778_vm4, %v1151_v24  ;;  %v4447_v24 = vld [vmem:[#allocation9 + $0x40] sm:$0xf] }
 0x451   :  { %4384 = vmatmul.msk.bf16.gmra.mxu2 %vm778_vm4, %v6370_v28 }
 0x480   :  { %v1181_v5 = vpop.f32.mrf.mxu1 }
 0x484   :  { %v920_v58 = vpop.f32.mrf.mxu2 }
 0x488   :  { %v1184_v10 = vpop.f32.mrf.mxu1 }
 0x48a   :  { %v961_v18 = vpop.f32.mrf.mxu3 }
 0x48b   :  { %v962_v20 = vadd.f32 %v961_v18, %v920_v58 }
 0x48c   :  { %v923_v59 = vpop.f32.mrf.mxu2 }
 0x492   :  { %v964_v19 = vpop.f32.mrf.mxu3 }
 0x493   :  { %v965_v28 = vadd.f32 %v964_v19, %v923_v59  ;;  %v4468_v59 = vor.u32 %v5519_v51, %v4465_v55  ;;  %v5509_v55 = vld [vmem:[#allocation9 + $0x14] sm:$0xf] }
 0x494   :  { %v926_v60 = vpop.f32.mrf.mxu2 }
 0x495   :  { %1389 = vmatpush.bf16.msra.mxu1 %v4468_v59  ;;  %v4487_v59 = vld [vmem:[#allocation9 + $0x90] sm:$0xf] }
 0x49a   :  { %v967_v21 = vpop.f32.mrf.mxu3 }
 0x49b   :  { %v968_v32 = vadd.f32 %v967_v21, %v926_v60  ;;  %v4528_v60 = vor.u32 %v5536_v8, %v4527_v56  ;;  %v4449_v21 = vld [vmem:[#allocation9 + $0x48] sm:$0xf0] }
 0x49c   :  { %v6394_v61 = vpop.f32.mrf.mxu2 }
 0x49d   :  { %1507 = vmatpush.bf16.msra.mxu2 %v4528_v60 }
 0x4a2   :  { %v970_v22 = vpop.f32.mrf.mxu3 }
 0x4a3   :  { %v971_v52 = vadd.f32 %v970_v22, %v6394_v61  ;;  %v4457_v61 = vld [vmem:[#allocation9 + $0x58] sm:$0xf0]  ;;  %v4511_v22 = vld [vmem:[#allocation9 + $0xc0] sm:$0xf] }
 0x4a4   :  { %v1015_v62 = vpop.f32.mrf.mxu2 }
 0x4ac   :  { %v1017_v0 = vpop.f32.mrf.mxu2 }
 0x4b4   :  { %v1020_v1 = vpop.f32.mrf.mxu2 }
 0x4bc   :  { %v1022_v2 = vpop.f32.mrf.mxu2 }
 0x4bf   :  { %v1187_v31 = vpop.f32.mrf.mxu1 }
 0x4c4   :  { %v1025_v3 = vpop.f32.mrf.mxu2 }
 0x4c7   :  { %v1190_v58 = vpop.f32.mrf.mxu1 }
 0x4cc   :  { %v1027_v23 = vpop.f32.mrf.mxu2 }
 0x4d4   :  { %v1030_v12 = vpop.f32.mrf.mxu2 }
 0x4dc   :  { %v1032_v7 = vpop.f32.mrf.mxu2 }
 0x4dd   :  { %1060 = vmatpush.msra.mxu3 %v1032_v7 }
 0x4df   :  { %1061 = vmatpush.msra.mxu3 %v1030_v12  ;;  %v4519_v12 = vld [vmem:[#allocation9 + $0xd0] sm:$0xf] }
 0x4e0   :  { %v4520_v14 = vor.u32 %v5534_v13, %v4519_v12  ;;  %v4415_v12 = vld [vmem:[#allocation9] sm:$0xf]  ;;  %v5508_v13 = vld [vmem:[#allocation9 + $0x4] sm:$0xf0] }
 0x4e1   :  { %1062 = vmatpush.msra.mxu3 %v1027_v23 }
 0x4e2   :  { %1508 = vmatpush.bf16.msra.mxu2 %v4520_v14 }
 0x4e3   :  { %1063 = vmatpush.msra.mxu3 %v1025_v3 }
 0x4e5   :  { %1064 = vmatpush.msra.mxu3 %v1022_v2  ;;  %v5517_v2 = vld [vmem:[#allocation9 + $0x54] sm:$0xf] }
 0x4e6   :  { %v4460_v7 = vor.u32 %v5517_v2, %v4457_v61 }
 0x4e7   :  { %1065 = vmatpush.msra.mxu3 %v1020_v1  ;;  %v5518_v1 = vld [vmem:[#allocation9 + $0x54] sm:$0xf0] }
 0x4e8   :  { %1390 = vmatpush.bf16.msra.mxu1 %v4460_v7  ;;  %v5507_v7 = vld [vmem:[#allocation9 + $0x4] sm:$0xf] }
 0x4e9   :  { %1066 = vmatpush.msra.mxu3 %v1017_v0  ;;  %v4455_v0 = vld [vmem:[#allocation9 + $0x50] sm:$0xf] }
 0x4ea   :  { %v4456_v23 = vor.u32 %v5518_v1, %v4455_v0 }
 0x4eb   :  { %1067 = vmatpush.msra.mxu3 %v1015_v62 }
 0x4ec   :  { %4385 = vmatmul.msk.f32.vlgmr.msra.gmra.mxu3 %vm778_vm4, %v1036_v63 }
 0x4ed   :  { %1369 = vmatpush.bf16.msrb.mxu3 %v4472_v41  ;;  %v4431_v41 = vld [vmem:[#allocation9 + $0x20] sm:$0xf] }
 0x4ee   :  { %v4432_v45 = vor.u32 %v5512_v6, %v4431_v41  ;;  %v4583_v6 = vld [vmem:[#allocation9 + $0x140] sm:$0xf] }
 0x4f1   :  { %1370 = vmatpush.bf16.msrb.mxu3 %v4464_v54  ;;  %v5510_v54 = vld [vmem:[#allocation9 + $0x14] sm:$0xf0] }
 0x4f4   :  { %4386 = vmatmul.msk.f32.gmra.mxu3 %vm778_vm4, %v1037_v15  ;;  %v5516_v15 = vld [vmem:[#allocation9 + $0x44] sm:$0xf0] }
 0x4f5   :  { %1371 = vmatpush.bf16.msrb.mxu3 %v4456_v23  ;;  %v4448_v19 = vor.u32 %v5516_v15, %v4447_v24  ;;  %v4479_v24 = vld [vmem:[#allocation9 + $0x80] sm:$0xf]  ;;  %v5524_v15 = vld [vmem:[#allocation9 + $0x84] sm:$0xf0] }
 0x4f9   :  { %1372 = vmatpush.bf16.msrb.mxu3 %v4448_v19  ;;  %v5537_v19 = vld [vmem:[#allocation9 + $0xf4] sm:$0xf] }
 0x4fc   :  { %4387 = vmatmul.msk.f32.gmra.mxu3 %vm778_vm4, %v1038_v16  ;;  %v5515_v16 = vld [vmem:[#allocation9 + $0x44] sm:$0xf] }
 0x504   :  { %4388 = vmatmul.msk.f32.gmra.mxu3 %vm778_vm4, %v1039_v17 }
 0x56f   :  { %v1069_v26 = vpop.f32.mrf.mxu3 }
 0x570   :  { %v1081_v27 = vadd.f32 %v1069_v26, %v962_v20  ;;  %v5532_v26 = vld [vmem:[#allocation9 + $0xc4] sm:$0xf0]  ;;  %v4439_v20 = vld [vmem:[#allocation9 + $0x30] sm:$0xf] }
 0x572   :  { %v6406_v33 = vadd.f32 %v1181_v5, %v1081_v27  ;;  %v4452_v5 = vor.u32 %v5515_v16, %v4449_v21  ;;  %v5513_v27 = vld [vmem:[#allocation9 + $0x34] sm:$0xf]  ;;  %v4537_v21 = vld [vmem:[#allocation9 + $0xf8] sm:$0xf0] }
 0x574   :  { %v1207_v39 = vmul.f32 %v6406_v33, %v6406_v33  ;;  %1391 = vmatpush.bf16.msra.mxu1 %v4452_v5 }
 0x577   :  { %v1072_v25 = vpop.f32.mrf.mxu3 }
 0x578   :  { %v1082_v29 = vadd.f32 %v1072_v25, %v965_v28  ;;  %v4512_v25 = vor.u32 %v5532_v26, %v4511_v22  ;;  %v4607_v22 = vld [vmem:[#allocation9 + $0x170] sm:$0xf]  ;;  %v4540_v26 = vor.u32 %v5537_v19, %v4537_v21 }
 0x57a   :  { %v6404_v30 = vadd.f32 %v1184_v10, %v1082_v29  ;;  %v5514_v29 = vld [vmem:[#allocation9 + $0x34] sm:$0xf0]  ;;  %1509 = vmatpush.bf16.msra.mxu2 %v4512_v25  ;;  %v5535_v25 = vld [vmem:[#allocation9 + $0xe4] sm:$0xf] }
 0x57c   :  { %v1208_v35 = vmul.f32 %v6404_v30, %v6404_v30  ;;  %v1197_v11 = vadd.f32 %v6404_v30, %v6406_v33 }
 0x57e   :  { %v1211_v46 = vadd.f32 %v1208_v35, %v1207_v39  ;;  %v4441_v35 = vld [vmem:[#allocation9 + $0x38] sm:$0xf0] }
 0x57f   :  { %v1075_v34 = vpop.f32.mrf.mxu3  ;;  %v4444_v36 = vor.u32 %v5513_v27, %v4441_v35  ;;  %v4521_v35 = vld [vmem:[#allocation9 + $0xd8] sm:$0xf0] }
 0x580   :  { %v1083_v4 = vadd.f32 %v1075_v34, %v968_v32  ;;  %v4440_v34 = vor.u32 %v5514_v29, %v4439_v20  ;;  %v4529_v20 = vld [vmem:[#allocation9 + $0xe8] sm:$0xf0]  ;;  %v4599_v29 = vld [vmem:[#allocation9 + $0x160] sm:$0xf] }
 0x581   :  { %1392 = vmatpush.bf16.msra.mxu1 %v4444_v36  ;;  %v4532_v27 = vor.u32 %v5535_v25, %v4529_v20  ;;  %v5550_v36 = vld [vmem:[#allocation9 + $0x154] sm:$0xf0] }
 0x582   :  { %v6414_v40 = vadd.f32 %v1187_v31, %v1083_v4  ;;  %v4503_v4 = vld [vmem:[#allocation9 + $0xb0] sm:$0xf]  ;;  %1373 = vmatpush.bf16.msrb.mxu3 %v4440_v34  ;;  %v5533_v34 = vld [vmem:[#allocation9 + $0xd4] sm:$0xf] }
 0x584   :  { %v1198_v47 = vadd.f32 %v1197_v11, %v6414_v40  ;;  %v1209_v48 = vmul.f32 %v6414_v40, %v6414_v40  ;;  %v4504_v11 = vor.u32 %v5530_v37, %v4503_v4  ;;  %v4591_v4 = vld [vmem:[#allocation9 + $0x150] sm:$0xf]  ;;  %v4524_v37 = vor.u32 %v5533_v34, %v4521_v35 }
 0x586   :  { %v1212_v53 = vadd.f32 %v1211_v46, %v1209_v48  ;;  %1510 = vmatpush.bf16.msra.mxu2 %v4504_v11  ;;  %v4433_v46 = vld [vmem:[#allocation9 + $0x28] sm:$0xf0]  ;;  %v4495_v48 = vld [vmem:[#allocation9 + $0xa0] sm:$0xf]  ;;  %1374 = vmatpush.bf16.msrb.mxu3 %v4432_v45 }
 0x587   :  { %v1078_v57 = vpop.f32.mrf.mxu3  ;;  %v4513_v11 = vld [vmem:[#allocation9 + $0xc8] sm:$0xf0] }
 0x588   :  { %v1084_v62 = vadd.f32 %v1078_v57, %v971_v52  ;;  %v4496_v52 = vor.u32 %v5528_v49, %v4495_v48  ;;  %v5529_v49 = vld [vmem:[#allocation9 + $0xb4] sm:$0xf] }
 0x58a   :  { %v6420_v3 = vadd.f32 %v1190_v58, %v1084_v62  ;;  %1511 = vmatpush.bf16.msra.mxu2 %v4496_v52  ;;  %v4425_v58 = vld [vmem:[#allocation9 + $0x18] sm:$0xf0]  ;;  %v5526_v62 = vld [vmem:[#allocation9 + $0x94] sm:$0xf0]  ;;  %v5780_v52 = vld [vmem:[%s6734_s7] ss:$0 sm:$0xff] }
 0x58b   :  { %v4428_v60 = vor.u32 %v5509_v55, %v4425_v58  ;;  %v4488_v61 = vor.u32 %v5526_v62, %v4487_v59  ;;  %v5546_v55 = vld [vmem:[#allocation9 + $0x134] sm:$0xf0]  ;;  %v5527_v58 = vld [vmem:[#allocation9 + $0xa4] sm:$0xf]  ;;  %v4497_v59 = vld [vmem:[#allocation9 + $0xa8] sm:$0xf0] }
 0x58c   :  { %v1199_v9 = vadd.f32 %v1198_v47, %v6420_v3  ;;  %v1210_v63 = vmul.f32 %v6420_v3, %v6420_v3  ;;  %v4436_v47 = vor.u32 %v5511_v42, %v4433_v46  ;;  %v5548_v42 = vld [vmem:[#allocation9 + $0x144] sm:$0xf0] }
 0x58d   :  { %v4584_v46 = vor.u32 %v5548_v42, %v4583_v6  ;;  %v5570_v42 = vld [vmem:[#allocation9 + $0x1f4] sm:$0xf0] }
 0x58e   :  { %v1200_v17 = vrot.slane %v1199_v9, 4  ;;  %v1213_v18 = vadd.f32 %v1212_v53, %v1210_v63  ;;  %1393 = vmatpush.bf16.msra.mxu1 %v4436_v47  ;;  %v4423_v53 = vld [vmem:[#allocation9 + $0x10] sm:$0xf]  ;;  %v4417_v63 = vld [vmem:[#allocation9 + $0x8] sm:$0xf0]  ;;  %1512 = vmatpush.bf16.msra.mxu2 %v4488_v61 }
 0x58f   :  { %v4424_v57 = vor.u32 %v5510_v54, %v4423_v53  ;;  %v4420_v16 = vor.u32 %v5507_v7, %v4417_v63  ;;  %v4575_v54 = vld [vmem:[#allocation9 + $0x130] sm:$0xf]  ;;  %v5544_v61 = vld [vmem:[#allocation9 + $0x124] sm:$0xf0] }
 0x590   :  { %v1201_v10 = vadd.f32 %v1200_v17, %v1199_v9  ;;  %v1214_v28 = vrot.slane %v1213_v18, 4  ;;  %v4416_v9 = vor.u32 %v5508_v13, %v4415_v12  ;;  %v4480_v17 = vor.u32 %v5524_v15, %v4479_v24  ;;  %v5525_v12 = vld [vmem:[#allocation9 + $0x94] sm:$0xf]  ;;  %v4489_v13 = vld [vmem:[#allocation9 + $0x98] sm:$0xf0] }
 0x591   :  { %1375 = vmatpush.bf16.msrb.mxu3 %v4424_v57  ;;  %v4576_v57 = vor.u32 %v5546_v55, %v4575_v54  ;;  %v5781_v24 = vld [vmem:[%s6735_s8] ss:$0 sm:$0xff]  ;;  %v4559_v15 = vld [vmem:[#allocation9 + $0x110] sm:$0xf] }
 0x592   :  { %v1202_v31 = vrot.slane %v1201_v10, 2  ;;  %v1215_v32 = vadd.f32 %v1214_v28, %v1213_v18  ;;  %1394 = vmatpush.bf16.msra.mxu1 %v4428_v60  ;;  %1513 = vmatpush.bf16.msra.mxu2 %v4480_v17  ;;  %v4567_v60 = vld [vmem:[#allocation9 + $0x120] sm:$0xf]  ;;  %v4492_v17 = vor.u32 %v5525_v12, %v4489_v13  ;;  %v5562_v13 = vld [vmem:[#allocation9 + $0x1b4] sm:$0xf0] }
 0x594   :  { %v1203_v38 = vadd.f32 %v1202_v31, %v1201_v10  ;;  %v1216_v39 = vrot.slane %v1215_v32, 2  ;;  %v5554_v10 = vld [vmem:[#allocation9 + $0x174] sm:$0xf0]  ;;  %v5552_v31 = vld [vmem:[#allocation9 + $0x164] sm:$0xf0] }
 0x595   :  { %1376 = vmatpush.bf16.msrb.mxu3 %v4416_v9  ;;  %v4608_v28 = vor.u32 %v5554_v10, %v4607_v22  ;;  %v4551_v10 = vld [vmem:[#allocation9 + $0x100] sm:$0xf] }
 0x596   :  { %v1204_v43 = vrot.slane %v1203_v38, 1  ;;  %v1217_v44 = vadd.f32 %v1216_v39, %v1215_v32  ;;  %1395 = vmatpush.bf16.msra.mxu1 %v4420_v16  ;;  %v4600_v32 = vor.u32 %v5552_v31, %v4599_v29  ;;  %v5531_v39 = vld [vmem:[#allocation9 + $0xc4] sm:$0xf]  ;;  %v5542_v16 = vld [vmem:[#allocation9 + $0x114] sm:$0xf0] }
 0x597   :  { %1749 = vmatpush.bf16.msrb.mxu2 %v4608_v28  ;;  %v5540_v28 = vld [vmem:[#allocation9 + $0x104] sm:$0xf0] }
 0x598   :  { %v1205_v50 = vadd.f32 %v1204_v43, %v1203_v38  ;;  %v1218_v51 = vrot.slane %v1217_v44, 1  ;;  %v4592_v38 = vor.u32 %v5550_v36, %v4591_v4  ;;  %v4552_v31 = vor.u32 %v5540_v28, %v4551_v10  ;;  %v5567_v28 = vld [vmem:[#allocation9 + $0x1e4] sm:$0xf] }
 0x599   :  { %1525 = vmatpush.bf16.msra.mxu3 %v4540_v26 }
 0x59a   :  { %v6425_v56 = vmul.f32 0.03125, %v1205_v50  ;;  %v1219_v8 = vadd.f32 %v1218_v51, %v1217_v44  ;;  %v4516_v44 = vor.u32 %v5531_v39, %v4513_v11  ;;  %v4505_v50 = vld [vmem:[#allocation9 + $0xb8] sm:$0xf0]  ;;  %v5553_v39 = vld [vmem:[#allocation9 + $0x174] sm:$0xf] }
 0x59b   :  { %1750 = vmatpush.bf16.msrb.mxu2 %v4600_v32  ;;  %v4508_v53 = vor.u32 %v5529_v49, %v4505_v50  ;;  %v4609_v11 = vld [vmem:[#allocation9 + $0x178] sm:$0xf0]  ;;  %v5549_v50 = vld [vmem:[#allocation9 + $0x154] sm:$0xf] }
 0x59c   :  { %v1220_v0 = vmul.f32 0.03125, %v1219_v8  ;;  %v1221_v1 = vmul.f32 %v6425_v56, %v6425_v56  ;;  %v1224_v2 = vsub.f32 %v6406_v33, %v6425_v56  ;;  %v1226_v23 = vsub.f32 %v6414_v40, %v6425_v56  ;;  %v5523_v33 = vld [vmem:[#allocation9 + $0x84] sm:$0xf]  ;;  %v4593_v51 = vld [vmem:[#allocation9 + $0x158] sm:$0xf0] }
 0x59d   :  { %1526 = vmatpush.bf16.msra.mxu3 %v4532_v27  ;;  %v1225_v62 = vsub.f32 %v6404_v30, %v6425_v56  ;;  %v4612_v6 = vor.u32 %v5553_v39, %v4609_v11  ;;  %v4596_v54 = vor.u32 %v5549_v50, %v4593_v51  ;;  %v5559_v11 = vld [vmem:[#allocation9 + $0x1a4] sm:$0xf] }
 0x59e   :  { %v1222_v14 = vsub.f32 %v1220_v0, %v1221_v1  ;;  %v1227_v0 = vsub.f32 %v6420_v3, %v6425_v56  ;;  %v4500_v1 = vor.u32 %v5527_v58, %v4497_v59  ;;  %v4651_v58 = vld [vmem:[#allocation9 + $0x1c0] sm:$0xf]  ;;  %v5564_v59 = vld [vmem:[#allocation9 + $0x1c4] sm:$0xf0] }
 0x59f   :  { %1751 = vmatpush.bf16.msrb.mxu2 %v4592_v38 }
 0x5a0   :  { %v1223_v18 = vmax.f32 %v1222_v14, 0.0  ;;  %v4568_v14 = vor.u32 %v5544_v61, %v4567_v60  ;;  %v4643_v61 = vld [vmem:[#allocation9 + $0x1b0] sm:$0xf] }
 0x5a1   :  { %1527 = vmatpush.bf16.msra.mxu3 %v4524_v37 }
 0x5a2   :  { %v1228_v5 = vadd.f32 1e-05, %v1223_v18 }
 0x5a3   :  { %1752 = vmatpush.bf16.msrb.mxu2 %v4584_v46  ;;  %v4667_v46 = vld [vmem:[#allocation9 + $0x1e0] sm:$0xf] }
 0x5a4   :  { %5783 = vrsqrt.f32 %v1228_v5  ;;  %vm1235_vm12 = vweird.f32 %v1228_v5 }
 0x5a5   :  { %1528 = vmatpush.bf16.msra.mxu3 %v4516_v44  ;;  %v5551_v44 = vld [vmem:[#allocation9 + $0x164] sm:$0xf] }
 0x5a7   :  { %1753 = vmatpush.bf16.msrb.mxu2 %v4576_v57  ;;  %v4585_v57 = vld [vmem:[#allocation9 + $0x148] sm:$0xf0] }
 0x5a9   :  { %1529 = vmatpush.bf16.msra.mxu3 %v4508_v53  ;;  %v5566_v53 = vld [vmem:[#allocation9 + $0x1d4] sm:$0xf0] }
 0x5aa   :  { %v5784_v41 = vpop.eup %5783 }
 0x5ab   :  { %v1230_v43 = vmul.f32 %v5784_v41, %v1228_v5  ;;  %vm1236_vm11 = vweird.f32 %v5784_v41  ;;  %1754 = vmatpush.bf16.msrb.mxu2 %v4568_v14  ;;  %v4560_v5 = vor.u32 %v5542_v16, %v4559_v15  ;;  %v5543_v14 = vld [vmem:[#allocation9 + $0x124] sm:$0xf]  ;;  %v5541_v15 = vld [vmem:[#allocation9 + $0x114] sm:$0xf]  ;;  %v4561_v16 = vld [vmem:[#allocation9 + $0x118] sm:$0xf0] }
 0x5ac   :  { %vm6433_vm13 = vmor %vm1235_vm12, %vm1236_vm11 }
 0x5ad   :  { %v1231_v45 = vmul.f32 %v5784_v41, %v1230_v43  ;;  %1530 = vmatpush.bf16.msra.mxu3 %v4500_v1  ;;  %v4577_v1 = vld [vmem:[#allocation9 + $0x138] sm:$0xf0] }
 0x5af   :  { %v1232_v47 = vmul.f32 0.5, %v1231_v45  ;;  %1755 = vmatpush.bf16.msrb.mxu2 %v4560_v5  ;;  %v4601_v45 = vld [vmem:[#allocation9 + $0x168] sm:$0xf0]  ;;  %v5556_v5 = vld [vmem:[#allocation9 + $0x184] sm:$0xf0] }
 0x5b1   :  { %v1233_v48 = vsub.f32 1.5, %v1232_v47  ;;  %1531 = vmatpush.bf16.msra.mxu3 %v4492_v17  ;;  %v4604_v47 = vor.u32 %v5551_v44, %v4601_v45  ;;  %v4627_v17 = vld [vmem:[#allocation9 + $0x190] sm:$0xf]  ;;  %v5555_v45 = vld [vmem:[#allocation9 + $0x184] sm:$0xf] }
 0x5b3   :  { %v1234_v8 = vmul.f32 %v5784_v41, %v1233_v48  ;;  %1756 = vmatpush.bf16.msrb.mxu2 %v4552_v31  ;;  %v5568_v48 = vld [vmem:[#allocation9 + $0x1e4] sm:$0xf0] }
 0x5b4   :  { %v4668_v49 = vor.u32 %v5568_v48, %v4667_v46  ;;  %v4621_v46 = vld [vmem:[#allocation9 + $0x188] sm:$0xf0] }
 0x5b5   :  { %v1238_v7 = vsel %vm6433_vm13, %v5784_v41, %v1234_v8  ;;  %v4675_v41 = vld [vmem:[#allocation9 + $0x1f0] sm:$0xf]  ;;  %v5547_v8 = vld [vmem:[#allocation9 + $0x144] sm:$0xf]  ;;  %vm2648_vm13 = vcmask 130048  }
 0x5b6   :  { %v1239_v9 = vmul.f32 %v1238_v7, %v1224_v2  ;;  %v1240_v63 = vmul.f32 %v1238_v7, %v1225_v62  ;;  %v1241_v30 = vmul.f32 %v1238_v7, %v1226_v23  ;;  %v1242_v3 = vmul.f32 %v1238_v7, %v1227_v0  ;;  %v4481_v2 = vld [vmem:[#allocation9 + $0x88] sm:$0xf0]  ;;  %v5545_v0 = vld [vmem:[#allocation9 + $0x134] sm:$0xf] }
 0x5b7   :  { %v4484_v25 = vor.u32 %v5523_v33, %v4481_v2  ;;  %v4676_v43 = vor.u32 %v5570_v42, %v4675_v41  ;;  %v4588_v60 = vor.u32 %v5547_v8, %v4585_v57  ;;  %v4652_v62 = vor.u32 %v5564_v59, %v4651_v58  ;;  %v4553_v33 = vld [vmem:[#allocation9 + $0x108] sm:$0xf0]  ;;  %v4619_v2 = vld [vmem:[#allocation9 + $0x180] sm:$0xf]  ;;  %v5557_v42 = vld [vmem:[#allocation9 + $0x194] sm:$0xf] }
 0x5b8   :  { %v1247_v18 = vmul.f32 %v5780_v52, %v1239_v9  ;;  %v1248_v19 = vmul.f32 %v5780_v52, %v1240_v63  ;;  %v1249_v21 = vmul.f32 %v5780_v52, %v1241_v30  ;;  %v1250_v22 = vmul.f32 %v5780_v52, %v1242_v3  ;;  %v4659_v52 = vld [vmem:[#allocation9 + $0x1d0] sm:$0xf]  ;;  %v4569_v9 = vld [vmem:[#allocation9 + $0x128] sm:$0xf0]  ;;  %v4635_v63 = vld [vmem:[#allocation9 + $0x1a0] sm:$0xf] }
 0x5b9   :  { %1532 = vmatpush.bf16.msra.mxu3 %v4484_v25  ;;  %v4660_v55 = vor.u32 %v5566_v53, %v4659_v52  ;;  %v4580_v12 = vor.u32 %v5545_v0, %v4577_v1  ;;  %v4644_v7 = vor.u32 %v5562_v13, %v4643_v61  ;;  %v4572_v30 = vor.u32 %v5543_v14, %v4569_v9  ;;  %v5560_v3 = vld [vmem:[#allocation9 + $0x1a4] sm:$0xf0]  ;;  %v4669_v25 = vld [vmem:[#allocation9 + $0x1e8] sm:$0xf0]  ;;  %v1545_v8 = vld [vmem:[#allocation7 + $0x10] sm:$0xff] }
 0x5ba   :  { %v1255_v26 = vadd.f32 %v5781_v24, %v1247_v18  ;;  %v1256_v40 = vadd.f32 %v5781_v24, %v1248_v19  ;;  %v1257_v56 = vadd.f32 %v5781_v24, %v1249_v21  ;;  %v1258_v23 = vadd.f32 %v5781_v24, %v1250_v22  ;;  %v5558_v18 = vld [vmem:[#allocation9 + $0x194] sm:$0xf0]  ;;  %v5539_v22 = vld [vmem:[#allocation9 + $0x104] sm:$0xf]  ;;  %v4637_v41 = vld [vmem:[#allocation9 + $0x1a8] sm:$0xf0] }
 0x5bb   :  { %v4636_v24 = vor.u32 %v5560_v3, %v4635_v63  ;;  %v4564_v19 = vor.u32 %v5541_v15, %v4561_v16  ;;  %v4628_v21 = vor.u32 %v5558_v18, %v4627_v17  ;;  %v1407_v0 = vld [vmem:[#allocation7] sm:$0xff]  ;;  %v1789_v15 = vld [vmem:[#allocation7 + $0x28] sm:$0xff] }
 0x5bc   :  { %vm1259_vm14 = vcmp.gt.f32.partialorder %v1255_v26, 0.0  ;;  %vm1260_vm15 = vcmp.gt.f32.partialorder %v1256_v40, 0.0  ;;  %vm1261_vm0 = vcmp.gt.f32.partialorder %v1257_v56, 0.0  ;;  %vm1262_vm1 = vcmp.gt.f32.partialorder %v1258_v23, 0.0 }
 0x5bd   :  { %v1263_v20 = vmul.f32 0.2, %v1255_v26  ;;  %v1264_v29 = vmul.f32 0.2, %v1256_v40  ;;  %v1265_v27 = vmul.f32 0.2, %v1257_v56 }
 0x5be   :  { %v1266_v32 = vmul.f32 0.2, %v1258_v23 }
 0x5bf   :  { %v1267_v34 = vsel %vm1259_vm14, %v1255_v26, %v1263_v20  ;;  %v1268_v35 = vsel %vm1260_vm15, %v1256_v40, %v1264_v29  ;;  %v1269_v4 = vsel %vm1261_vm0, %v1257_v56, %v1265_v27  ;;  %v4556_v26 = vor.u32 %v5539_v22, %v4553_v33  ;;  %v5569_v56 = vld [vmem:[#allocation9 + $0x1f4] sm:$0xf]  ;;  %v4661_v27 = vld [vmem:[#allocation9 + $0x1d8] sm:$0xf0] }
 0x5c0   :  { %v1270_v36 = vsel %vm1262_vm1, %v1258_v23, %v1266_v32  ;;  %v6455_v37 = vpack.c.bf16 %v1268_v35, %v1267_v34  ;;  %v4620_v40 = vor.u32 %v5556_v5, %v4619_v2  ;;  %v4677_v23 = vld [vmem:[#allocation9 + $0x1f8] sm:$0xf0]  ;;  %v4672_v20 = vor.u32 %v5567_v28, %v4669_v25  ;;  %v5565_v29 = vld [vmem:[#allocation9 + $0x1d4] sm:$0xf]  ;;  %v5563_v32 = vld [vmem:[#allocation9 + $0x1c4] sm:$0xf] }
 0x5c1   :  { %v6457_v38 = vpack.c.bf16 %v1270_v36, %v1269_v4  ;;  %v4680_v10 = vor.u32 %v5569_v56, %v4677_v23  ;;  %v4664_v31 = vor.u32 %v5565_v29, %v4661_v27  ;;  %v4653_v34 = vld [vmem:[#allocation9 + $0x1c8] sm:$0xf0]  ;;  %v5561_v4 = vld [vmem:[#allocation9 + $0x1b4] sm:$0xf]  ;;  %v4645_v36 = vld [vmem:[#allocation9 + $0x1b8] sm:$0xf0] }
 0x5c2   :  { %1377 = vmatmul.bf16.vlgmr.msrb.gmra.mxu3 %v6455_v37  ;;  %1396 = vmatmul.bf16.vlgmr.msra.gmra.mxu1 %v6455_v37  ;;  %v4656_v35 = vor.u32 %v5563_v32, %v4653_v34  ;;  %v4648_v39 = vor.u32 %v5561_v4, %v4645_v36  ;;  %v1982_v22 = vld [vmem:[#allocation7 + $0x30] sm:$0xff]  ;;  %v1983_v2 = vld [vmem:[#allocation7 + $0x38] sm:$0xff]  ;;  %v5584_v32 = vld [vmem:[#allocation12 + $0x64] sm:$0xf0] }
 0x5c3   :  { %1514 = vmatmul.bf16.vlgmr.msra.gmra.mxu2 %v6455_v37  ;;  %1768 = vmatpush.bf16.msrb.mxu3 %v4612_v6  ;;  %v4640_v6 = vor.u32 %v5559_v11, %v4637_v41  ;;  %v4743_v25 = vld [vmem:[#allocation12 + $0x70] sm:$0xf]  ;;  %v5582_v36 = vld [vmem:[#allocation12 + $0x54] sm:$0xf0]  ;;  %v4719_v41 = vld [vmem:[#allocation12 + $0x40] sm:$0xf] }
 0x5c4   :  { %1943 = vmatpush.bf16.msra.mxu2 %v4676_v43  ;;  %v4629_v43 = vld [vmem:[#allocation9 + $0x198] sm:$0xf0]  ;;  %v4727_v4 = vld [vmem:[#allocation12 + $0x50] sm:$0xf] }
 0x5c5   :  { %v4632_v44 = vor.u32 %v5557_v42, %v4629_v43  ;;  %v5585_v43 = vld [vmem:[#allocation12 + $0x74] sm:$0xf] }
 0x5c7   :  { %1769 = vmatpush.bf16.msrb.mxu3 %v4604_v47  ;;  %v4624_v47 = vor.u32 %v5555_v45, %v4621_v46  ;;  %v4711_v46 = vld [vmem:[#allocation12 + $0x30] sm:$0xf] }
 0x5c8   :  { %1944 = vmatpush.bf16.msra.mxu2 %v4668_v49 }
 0x5cb   :  { %1770 = vmatpush.bf16.msrb.mxu3 %v4596_v54 }
 0x5cc   :  { %1945 = vmatpush.bf16.msra.mxu2 %v4660_v55 }
 0x5cf   :  { %1771 = vmatpush.bf16.msrb.mxu3 %v4588_v60 }
 0x5d0   :  { %1946 = vmatpush.bf16.msra.mxu2 %v4652_v62 }
 0x5d2   :  { %1382 = vmatmul.bf16.gmra.mxu3 %v6457_v38  ;;  %1401 = vmatmul.bf16.gmra.mxu1 %v6457_v38 }
 0x5d3   :  { %1519 = vmatmul.bf16.gmra.mxu2 %v6457_v38  ;;  %1772 = vmatpush.bf16.msrb.mxu3 %v4580_v12 }
 0x5d4   :  { %1947 = vmatpush.bf16.msra.mxu2 %v4644_v7  ;;  %v1408_v7 = vld [vmem:[#allocation7 + $0x8] sm:$0xff] }
 0x5d7   :  { %1773 = vmatpush.bf16.msrb.mxu3 %v4572_v30  ;;  %v1788_v30 = vld [vmem:[#allocation7 + $0x20] sm:$0xff] }
 0x5d8   :  { %1948 = vmatpush.bf16.msra.mxu2 %v4636_v24 }
 0x5db   :  { %1774 = vmatpush.bf16.msrb.mxu3 %v4564_v19 }
 0x5dc   :  { %1949 = vmatpush.bf16.msra.mxu2 %v4628_v21 }
 0x5df   :  { %1775 = vmatpush.bf16.msrb.mxu3 %v4556_v26 }
 0x5e0   :  { %1950 = vmatpush.bf16.msra.mxu2 %v4620_v40 }
 0x5e2   :  { %1533 = vmatmul.bf16.vlgmr.msra.gmra.mxu3 %v6455_v37 }
 0x5e3   :  { %1757 = vmatmul.bf16.vlgmr.msrb.gmra.mxu2 %v6455_v37  ;;  %1962 = vmatpush.bf16.msra.mxu3 %v4680_v10 }
 0x5e7   :  { %1963 = vmatpush.bf16.msra.mxu3 %v4672_v20  ;;  %v5586_v20 = vld [vmem:[#allocation12 + $0x74] sm:$0xf0] }
 0x5e8   :  { %v4744_v29 = vor.u32 %v5586_v20, %v4743_v25  ;;  %v4855_v25 = vld [vmem:[#allocation12 + $0x150] sm:$0xf] }
 0x5eb   :  { %1964 = vmatpush.bf16.msra.mxu3 %v4664_v31  ;;  %v4735_v31 = vld [vmem:[#allocation12 + $0x60] sm:$0xf] }
 0x5ec   :  { %v4736_v34 = vor.u32 %v5584_v32, %v4735_v31 }
 0x5ef   :  { %1965 = vmatpush.bf16.msra.mxu3 %v4656_v35 }
 0x5f2   :  { %1538 = vmatmul.bf16.gmra.mxu3 %v6457_v38 }
 0x5f3   :  { %1762 = vmatmul.bf16.gmra.mxu2 %v6457_v38  ;;  %1966 = vmatpush.bf16.msra.mxu3 %v4648_v39  ;;  %v4728_v39 = vor.u32 %v5582_v36, %v4727_v4 }
 0x5f7   :  { %1967 = vmatpush.bf16.msra.mxu3 %v4640_v6  ;;  %v5580_v6 = vld [vmem:[#allocation12 + $0x44] sm:$0xf0] }
 0x5f8   :  { %v4720_v42 = vor.u32 %v5580_v6, %v4719_v41  ;;  %v5571_v41 = vld [vmem:[#allocation12 + $0x4] sm:$0xf]  ;;  %v4689_v6 = vld [vmem:[#allocation12 + $0x8] sm:$0xf0] }
 0x5fb   :  { %1968 = vmatpush.bf16.msra.mxu3 %v4632_v44  ;;  %v4745_v44 = vld [vmem:[#allocation12 + $0x78] sm:$0xf0] }
 0x5fc   :  { %v4748_v45 = vor.u32 %v5585_v43, %v4745_v44 }
 0x5fe   :  { %2366 = vmatpush.bf16.msrb.mxu2 %v4748_v45  ;;  %v4692_v45 = vor.u32 %v5571_v41, %v4689_v6 }
 0x5ff   :  { %1969 = vmatpush.bf16.msra.mxu3 %v4624_v47  ;;  %v5578_v47 = vld [vmem:[#allocation12 + $0x34] sm:$0xf0] }
 0x602   :  { %1776 = vmatmul.bf16.vlgmr.msrb.gmra.mxu3 %v6455_v37 }
 0x603   :  { %1951 = vmatmul.bf16.vlgmr.msra.gmra.mxu2 %v6455_v37 }
 0x612   :  { %1781 = vmatmul.bf16.gmra.mxu3 %v6457_v38 }
 0x613   :  { %1956 = vmatmul.bf16.gmra.mxu2 %v6457_v38 }
 0x622   :  { %1970 = vmatmul.bf16.vlgmr.msra.gmra.mxu3 %v6455_v37 }
 0x632   :  { %1975 = vmatmul.bf16.gmra.mxu3 %v6457_v38  ;;  %v1546_v38 = vld [vmem:[#allocation7 + $0x18] sm:$0xff] }
 0x63f   :  { %v1397_v58 = vpop.f32.mrf.mxu1 }
 0x645   :  { %v1378_v48 = vpop.f32.mrf.mxu3 }
 0x646   :  { %v1515_v49 = vpop.f32.mrf.mxu2 }
 0x647   :  { %v1399_v62 = vpop.f32.mrf.mxu1 }
 0x64d   :  { %v1380_v50 = vpop.f32.mrf.mxu3 }
 0x64e   :  { %v1517_v51 = vpop.f32.mrf.mxu2 }
 0x64f   :  { %v1402_v12 = vpop.f32.mrf.mxu1 }
 0x655   :  { %v1383_v52 = vpop.f32.mrf.mxu3 }
 0x656   :  { %v1520_v53 = vpop.f32.mrf.mxu2 }
 0x657   :  { %v1404_v9 = vpop.f32.mrf.mxu1 }
 0x65d   :  { %v1385_v54 = vpop.f32.mrf.mxu3 }
 0x65e   :  { %v1522_v55 = vpop.f32.mrf.mxu2 }
 0x65f   :  { %1566 = vmatpush.msrb.mxu0 %v1522_v55  ;;  %v5576_v55 = vld [vmem:[#allocation12 + $0x24] sm:$0xf0] }
 0x661   :  { %1567 = vmatpush.msrb.mxu0 %v1520_v53 }
 0x663   :  { %1568 = vmatpush.msrb.mxu0 %v1517_v51  ;;  %v4737_v51 = vld [vmem:[#allocation12 + $0x68] sm:$0xf0] }
 0x665   :  { %1569 = vmatpush.msrb.mxu0 %v1515_v49  ;;  %v1534_v57 = vpop.f32.mrf.mxu3  ;;  %v4712_v49 = vor.u32 %v5578_v47, %v4711_v46  ;;  %v5612_v46 = vld [vmem:[#allocation12 + $0x144] sm:$0xf0]  ;;  %v5617_v47 = vld [vmem:[#allocation12 + $0x174] sm:$0xf] }
 0x666   :  { %v1758_v37 = vpop.f32.mrf.mxu2  ;;  %4541 = vmatmul.msk.f32.vlgmr.msrb.gmra.mxu0 %vm1547_vm2, %v1545_v8 }
 0x667   :  { %1618 = vmatpush.msra.mxu0 %v1385_v54  ;;  %v4703_v54 = vld [vmem:[#allocation12 + $0x20] sm:$0xf] }
 0x669   :  { %1619 = vmatpush.msra.mxu0 %v1383_v52 }
 0x66b   :  { %1620 = vmatpush.msra.mxu0 %v1380_v50  ;;  %v5583_v50 = vld [vmem:[#allocation12 + $0x64] sm:$0xf] }
 0x66c   :  { %v4740_v52 = vor.u32 %v5583_v50, %v4737_v51 }
 0x66d   :  { %1621 = vmatpush.msra.mxu0 %v1378_v48  ;;  %v1536_v59 = vpop.f32.mrf.mxu3 }
 0x66e   :  { %v1760_v60 = vpop.f32.mrf.mxu2  ;;  %4542 = vmatmul.msk.f32.gmra.mxu0 %vm1547_vm2, %v1546_v38  ;;  %2367 = vmatpush.bf16.msrb.mxu2 %v4740_v52 }
 0x675   :  { %v1539_v1 = vpop.f32.mrf.mxu3 }
 0x676   :  { %v1763_v61 = vpop.f32.mrf.mxu2  ;;  %4545 = vmatmul.msk.f32.vlgmr.msra.gmra.mxu0 %vm1547_vm2, %v1407_v0 }
 0x67d   :  { %v1541_v13 = vpop.f32.mrf.mxu3 }
 0x67e   :  { %v1765_v14 = vpop.f32.mrf.mxu2  ;;  %1589 = vmatpush.msrb.mxu1 %v1541_v13  ;;  %4546 = vmatmul.msk.f32.gmra.mxu0 %vm1547_vm2, %v1408_v7  ;;  %v4687_v13 = vld [vmem:[#allocation12] sm:$0xf] }
 0x67f   :  { %1808 = vmatpush.msrb.mxu0 %v1765_v14 }
 0x680   :  { %1590 = vmatpush.msrb.mxu1 %v1539_v1 }
 0x681   :  { %1809 = vmatpush.msrb.mxu0 %v1763_v61 }
 0x682   :  { %1591 = vmatpush.msrb.mxu1 %v1536_v59  ;;  %v5574_v59 = vld [vmem:[#allocation12 + $0x14] sm:$0xf0] }
 0x683   :  { %1810 = vmatpush.msrb.mxu0 %v1760_v60 }
 0x684   :  { %1592 = vmatpush.msrb.mxu1 %v1534_v57  ;;  %v5581_v57 = vld [vmem:[#allocation12 + $0x54] sm:$0xf] }
 0x685   :  { %1811 = vmatpush.msrb.mxu0 %v1758_v37  ;;  %v1777_v63 = vpop.f32.mrf.mxu3  ;;  %4543 = vmatmul.msk.f32.vlgmr.msrb.gmra.mxu1 %vm1547_vm2, %v1545_v8  ;;  %v4704_v8 = vor.u32 %v5576_v55, %v4703_v54  ;;  %v4807_v54 = vld [vmem:[#allocation12 + $0xf0] sm:$0xf]  ;;  %v5602_v55 = vld [vmem:[#allocation12 + $0xf4] sm:$0xf0] }
 0x686   :  { %1641 = vmatpush.msra.mxu1 %v1404_v9  ;;  %v1952_v3 = vpop.f32.mrf.mxu2  ;;  %4613 = vmatmul.msk.f32.vlgmr.msrb.gmra.mxu0 %vm1547_vm2, %v1788_v30  ;;  %v5577_v9 = vld [vmem:[#allocation12 + $0x34] sm:$0xf] }
 0x688   :  { %1642 = vmatpush.msra.mxu1 %v1402_v12 }
 0x68a   :  { %1643 = vmatpush.msra.mxu1 %v1399_v62  ;;  %v5579_v62 = vld [vmem:[#allocation12 + $0x44] sm:$0xf] }
 0x68c   :  { %1644 = vmatpush.msra.mxu1 %v1397_v58  ;;  %v4729_v58 = vld [vmem:[#allocation12 + $0x58] sm:$0xf0] }
 0x68d   :  { %v1779_v24 = vpop.f32.mrf.mxu3  ;;  %4544 = vmatmul.msk.f32.gmra.mxu1 %vm1547_vm2, %v1546_v38  ;;  %v4732_v37 = vor.u32 %v5581_v57, %v4729_v58  ;;  %v4695_v38 = vld [vmem:[#allocation12 + $0x10] sm:$0xf] }
 0x68e   :  { %v1954_v16 = vpop.f32.mrf.mxu2  ;;  %4614 = vmatmul.msk.f32.gmra.mxu0 %vm1547_vm2, %v1789_v15  ;;  %v4696_v60 = vor.u32 %v5574_v59, %v4695_v38  ;;  %v4809_v38 = vld [vmem:[#allocation12 + $0xf8] sm:$0xf0]  ;;  %v4839_v59 = vld [vmem:[#allocation12 + $0x130] sm:$0xf] }
 0x68f   :  { %2368 = vmatpush.bf16.msrb.mxu2 %v4732_v37  ;;  %v4808_v37 = vor.u32 %v5602_v55, %v4807_v54  ;;  %v5604_v54 = vld [vmem:[#allocation12 + $0x104] sm:$0xf0]  ;;  %v5609_v55 = vld [vmem:[#allocation12 + $0x134] sm:$0xf] }
 0x695   :  { %v1782_v17 = vpop.f32.mrf.mxu3  ;;  %4547 = vmatmul.msk.f32.vlgmr.msra.gmra.mxu1 %vm1547_vm2, %v1407_v0  ;;  %v4721_v0 = vld [vmem:[#allocation12 + $0x48] sm:$0xf0] }
 0x696   :  { %v1957_v18 = vpop.f32.mrf.mxu2  ;;  %v4724_v1 = vor.u32 %v5579_v62, %v4721_v0  ;;  %v5610_v62 = vld [vmem:[#allocation12 + $0x134] sm:$0xf0]  ;;  %v5615_v0 = vld [vmem:[#allocation12 + $0x164] sm:$0xf] }
 0x698   :  { %2369 = vmatpush.bf16.msrb.mxu2 %v4724_v1  ;;  %v4865_v1 = vld [vmem:[#allocation12 + $0x168] sm:$0xf0] }
 0x69d   :  { %v1784_v19 = vpop.f32.mrf.mxu3  ;;  %4548 = vmatmul.msk.f32.gmra.mxu1 %vm1547_vm2, %v1408_v7  ;;  %v5572_v7 = vld [vmem:[#allocation12 + $0x4] sm:$0xf0] }
 0x69e   :  { %v1959_v21 = vpop.f32.mrf.mxu2  ;;  %1831 = vmatpush.msrb.mxu1 %v1784_v19  ;;  %v4688_v14 = vor.u32 %v5572_v7, %v4687_v13  ;;  %v5575_v19 = vld [vmem:[#allocation12 + $0x24] sm:$0xf]  ;;  %v4840_v13 = vor.u32 %v5610_v62, %v4839_v59  ;;  %v4868_v7 = vor.u32 %v5615_v0, %v4865_v1  ;;  %v4775_v59 = vld [vmem:[#allocation12 + $0xb0] sm:$0xf]  ;;  %v5593_v62 = vld [vmem:[#allocation12 + $0xb4] sm:$0xf] }
 0x69f   :  { %2002 = vmatpush.msra.mxu0 %v1959_v21  ;;  %v4705_v21 = vld [vmem:[#allocation12 + $0x28] sm:$0xf0] }
 0x6a0   :  { %1832 = vmatpush.msrb.mxu1 %v1782_v17 }
 0x6a1   :  { %2003 = vmatpush.msra.mxu0 %v1957_v18 }
 0x6a2   :  { %1833 = vmatpush.msrb.mxu1 %v1779_v24 }
 0x6a3   :  { %2004 = vmatpush.msra.mxu0 %v1954_v16  ;;  %v5618_v16 = vld [vmem:[#allocation12 + $0x174] sm:$0xf0] }
 0x6a4   :  { %1834 = vmatpush.msrb.mxu1 %v1777_v63  ;;  %v4713_v63 = vld [vmem:[#allocation12 + $0x38] sm:$0xf0] }
 0x6a5   :  { %2005 = vmatpush.msra.mxu0 %v1952_v3  ;;  %v1971_v33 = vpop.f32.mrf.mxu3  ;;  %4615 = vmatmul.msk.f32.vlgmr.msrb.gmra.mxu1 %vm1547_vm2, %v1788_v30  ;;  %v4871_v30 = vld [vmem:[#allocation12 + $0x170] sm:$0xf] }
 0x6a6   :  { %4681 = vmatmul.msk.f32.vlgmr.msra.gmra.mxu0 %vm1547_vm2, %v1982_v22  ;;  %v4872_v17 = vor.u32 %v5618_v16, %v4871_v30  ;;  %v5599_v16 = vld [vmem:[#allocation12 + $0xe4] sm:$0xf] }
 0x6a7   :  { %2338 = vmatpush.bf16.msrb.mxu0 %v4744_v29 }
 0x6ab   :  { %2339 = vmatpush.bf16.msrb.mxu0 %v4736_v34  ;;  %v5614_v34 = vld [vmem:[#allocation12 + $0x154] sm:$0xf0] }
 0x6ad   :  { %v1973_v5 = vpop.f32.mrf.mxu3  ;;  %4616 = vmatmul.msk.f32.gmra.mxu1 %vm1547_vm2, %v1789_v15  ;;  %v4716_v15 = vor.u32 %v5577_v9, %v4713_v63  ;;  %v5600_v9 = vld [vmem:[#allocation12 + $0xe4] sm:$0xf0] }
 0x6ae   :  { %4682 = vmatmul.msk.f32.gmra.mxu0 %vm1547_vm2, %v1983_v2 }
 0x6af   :  { %2340 = vmatpush.bf16.msrb.mxu0 %v4728_v39  ;;  %2370 = vmatpush.bf16.msrb.mxu2 %v4716_v15 }
 0x6b3   :  { %2341 = vmatpush.bf16.msrb.mxu0 %v4720_v42  ;;  %v4847_v42 = vld [vmem:[#allocation12 + $0x140] sm:$0xf] }
 0x6b5   :  { %v1976_v26 = vpop.f32.mrf.mxu3 }
 0x6b7   :  { %2342 = vmatpush.bf16.msrb.mxu0 %v4712_v49  ;;  %v4873_v49 = vld [vmem:[#allocation12 + $0x178] sm:$0xf0] }
 0x6b8   :  { %v4876_v52 = vor.u32 %v5617_v47, %v4873_v49 }
 0x6bb   :  { %2343 = vmatpush.bf16.msrb.mxu0 %v4704_v8  ;;  %v5601_v8 = vld [vmem:[#allocation12 + $0xf4] sm:$0xf] }
 0x6bd   :  { %v1978_v40 = vpop.f32.mrf.mxu3 }
 0x6be   :  { %2025 = vmatpush.msra.mxu1 %v1978_v40 }
 0x6bf   :  { %2344 = vmatpush.bf16.msrb.mxu0 %v4696_v60  ;;  %v4812_v60 = vor.u32 %v5601_v8, %v4809_v38  ;;  %v4841_v8 = vld [vmem:[#allocation12 + $0x138] sm:$0xf0] }
 0x6c0   :  { %2026 = vmatpush.msra.mxu1 %v1976_v26  ;;  %v5616_v26 = vld [vmem:[#allocation12 + $0x164] sm:$0xf0]  ;;  %v4844_v38 = vor.u32 %v5609_v55, %v4841_v8  ;;  %v5634_v55 = vld [vmem:[#allocation12 + $0x1f4] sm:$0xf0]  ;;  %v5633_v8 = vld [vmem:[#allocation12 + $0x1f4] sm:$0xf] }
 0x6c1   :  { %2380 = vmatpush.bf16.msrb.mxu3 %v4812_v60  ;;  %v5594_v60 = vld [vmem:[#allocation12 + $0xb4] sm:$0xf0] }
 0x6c2   :  { %2027 = vmatpush.msra.mxu1 %v1973_v5  ;;  %v4708_v5 = vor.u32 %v5575_v19, %v4705_v21  ;;  %v4776_v1 = vor.u32 %v5594_v60, %v4775_v59  ;;  %v4937_v59 = vld [vmem:[#allocation12 + $0x1f8] sm:$0xf0] }
 0x6c3   :  { %2345 = vmatpush.bf16.msrb.mxu0 %v4688_v14  ;;  %v4799_v14 = vld [vmem:[#allocation12 + $0xe0] sm:$0xf] }
 0x6c4   :  { %2028 = vmatpush.msra.mxu1 %v1971_v33  ;;  %2371 = vmatpush.bf16.msrb.mxu2 %v4708_v5  ;;  %v4800_v15 = vor.u32 %v5600_v9, %v4799_v14  ;;  %v5613_v5 = vld [vmem:[#allocation12 + $0x154] sm:$0xf] }
 0x6c5   :  { %4683 = vmatmul.msk.f32.vlgmr.msra.gmra.mxu1 %vm1547_vm2, %v1982_v22  ;;  %v4863_v22 = vld [vmem:[#allocation12 + $0x160] sm:$0xf] }
 0x6c6   :  { %2352 = vmatpush.bf16.msrb.mxu1 %v4808_v37 }
 0x6c7   :  { %2589 = vmatpush.bf16.msra.mxu0 %v4872_v17  ;;  %v4801_v17 = vld [vmem:[#allocation12 + $0xe8] sm:$0xf0] }
 0x6ca   :  { %2353 = vmatpush.bf16.msrb.mxu1 %v4800_v15 }
 0x6cd   :  { %4684 = vmatmul.msk.f32.gmra.mxu1 %vm1547_vm2, %v1983_v2 }
 0x6e3   :  { %v1571_v56 = vpop.f32.mrf.mxu0 }
 0x6eb   :  { %v1574_v23 = vpop.f32.mrf.mxu0 }
 0x6f3   :  { %v1623_v10 = vpop.f32.mrf.mxu0 }
 0x6f4   :  { %v1624_v12 = vadd.f32 %v1623_v10, %v1571_v56  ;;  %v4864_v56 = vor.u32 %v5616_v26, %v4863_v22  ;;  %v5573_v10 = vld [vmem:[#allocation12 + $0x14] sm:$0xf]  ;;  %v4804_v22 = vor.u32 %v5599_v16, %v4801_v17  ;;  %v4769_v17 = vld [vmem:[#allocation12 + $0xa8] sm:$0xf0] }
 0x6f6   :  { %2590 = vmatpush.bf16.msra.mxu0 %v4864_v56  ;;  %v4791_v56 = vld [vmem:[#allocation12 + $0xd0] sm:$0xf]  ;;  %2381 = vmatpush.bf16.msrb.mxu3 %v4804_v22 }
 0x6fb   :  { %v1626_v28 = vpop.f32.mrf.mxu0 }
 0x6fc   :  { %v1627_v3 = vadd.f32 %v1626_v28, %v1574_v23  ;;  %v4697_v28 = vld [vmem:[#allocation12 + $0x18] sm:$0xf0] }
 0x6fd   :  { %v4700_v32 = vor.u32 %v5573_v10, %v4697_v28  ;;  %v5598_v10 = vld [vmem:[#allocation12 + $0xd4] sm:$0xf0] }
 0x6ff   :  { %2372 = vmatpush.bf16.msrb.mxu2 %v4700_v32  ;;  %v4792_v32 = vor.u32 %v5598_v10, %v4791_v56  ;;  %v4759_v56 = vld [vmem:[#allocation12 + $0x90] sm:$0xf]  ;;  %v5590_v10 = vld [vmem:[#allocation12 + $0x94] sm:$0xf0] }
 0x701   :  { %2354 = vmatpush.bf16.msrb.mxu1 %v4792_v32 }
 0x702   :  { %v6491_v27 = vpop.f32.mrf.mxu1 }
 0x703   :  { %v1813_v35 = vpop.f32.mrf.mxu0  ;;  %2373 = vmatpush.bf16.msrb.mxu2 %v4692_v45  ;;  %v5596_v45 = vld [vmem:[#allocation12 + $0xc4] sm:$0xf0] }
 0x704   :  { %v1842_v18 = vadd.f32 %v1813_v35, %v1624_v12  ;;  %v4856_v35 = vor.u32 %v5614_v34, %v4855_v25 }
 0x706   :  { %2591 = vmatpush.bf16.msra.mxu0 %v4856_v35  ;;  %v4823_v35 = vld [vmem:[#allocation12 + $0x110] sm:$0xf] }
 0x707   :  { %2617 = vmatpush.bf16.msra.mxu2 %v4876_v52 }
 0x70a   :  { %v6493_v11 = vpop.f32.mrf.mxu1 }
 0x70b   :  { %v1816_v48 = vpop.f32.mrf.mxu0  ;;  %2618 = vmatpush.bf16.msra.mxu2 %v4868_v7 }
 0x70c   :  { %v1844_v33 = vadd.f32 %v1816_v48, %v1627_v3  ;;  %v4848_v48 = vor.u32 %v5612_v46, %v4847_v42  ;;  %v4849_v42 = vld [vmem:[#allocation12 + $0x148] sm:$0xf0]  ;;  %v5595_v46 = vld [vmem:[#allocation12 + $0xc4] sm:$0xf] }
 0x70e   :  { %2592 = vmatpush.bf16.msra.mxu0 %v4848_v48 }
 0x712   :  { %v6495_v53 = vpop.f32.mrf.mxu1  ;;  %2593 = vmatpush.bf16.msra.mxu0 %v4840_v13  ;;  %v4833_v13 = vld [vmem:[#allocation12 + $0x128] sm:$0xf0] }
 0x71a   :  { %v6497_v24 = vpop.f32.mrf.mxu1 }
 0x722   :  { %v6509_v39 = vpop.f32.mrf.mxu1 }
 0x723   :  { %v2007_v61 = vpop.f32.mrf.mxu0 }
 0x724   :  { %v6499_v2 = vadd.f32 %v2007_v61, %v1842_v18  ;;  %v4831_v18 = vld [vmem:[#allocation12 + $0x120] sm:$0xf] }
 0x726   :  { %v2056_v20 = vmul.f32 %v6499_v2, %v6499_v2 }
 0x72a   :  { %v6511_v3 = vpop.f32.mrf.mxu1 }
 0x72b   :  { %v2010_v40 = vpop.f32.mrf.mxu0 }
 0x72c   :  { %v6501_v23 = vadd.f32 %v2010_v40, %v1844_v33  ;;  %v5608_v33 = vld [vmem:[#allocation12 + $0x124] sm:$0xf0]  ;;  %v4857_v40 = vld [vmem:[#allocation12 + $0x158] sm:$0xf0] }
 0x72d   :  { %v4832_v26 = vor.u32 %v5608_v33, %v4831_v18  ;;  %v5605_v18 = vld [vmem:[#allocation12 + $0x114] sm:$0xf] }
 0x72e   :  { %v2040_v29 = vadd.f32 %v6501_v23, %v6499_v2  ;;  %v2058_v31 = vmul.f32 %v6501_v23, %v6501_v23 }
 0x72f   :  { %2594 = vmatpush.bf16.msra.mxu0 %v4832_v26 }
 0x730   :  { %v2041_v4 = vrot.slane %v2040_v29, 4  ;;  %v2060_v36 = vadd.f32 %v2058_v31, %v2056_v20  ;;  %v5597_v20 = vld [vmem:[#allocation12 + $0xd4] sm:$0xf]  ;;  %v4860_v31 = vor.u32 %v5613_v5, %v4857_v40 }
 0x732   :  { %v2042_v43 = vadd.f32 %v2041_v4, %v2040_v29  ;;  %v2061_v44 = vrot.slane %v2060_v36, 4  ;;  %v4793_v29 = vld [vmem:[#allocation12 + $0xd8] sm:$0xf0]  ;;  %v5606_v4 = vld [vmem:[#allocation12 + $0x114] sm:$0xf0]  ;;  %2619 = vmatpush.bf16.msra.mxu2 %v4860_v31 }
 0x733   :  { %v4796_v34 = vor.u32 %v5597_v20, %v4793_v29  ;;  %v4824_v6 = vor.u32 %v5606_v4, %v4823_v35  ;;  %v4761_v20 = vld [vmem:[#allocation12 + $0x98] sm:$0xf0]  ;;  %v5603_v29 = vld [vmem:[#allocation12 + $0x104] sm:$0xf]  ;;  %v4817_v4 = vld [vmem:[#allocation12 + $0x108] sm:$0xf0] }
 0x734   :  { %v2043_v50 = vrot.slane %v2042_v43, 2  ;;  %v2062_v51 = vadd.f32 %v2061_v44, %v2060_v36  ;;  %v5611_v36 = vld [vmem:[#allocation12 + $0x144] sm:$0xf]  ;;  %v4783_v44 = vld [vmem:[#allocation12 + $0xc0] sm:$0xf] }
 0x735   :  { %2382 = vmatpush.bf16.msrb.mxu3 %v4796_v34  ;;  %v4784_v49 = vor.u32 %v5596_v45, %v4783_v44  ;;  %2595 = vmatpush.bf16.msra.mxu0 %v4824_v6  ;;  %v4751_v44 = vld [vmem:[#allocation12 + $0x80] sm:$0xf]  ;;  %v5588_v45 = vld [vmem:[#allocation12 + $0x84] sm:$0xf0] }
 0x736   :  { %v2044_v57 = vadd.f32 %v2043_v50, %v2042_v43  ;;  %v2063_v58 = vrot.slane %v2062_v51, 2  ;;  %v4852_v43 = vor.u32 %v5611_v36, %v4849_v42  ;;  %v4785_v50 = vld [vmem:[#allocation12 + $0xc8] sm:$0xf0]  ;;  %v6540_v36 = vld [vmem:[%s6738_s11] sm:$0x3] }
 0x737   :  { %v4788_v52 = vor.u32 %v5595_v46, %v4785_v50  ;;  %2355 = vmatpush.bf16.msrb.mxu1 %v4784_v49  ;;  %v4752_v46 = vor.u32 %v5588_v45, %v4751_v44  ;;  %v4935_v49 = vld [vmem:[#allocation12 + $0x1f0] sm:$0xf]  ;;  %v4913_v45 = vld [vmem:[#allocation12 + $0x1c8] sm:$0xf0] }
 0x738   :  { %v2045_v61 = vrot.slane %v2044_v57, 1  ;;  %v2064_v12 = vadd.f32 %v2063_v58, %v2062_v51  ;;  %v4815_v51 = vld [vmem:[#allocation12 + $0x100] sm:$0xf]  ;;  %2620 = vmatpush.bf16.msra.mxu2 %v4852_v43  ;;  %v4820_v43 = vor.u32 %v5603_v29, %v4817_v4  ;;  %v5650_v29 = vld [vmem:[#allocation12 + $0x274] sm:$0xf0] }
 0x739   :  { %v4816_v37 = vor.u32 %v5604_v54, %v4815_v51  ;;  %2383 = vmatpush.bf16.msrb.mxu3 %v4788_v52  ;;  %v5628_v4 = vld [vmem:[#allocation12 + $0x1c4] sm:$0xf0] }
 0x73a   :  { %v2046_v63 = vadd.f32 %v2045_v61, %v2044_v57  ;;  %v2065_v30 = vrot.slane %v2064_v12, 1  ;;  %v1647_v57 = vadd.f32 %v6495_v53, %v6491_v27  ;;  %v4777_v61 = vld [vmem:[#allocation12 + $0xb8] sm:$0xf0]  ;;  %v1650_v27 = vadd.f32 %v6497_v24, %v6493_v11 }
 0x73b   :  { %2596 = vmatpush.bf16.msra.mxu0 %v4816_v37  ;;  %v4780_v53 = vor.u32 %v5593_v62, %v4777_v61  ;;  %2356 = vmatpush.bf16.msrb.mxu1 %v4776_v1  ;;  %v6547_v37 = vld [vmem:[%s6739_s12] sm:$0x3]  ;;  %v4940_v1 = vor.u32 %v5633_v8, %v4937_v59 }
 0x73c   :  { %v6513_v19 = vmul.f32 0.0625, %v2046_v63  ;;  %v2066_v21 = vadd.f32 %v2065_v30, %v2064_v12  ;;  %v1843_v0 = vadd.f32 %v6509_v39, %v1647_v57  ;;  %v5607_v12 = vld [vmem:[#allocation12 + $0x124] sm:$0xf]  ;;  %v1845_v14 = vadd.f32 %v6511_v3, %v1650_v27  ;;  %2621 = vmatpush.bf16.msra.mxu2 %v4844_v38  ;;  %v4767_v63 = vld [vmem:[#allocation12 + $0xa0] sm:$0xf] }
 0x73d   :  { %v4836_v9 = vor.u32 %v5607_v12, %v4833_v13  ;;  %v5592_v30 = vld [vmem:[#allocation12 + $0xa4] sm:$0xf0]  ;;  %v5591_v39 = vld [vmem:[#allocation12 + $0xa4] sm:$0xf]  ;;  %2384 = vmatpush.bf16.msrb.mxu3 %v4780_v53  ;;  %v2114_v57 = vperm.slane %v6540_v36, 0  ;;  %v4936_v38 = vor.u32 %v5634_v55, %v4935_v49 }
 0x73e   :  { %v2074_v28 = vmul.f32 0.0625, %v2066_v21  ;;  %v2076_v25 = vmul.f32 %v6513_v19, %v6513_v19  ;;  %v4768_v16 = vor.u32 %v5592_v30, %v4767_v63  ;;  %v4825_v21 = vld [vmem:[#allocation12 + $0x118] sm:$0xf0]  ;;  %v4772_v11 = vor.u32 %v5591_v39, %v4769_v17  ;;  %v4927_v12 = vld [vmem:[#allocation12 + $0x1e0] sm:$0xf] }
 0x73f   :  { %v4828_v3 = vor.u32 %v5605_v18, %v4825_v21  ;;  %v2084_v61 = vsub.f32 %v6501_v23, %v6513_v19  ;;  %v5632_v13 = vld [vmem:[#allocation12 + $0x1e4] sm:$0xf0]  ;;  %v5631_v27 = vld [vmem:[#allocation12 + $0x1e4] sm:$0xf]  ;;  %v4929_v30 = vld [vmem:[#allocation12 + $0x1e8] sm:$0xf0] }
 0x740   :  { %v2078_v41 = vsub.f32 %v2074_v28, %v2076_v25  ;;  %2622 = vmatpush.bf16.msra.mxu2 %v4836_v9  ;;  %2357 = vmatpush.bf16.msrb.mxu1 %v4768_v16  ;;  %v5589_v28 = vld [vmem:[#allocation12 + $0x94] sm:$0xf]  ;;  %v4760_v25 = vor.u32 %v5590_v10, %v4759_v56  ;;  %v4928_v16 = vor.u32 %v5632_v13, %v4927_v12  ;;  %v5648_v49 = vld [vmem:[#allocation12 + $0x264] sm:$0xf0]  ;;  %v4887_v13 = vld [vmem:[#allocation12 + $0x190] sm:$0xf] }
 0x741   :  { %2385 = vmatpush.bf16.msrb.mxu3 %v4772_v11  ;;  %v4764_v35 = vor.u32 %v5589_v28, %v4761_v20  ;;  %v4932_v17 = vor.u32 %v5631_v27, %v4929_v30  ;;  %v5630_v11 = vld [vmem:[#allocation12 + $0x1d4] sm:$0xf0]  ;;  %v5007_v20 = vld [vmem:[#allocation12 + $0x270] sm:$0xf]  ;;  %v5621_v30 = vld [vmem:[#allocation12 + $0x194] sm:$0xf] }
 0x742   :  { %v2080_v47 = vmax.f32 %v2078_v41, 0.0  ;;  %v2030_v48 = vpop.f32.mrf.mxu1  ;;  %v5622_v27 = vld [vmem:[#allocation12 + $0x194] sm:$0xf0] }
 0x743   :  { %v6525_v7 = vadd.f32 %v2030_v48, %v1843_v0  ;;  %v4753_v48 = vld [vmem:[#allocation12 + $0x88] sm:$0xf0] }
 0x744   :  { %v6519_v58 = vadd.f32 1e-05, %v2080_v47  ;;  %2623 = vmatpush.bf16.msra.mxu2 %v4828_v3  ;;  %2358 = vmatpush.bf16.msrb.mxu1 %v4760_v25  ;;  %v5587_v47 = vld [vmem:[#allocation12 + $0x84] sm:$0xf] }
 0x745   :  { %v2057_v33 = vmul.f32 %v6525_v7, %v6525_v7  ;;  %2386 = vmatpush.bf16.msrb.mxu3 %v4764_v35  ;;  %v4756_v54 = vor.u32 %v5587_v47, %v4753_v48  ;;  %v4911_v35 = vld [vmem:[#allocation12 + $0x1c0] sm:$0xf] }
 0x746   :  { %5785 = vrsqrt.f32 %v6519_v58  ;;  %vm2094_vm4 = vweird.f32 %v6519_v58  ;;  %v4912_v44 = vor.u32 %v5628_v4, %v4911_v35  ;;  %v4999_v48 = vld [vmem:[#allocation12 + $0x260] sm:$0xf]  ;;  %v2115_v35 = vperm.slane %v6540_v36, 1  ;;  %v4959_v4 = vld [vmem:[#allocation12 + $0x210] sm:$0xf] }
 0x747   :  { %v5000_v59 = vor.u32 %v5648_v49, %v4999_v48  ;;  %v4951_v49 = vld [vmem:[#allocation12 + $0x200] sm:$0xf] }
 0x748   :  { %2624 = vmatpush.bf16.msra.mxu2 %v4820_v43  ;;  %2359 = vmatpush.bf16.msrb.mxu1 %v4752_v46  ;;  %v5008_v43 = vor.u32 %v5650_v29, %v5007_v20 }
 0x749   :  { %2387 = vmatpush.bf16.msrb.mxu3 %v4756_v54  ;;  %v5625_v54 = vld [vmem:[#allocation12 + $0x1b4] sm:$0xf] }
 0x74a   :  { %v2033_v15 = vpop.f32.mrf.mxu1 }
 0x74b   :  { %v6528_v22 = vadd.f32 %v2033_v15, %v1845_v14  ;;  %v2124_v14 = vperm.slane %v6547_v37, 0 }
 0x74c   :  { %v5786_v24 = vpop.eup %5785  ;;  %2603 = vmatpush.bf16.msra.mxu1 %v4936_v38  ;;  %v4895_v38 = vld [vmem:[#allocation12 + $0x1a0] sm:$0xf] }
 0x74d   :  { %v2089_v5 = vmul.f32 %v5786_v24, %v6519_v58  ;;  %v2047_v26 = vadd.f32 %v6528_v22, %v6525_v7  ;;  %v2059_v40 = vmul.f32 %v6528_v22, %v6528_v22  ;;  %vm2095_vm3 = vweird.f32 %v5786_v24  ;;  %2631 = vmatpush.bf16.msra.mxu3 %v4940_v1  ;;  %v5646_v1 = vld [vmem:[#allocation12 + $0x254] sm:$0xf0] }
 0x74e   :  { %vm2096_vm5 = vmor %vm2094_vm4, %vm2095_vm3  ;;  %v2082_v58 = vsub.f32 %v6499_v2, %v6513_v19  ;;  %v4919_v19 = vld [vmem:[#allocation12 + $0x1d0] sm:$0xf] }
 0x74f   :  { %v2090_v31 = vmul.f32 %v5786_v24, %v2089_v5  ;;  %v2048_v32 = vrot.slane %v2047_v26, 4  ;;  %v2067_v34 = vadd.f32 %v2059_v40, %v2057_v33  ;;  %v5629_v33 = vld [vmem:[#allocation12 + $0x1d4] sm:$0xf]  ;;  %v4920_v5 = vor.u32 %v5630_v11, %v4919_v19  ;;  %v5642_v11 = vld [vmem:[#allocation12 + $0x234] sm:$0xf0] }
 0x750   :  { %2604 = vmatpush.bf16.msra.mxu1 %v4928_v16 }
 0x751   :  { %v2091_v41 = vmul.f32 0.5, %v2090_v31  ;;  %v2049_v6 = vadd.f32 %v2048_v32, %v2047_v26  ;;  %v2068_v42 = vrot.slane %v2067_v34, 4  ;;  %2632 = vmatpush.bf16.msra.mxu3 %v4932_v17  ;;  %v4921_v26 = vld [vmem:[#allocation12 + $0x1d8] sm:$0xf0]  ;;  %v4879_v17 = vld [vmem:[#allocation12 + $0x180] sm:$0xf] }
 0x752   :  { %v4924_v10 = vor.u32 %v5629_v33, %v4921_v26  ;;  %v5619_v33 = vld [vmem:[#allocation12 + $0x184] sm:$0xf] }
 0x753   :  { %v2092_v50 = vsub.f32 1.5, %v2091_v41  ;;  %v2050_v51 = vrot.slane %v2049_v6, 2  ;;  %v2069_v52 = vadd.f32 %v2068_v42, %v2067_v34  ;;  %v5627_v41 = vld [vmem:[#allocation12 + $0x1c4] sm:$0xf] }
 0x754   :  { %2605 = vmatpush.bf16.msra.mxu1 %v4920_v5 }
 0x755   :  { %v2093_v60 = vmul.f32 %v5786_v24, %v2092_v50  ;;  %v2051_v62 = vadd.f32 %v2050_v51, %v2049_v6  ;;  %v2070_v0 = vrot.slane %v2069_v52, 2  ;;  %2633 = vmatpush.bf16.msra.mxu3 %v4924_v10  ;;  %v4916_v50 = vor.u32 %v5627_v41, %v4913_v45  ;;  %v4903_v51 = vld [vmem:[#allocation12 + $0x1b0] sm:$0xf]  ;;  %v5638_v41 = vld [vmem:[#allocation12 + $0x214] sm:$0xf0] }
 0x756   :  { %v4960_v45 = vor.u32 %v5638_v41, %v4959_v4  ;;  %v5666_v4 = vld [vmem:[#allocation12 + $0x2f4] sm:$0xf0] }
 0x757   :  { %v2097_v53 = vsel %vm2096_vm5, %v5786_v24, %v2093_v60  ;;  %v2052_v9 = vrot.slane %v2051_v62, 1  ;;  %v2071_v63 = vadd.f32 %v2070_v0, %v2069_v52  ;;  %v5626_v52 = vld [vmem:[#allocation12 + $0x1b4] sm:$0xf0]  ;;  %v4991_v60 = vld [vmem:[#allocation12 + $0x250] sm:$0xf] }
 0x758   :  { %v2108_v39 = vmul.f32 %v2097_v53, %v2082_v58  ;;  %v2110_v15 = vmul.f32 %v2097_v53, %v2084_v61  ;;  %2606 = vmatpush.bf16.msra.mxu1 %v4912_v44  ;;  %v4904_v8 = vor.u32 %v5626_v52, %v4903_v51  ;;  %v5624_v0 = vld [vmem:[#allocation12 + $0x1a4] sm:$0xf0]  ;;  %v5623_v58 = vld [vmem:[#allocation12 + $0x1a4] sm:$0xf]  ;;  %v4897_v61 = vld [vmem:[#allocation12 + $0x1a8] sm:$0xf0]  ;;  %v4992_v53 = vor.u32 %v5646_v1, %v4991_v60 }
 0x759   :  { %v2053_v2 = vadd.f32 %v2052_v9, %v2051_v62  ;;  %v2072_v18 = vrot.slane %v2071_v63, 1  ;;  %2634 = vmatpush.bf16.msra.mxu3 %v4916_v50  ;;  %v4896_v12 = vor.u32 %v5624_v0, %v4895_v38  ;;  %v4900_v9 = vor.u32 %v5623_v58, %v4897_v61  ;;  %v5636_v50 = vld [vmem:[#allocation12 + $0x204] sm:$0xf0]  ;;  %v5649_v60 = vld [vmem:[#allocation12 + $0x274] sm:$0xf] }
 0x75a   :  { %v2118_v21 = vmul.f32 %v2114_v57, %v2108_v39  ;;  %v2120_v23 = vmul.f32 %v2114_v57, %v2110_v15  ;;  %v4905_v57 = vld [vmem:[#allocation12 + $0x1b8] sm:$0xf0]  ;;  %v4888_v15 = vor.u32 %v5622_v27, %v4887_v13  ;;  %v2125_v44 = vperm.slane %v6547_v37, 1  ;;  %v5647_v13 = vld [vmem:[#allocation12 + $0x264] sm:$0xf] }
 0x75b   :  { %v6555_v3 = vmul.f32 0.0625, %v2053_v2  ;;  %v2073_v24 = vadd.f32 %v2072_v18, %v2071_v63  ;;  %v4908_v62 = vor.u32 %v5625_v54, %v4905_v57  ;;  %v5644_v63 = vld [vmem:[#allocation12 + $0x244] sm:$0xf0]  ;;  %v4889_v39 = vld [vmem:[#allocation12 + $0x198] sm:$0xf0] }
 0x75c   :  { %v2128_v40 = vadd.f32 %v2124_v14, %v2118_v21  ;;  %v2130_v56 = vadd.f32 %v2124_v14, %v2120_v23  ;;  %2607 = vmatpush.bf16.msra.mxu1 %v4904_v8  ;;  %v4983_v14 = vld [vmem:[#allocation12 + $0x240] sm:$0xf]  ;;  %v5620_v2 = vld [vmem:[#allocation12 + $0x184] sm:$0xf0]  ;;  %v4975_v23 = vld [vmem:[#allocation12 + $0x230] sm:$0xf]  ;;  %v4892_v19 = vor.u32 %v5621_v30, %v4889_v39 }
 0x75d   :  { %v2075_v28 = vmul.f32 0.0625, %v2073_v24  ;;  %v2077_v25 = vmul.f32 %v6555_v3, %v6555_v3  ;;  %2635 = vmatpush.bf16.msra.mxu3 %v4908_v62  ;;  %v4984_v21 = vor.u32 %v5644_v63, %v4983_v14  ;;  %v4881_v24 = vld [vmem:[#allocation12 + $0x188] sm:$0xf0]  ;;  %v4880_v26 = vor.u32 %v5620_v2, %v4879_v17  ;;  %v5009_v62 = vld [vmem:[#allocation12 + $0x278] sm:$0xf0] }
 0x75e   :  { %vm2132_vm6 = vcmp.gt.f32.partialorder %v2128_v40, 0.0  ;;  %vm2134_vm7 = vcmp.gt.f32.partialorder %v2130_v56, 0.0  ;;  %v2136_v31 = vmul.f32 0.2, %v2128_v40  ;;  %v2138_v32 = vmul.f32 0.2, %v2130_v56 }
 0x75f   :  { %v2079_v34 = vsub.f32 %v2075_v28, %v2077_v25  ;;  %v4884_v10 = vor.u32 %v5619_v33, %v4881_v24  ;;  %v4967_v28 = vld [vmem:[#allocation12 + $0x220] sm:$0xf]  ;;  %v5640_v25 = vld [vmem:[#allocation12 + $0x224] sm:$0xf0]  ;;  %v5012_v61 = vor.u32 %v5649_v60, %v5009_v62  ;;  %v5001_v27 = vld [vmem:[#allocation12 + $0x268] sm:$0xf0] }
 0x760   :  { %v2140_v6 = vsel %vm2132_vm6, %v2128_v40, %v2136_v31  ;;  %v2142_v42 = vsel %vm2134_vm7, %v2130_v56, %v2138_v32  ;;  %2608 = vmatpush.bf16.msra.mxu1 %v4896_v12  ;;  %v4976_v56 = vor.u32 %v5642_v11, %v4975_v23  ;;  %v4968_v31 = vor.u32 %v5640_v25, %v4967_v28  ;;  %v5645_v30 = vld [vmem:[#allocation12 + $0x254] sm:$0xf]  ;;  %v4993_v39 = vld [vmem:[#allocation12 + $0x258] sm:$0xf0]  ;;  %v5643_v17 = vld [vmem:[#allocation12 + $0x244] sm:$0xf] }
 0x761   :  { %v6559_v46 = vpack.c.bf16 %v2142_v42, %v2140_v6  ;;  %v2081_v47 = vmax.f32 %v2079_v34, 0.0  ;;  %2636 = vmatpush.bf16.msra.mxu3 %v4900_v9  ;;  %v2083_v32 = vsub.f32 %v6525_v7, %v6555_v3  ;;  %v2085_v34 = vsub.f32 %v6528_v22, %v6555_v3  ;;  %v4985_v2 = vld [vmem:[#allocation12 + $0x248] sm:$0xf0]  ;;  %v5641_v11 = vld [vmem:[#allocation12 + $0x234] sm:$0xf] }
 0x762   :  { %v4952_v22 = vor.u32 %v5636_v50, %v4951_v49  ;;  %v5004_v63 = vor.u32 %v5647_v13, %v5001_v27  ;;  %v4977_v33 = vld [vmem:[#allocation12 + $0x238] sm:$0xf0]  ;;  %v5639_v25 = vld [vmem:[#allocation12 + $0x224] sm:$0xf]  ;;  %v5055_v62 = vld [vmem:[#allocation12 + $0x2d0] sm:$0xf] }
 0x763   :  { %v6561_v55 = vadd.f32 1e-05, %v2081_v47  ;;  %2346 = vmatmul.bf16.vlgmr.msrb.gmra.mxu0 %v6559_v46  ;;  %2374 = vmatmul.bf16.vlgmr.msrb.gmra.mxu2 %v6559_v46  ;;  %v4961_v49 = vld [vmem:[#allocation12 + $0x218] sm:$0xf0]  ;;  %v5131_v27 = vld [vmem:[#allocation12 + $0x360] sm:$0xf] }
 0x764   :  { %2946 = vmatpush.bf16.msrb.mxu0 %v5008_v43  ;;  %2609 = vmatpush.bf16.msra.mxu1 %v4888_v15 }
 0x765   :  { %5787 = vrsqrt.f32 %v6561_v55  ;;  %2637 = vmatpush.bf16.msra.mxu3 %v4892_v19  ;;  %vm2104_vm9 = vweird.f32 %v6561_v55  ;;  %v4988_v19 = vor.u32 %v5643_v17, %v4985_v2  ;;  %v5123_v2 = vld [vmem:[#allocation12 + $0x350] sm:$0xf] }
 0x768   :  { %2947 = vmatpush.bf16.msrb.mxu0 %v5000_v59  ;;  %2610 = vmatpush.bf16.msra.mxu1 %v4880_v26 }
 0x769   :  { %2638 = vmatpush.bf16.msra.mxu3 %v4884_v10  ;;  %v5073_v10 = vld [vmem:[#allocation12 + $0x2f8] sm:$0xf0] }
 0x76b   :  { %v5788_v16 = vpop.eup %5787 }
 0x76c   :  { %v2099_v18 = vmul.f32 %v5788_v16, %v6561_v55  ;;  %2948 = vmatpush.bf16.msrb.mxu0 %v4992_v53  ;;  %vm2105_vm8 = vweird.f32 %v5788_v16  ;;  %v6583_v53 = vld [vmem:[#allocation10] sm:$0xff] }
 0x76d   :  { %vm2106_vm10 = vmor %vm2104_vm9, %vm2105_vm8 }
 0x76e   :  { %v2100_v5 = vmul.f32 %v5788_v16, %v2099_v18 }
 0x770   :  { %v2101_v40 = vmul.f32 0.5, %v2100_v5  ;;  %2949 = vmatpush.bf16.msrb.mxu0 %v4984_v21  ;;  %v6587_v21 = vld [vmem:[#allocation10 + $0x8] sm:$0xff] }
 0x772   :  { %v2102_v20 = vsub.f32 1.5, %v2101_v40  ;;  %v4980_v40 = vor.u32 %v5641_v11, %v4977_v33  ;;  %v5655_v11 = vld [vmem:[#allocation12 + $0x2a4] sm:$0xf]  ;;  %v5033_v33 = vld [vmem:[#allocation12 + $0x2a8] sm:$0xf0] }
 0x773   :  { %2597 = vmatmul.bf16.vlgmr.msra.gmra.mxu0 %v6559_v46  ;;  %2625 = vmatmul.bf16.vlgmr.msra.gmra.mxu2 %v6559_v46 }
 0x774   :  { %v2103_v29 = vmul.f32 %v5788_v16, %v2102_v20  ;;  %2950 = vmatpush.bf16.msrb.mxu0 %v4976_v56  ;;  %v5665_v56 = vld [vmem:[#allocation12 + $0x2f4] sm:$0xf]  ;;  %v4969_v20 = vld [vmem:[#allocation12 + $0x228] sm:$0xf0] }
 0x776   :  { %v2107_v6 = vsel %vm2106_vm10, %v5788_v16, %v2103_v29  ;;  %v4996_v16 = vor.u32 %v5645_v30, %v4993_v39  ;;  %v5660_v30 = vld [vmem:[#allocation12 + $0x2c4] sm:$0xf0]  ;;  %v5657_v39 = vld [vmem:[#allocation12 + $0x2b4] sm:$0xf] }
 0x777   :  { %v2109_v42 = vmul.f32 %v2107_v6, %v2083_v32  ;;  %v2111_v43 = vmul.f32 %v2107_v6, %v2085_v34  ;;  %v2646_v32 = vld [vmem:[#allocation10 + $0x10] sm:$0xff]  ;;  %v5076_v34 = vor.u32 %v5665_v56, %v5073_v10  ;;  %v5036_v56 = vor.u32 %v5655_v11, %v5033_v33  ;;  %v5031_v10 = vld [vmem:[#allocation12 + $0x2a0] sm:$0xf] }
 0x778   :  { %2951 = vmatpush.bf16.msrb.mxu0 %v4968_v31  ;;  %v6591_v31 = vld [vmem:[#allocation10 + $0x18] sm:$0xff] }
 0x779   :  { %v2119_v47 = vmul.f32 %v2115_v35, %v2109_v42  ;;  %v2121_v48 = vmul.f32 %v2115_v35, %v2111_v43  ;;  %v5071_v35 = vld [vmem:[#allocation12 + $0x2f0] sm:$0xf]  ;;  %v4972_v43 = vor.u32 %v5639_v25, %v4969_v20  ;;  %v5653_v25 = vld [vmem:[#allocation12 + $0x294] sm:$0xf]  ;;  %v5025_v20 = vld [vmem:[#allocation12 + $0x298] sm:$0xf0] }
 0x77a   :  { %v5072_v50 = vor.u32 %v5666_v4, %v5071_v35  ;;  %v5674_v35 = vld [vmem:[#allocation12 + $0x334] sm:$0xf0]  ;;  %v5023_v4 = vld [vmem:[#allocation12 + $0x290] sm:$0xf] }
 0x77b   :  { %v2129_v7 = vadd.f32 %v2125_v44, %v2119_v47  ;;  %v2131_v51 = vadd.f32 %v2125_v44, %v2121_v48  ;;  %v5663_v44 = vld [vmem:[#allocation12 + $0x2e4] sm:$0xf]  ;;  %v5637_v48 = vld [vmem:[#allocation12 + $0x214] sm:$0xf] }
 0x77c   :  { %2952 = vmatpush.bf16.msrb.mxu0 %v4960_v45  ;;  %v5065_v45 = vld [vmem:[#allocation12 + $0x2e8] sm:$0xf0] }
 0x77d   :  { %vm2133_vm11 = vcmp.gt.f32.partialorder %v2129_v7, 0.0  ;;  %vm2135_vm12 = vcmp.gt.f32.partialorder %v2131_v51, 0.0  ;;  %v2137_v36 = vmul.f32 0.2, %v2129_v7  ;;  %v2139_v3 = vmul.f32 0.2, %v2131_v51 }
 0x77f   :  { %v2141_v52 = vsel %vm2133_vm11, %v2129_v7, %v2137_v36  ;;  %v2143_v54 = vsel %vm2135_vm12, %v2131_v51, %v2139_v3  ;;  %v5068_v51 = vor.u32 %v5663_v44, %v5065_v45  ;;  %v5664_v36 = vld [vmem:[#allocation12 + $0x2e4] sm:$0xf0]  ;;  %v4964_v3 = vor.u32 %v5637_v48, %v4961_v49  ;;  %v5203_v44 = vld [vmem:[#allocation12 + $0x3f0] sm:$0xf]  ;;  %v5698_v45 = vld [vmem:[#allocation12 + $0x3f4] sm:$0xf0] }
 0x780   :  { %v6576_v55 = vpack.c.bf16 %v2143_v54, %v2141_v52  ;;  %2953 = vmatpush.bf16.msrb.mxu0 %v4952_v22  ;;  %v5063_v22 = vld [vmem:[#allocation12 + $0x2e0] sm:$0xf]  ;;  %v5661_v52 = vld [vmem:[#allocation12 + $0x2d4] sm:$0xf]  ;;  %v5057_v54 = vld [vmem:[#allocation12 + $0x2d8] sm:$0xf0] }
 0x781   :  { %v5060_v60 = vor.u32 %v5661_v52, %v5057_v54  ;;  %v5672_v48 = vld [vmem:[#allocation12 + $0x324] sm:$0xf0]  ;;  %v5091_v54 = vld [vmem:[#allocation12 + $0x310] sm:$0xf] }
 0x782   :  { %2360 = vmatmul.bf16.vlgmr.msrb.gmra.mxu1 %v6576_v55  ;;  %2388 = vmatmul.bf16.vlgmr.msrb.gmra.mxu3 %v6576_v55 }
 0x783   :  { %2954 = vmatmul.bf16.vlgmr.msrb.gmra.mxu0 %v6559_v46 }
 0x792   :  { %2611 = vmatmul.bf16.vlgmr.msra.gmra.mxu1 %v6576_v55  ;;  %2639 = vmatmul.bf16.vlgmr.msra.gmra.mxu3 %v6576_v55 }
 0x7e0   :  { %v2347_v37 = vpop.f32.mrf.mxu0 }
 0x7e6   :  { %v2375_v8 = vpop.f32.mrf.mxu2 }
 0x7e8   :  { %v2349_v38 = vpop.f32.mrf.mxu0 }
 0x7ee   :  { %v2377_v58 = vpop.f32.mrf.mxu2 }
 0x7f0   :  { %v2598_v14 = vpop.f32.mrf.mxu0 }
 0x7f6   :  { %v2626_v18 = vpop.f32.mrf.mxu2 }
 0x7f8   :  { %v2600_v24 = vpop.f32.mrf.mxu0 }
 0x7fe   :  { %v2628_v41 = vpop.f32.mrf.mxu2 }
 0x7ff   :  { %v2361_v57 = vpop.f32.mrf.mxu1 }
 0x800   :  { %v2362_v12 = vadd.f32 %v2361_v57, %v2347_v37  ;;  %v5635_v37 = vld [vmem:[#allocation12 + $0x204] sm:$0xf]  ;;  %v5064_v57 = vor.u32 %v5664_v36, %v5063_v22  ;;  %v5195_v36 = vld [vmem:[#allocation12 + $0x3e0] sm:$0xf] }
 0x805   :  { %v2389_v59 = vpop.f32.mrf.mxu3 }
 0x806   :  { %v2390_v6 = vadd.f32 %v2389_v59, %v2375_v8  ;;  %v4953_v8 = vld [vmem:[#allocation12 + $0x208] sm:$0xf0]  ;;  %v5682_v59 = vld [vmem:[#allocation12 + $0x374] sm:$0xf0] }
 0x807   :  { %v2363_v0 = vpop.f32.mrf.mxu1 }
 0x808   :  { %v2364_v1 = vadd.f32 %v2363_v0, %v2349_v38  ;;  %v5139_v38 = vld [vmem:[#allocation12 + $0x370] sm:$0xf]  ;;  %v5662_v0 = vld [vmem:[#allocation12 + $0x2d4] sm:$0xf0] }
 0x809   :  { %v5056_v13 = vor.u32 %v5662_v0, %v5055_v62  ;;  %v5668_v62 = vld [vmem:[#allocation12 + $0x304] sm:$0xf0] }
 0x80a   :  { %2721 = vmatpush.msrb.mxu2 %v2364_v1  ;;  %v4956_v1 = vor.u32 %v5635_v37, %v4953_v8  ;;  %v5670_v37 = vld [vmem:[#allocation12 + $0x314] sm:$0xf0] }
 0x80c   :  { %2722 = vmatpush.msrb.mxu2 %v2362_v12  ;;  %v5140_v12 = vor.u32 %v5682_v59, %v5139_v38  ;;  %v5187_v38 = vld [vmem:[#allocation12 + $0x3d0] sm:$0xf]  ;;  %v5694_v59 = vld [vmem:[#allocation12 + $0x3d4] sm:$0xf0] }
 0x80d   :  { %v2391_v9 = vpop.f32.mrf.mxu3  ;;  %4945 = vmatmul.msk.f32.vlgmr.msrb.gmra.mxu2 %vm2648_vm13, %v6583_v53  ;;  %v5188_v0 = vor.u32 %v5694_v59, %v5187_v38  ;;  %v5693_v38 = vld [vmem:[#allocation12 + $0x3d4] sm:$0xf]  ;;  %v5189_v59 = vld [vmem:[#allocation12 + $0x3d8] sm:$0xf0] }
 0x80e   :  { %2974 = vmatpush.bf16.msra.mxu2 %v5012_v61  ;;  %v2392_v29 = vadd.f32 %v2391_v9, %v2377_v58  ;;  %v5659_v58 = vld [vmem:[#allocation12 + $0x2c4] sm:$0xf]  ;;  %v5049_v61 = vld [vmem:[#allocation12 + $0x2c8] sm:$0xf0] }
 0x80f   :  { %v2612_v15 = vpop.f32.mrf.mxu1  ;;  %v5052_v9 = vor.u32 %v5659_v58, %v5049_v61  ;;  %v5179_v58 = vld [vmem:[#allocation12 + $0x3c0] sm:$0xf]  ;;  %v5692_v61 = vld [vmem:[#allocation12 + $0x3c4] sm:$0xf0] }
 0x810   :  { %v2613_v28 = vadd.f32 %v2612_v15, %v2598_v14  ;;  %v5680_v14 = vld [vmem:[#allocation12 + $0x364] sm:$0xf0]  ;;  %v5041_v15 = vld [vmem:[#allocation12 + $0x2b8] sm:$0xf0] }
 0x812   :  { %2975 = vmatpush.bf16.msra.mxu2 %v5004_v63  ;;  %v5047_v63 = vld [vmem:[#allocation12 + $0x2c0] sm:$0xf] }
 0x813   :  { %v5048_v17 = vor.u32 %v5660_v30, %v5047_v63  ;;  %v5688_v63 = vld [vmem:[#allocation12 + $0x3a4] sm:$0xf0] }
 0x815   :  { %v2640_v23 = vpop.f32.mrf.mxu3  ;;  %4946 = vmatmul.msk.f32.gmra.mxu2 %vm2648_vm13, %v6587_v21 }
 0x816   :  { %2976 = vmatpush.bf16.msra.mxu2 %v4996_v16  ;;  %v2641_v7 = vadd.f32 %v2640_v23, %v2626_v18  ;;  %v5132_v16 = vor.u32 %v5680_v14, %v5131_v27  ;;  %v5678_v18 = vld [vmem:[#allocation12 + $0x354] sm:$0xf0]  ;;  %v5039_v23 = vld [vmem:[#allocation12 + $0x2b0] sm:$0xf] }
 0x817   :  { %v2614_v5 = vpop.f32.mrf.mxu1  ;;  %v5690_v27 = vld [vmem:[#allocation12 + $0x3b4] sm:$0xf0] }
 0x818   :  { %v2615_v26 = vadd.f32 %v2614_v5, %v2600_v24  ;;  %v5124_v24 = vor.u32 %v5678_v18, %v5123_v2  ;;  %v5684_v2 = vld [vmem:[#allocation12 + $0x384] sm:$0xf0] }
 0x81a   :  { %2977 = vmatpush.bf16.msra.mxu2 %v4988_v19  ;;  %2669 = vmatpush.msrb.mxu1 %v2615_v26  ;;  %v5658_v19 = vld [vmem:[#allocation12 + $0x2b4] sm:$0xf0] }
 0x81b   :  { %5763 = vmatpush.msrb.mxu3 %v2615_v26  ;;  %v5040_v5 = vor.u32 %v5658_v19, %v5039_v23  ;;  %v5115_v26 = vld [vmem:[#allocation12 + $0x340] sm:$0xf] }
 0x81c   :  { %2670 = vmatpush.msrb.mxu1 %v2613_v28 }
 0x81d   :  { %5764 = vmatpush.msrb.mxu3 %v2613_v28  ;;  %v2642_v42 = vpop.f32.mrf.mxu3  ;;  %4941 = vmatmul.msk.f32.vlgmr.msrb.gmra.mxu1 %vm2648_vm13, %v2646_v32  ;;  %v5656_v28 = vld [vmem:[#allocation12 + $0x2a4] sm:$0xf0] }
 0x81e   :  { %2978 = vmatpush.bf16.msra.mxu2 %v4980_v40  ;;  %v2643_v47 = vadd.f32 %v2642_v42, %v2628_v41  ;;  %4942 = vmatmul.msk.f32.vlgmr.msrb.gmra.mxu3 %vm2648_vm13, %v6591_v31  ;;  %v5676_v40 = vld [vmem:[#allocation12 + $0x344] sm:$0xf0]  ;;  %v5654_v41 = vld [vmem:[#allocation12 + $0x294] sm:$0xf0]  ;;  %v5017_v42 = vld [vmem:[#allocation12 + $0x288] sm:$0xf0] }
 0x81f   :  { %2744 = vmatpush.msra.mxu3 %v2392_v29  ;;  %v5116_v29 = vor.u32 %v5676_v40, %v5115_v26 }
 0x820   :  { %2692 = vmatpush.msra.mxu1 %v2643_v47  ;;  %v5099_v47 = vld [vmem:[#allocation12 + $0x320] sm:$0xf] }
 0x821   :  { %2745 = vmatpush.msra.mxu3 %v2390_v6  ;;  %v5651_v6 = vld [vmem:[#allocation12 + $0x284] sm:$0xf]  ;;  %v5100_v22 = vor.u32 %v5672_v48, %v5099_v47  ;;  %v5205_v47 = vld [vmem:[#allocation12 + $0x3f8] sm:$0xf0] }
 0x822   :  { %2979 = vmatpush.bf16.msra.mxu2 %v4972_v43  ;;  %2693 = vmatpush.msra.mxu1 %v2641_v7  ;;  %v5020_v49 = vor.u32 %v5651_v6, %v5017_v42  ;;  %v5652_v7 = vld [vmem:[#allocation12 + $0x284] sm:$0xf0] }
 0x823   :  { %2988 = vmatpush.bf16.msrb.mxu3 %v5076_v34  ;;  %v5107_v34 = vld [vmem:[#allocation12 + $0x330] sm:$0xf] }
 0x824   :  { %2960 = vmatpush.bf16.msrb.mxu1 %v5072_v50  ;;  %v5108_v43 = vor.u32 %v5674_v35, %v5107_v34  ;;  %v5015_v50 = vld [vmem:[#allocation12 + $0x280] sm:$0xf] }
 0x825   :  { %4943 = vmatmul.msk.f32.vlgmr.msra.gmra.mxu1 %vm2648_vm13, %v2646_v32  ;;  %v5032_v32 = vor.u32 %v5656_v28, %v5031_v10  ;;  %v5016_v52 = vor.u32 %v5652_v7, %v5015_v50  ;;  %v5133_v50 = vld [vmem:[#allocation12 + $0x368] sm:$0xf0] }
 0x826   :  { %2980 = vmatpush.bf16.msra.mxu2 %v4964_v3  ;;  %4947 = vmatmul.msk.f32.vlgmr.msra.gmra.mxu3 %vm2648_vm13, %v6583_v53  ;;  %v5044_v53 = vor.u32 %v5657_v39, %v5041_v15  ;;  %v5696_v3 = vld [vmem:[#allocation12 + $0x3e4] sm:$0xf0]  ;;  %v5155_v39 = vld [vmem:[#allocation12 + $0x390] sm:$0xf]  ;;  %v5686_v15 = vld [vmem:[#allocation12 + $0x394] sm:$0xf0] }
 0x827   :  { %2989 = vmatpush.bf16.msrb.mxu3 %v5068_v51  ;;  %v5204_v51 = vor.u32 %v5698_v45, %v5203_v44  ;;  %v5196_v8 = vor.u32 %v5696_v3, %v5195_v36  ;;  %v3003_v44 = vld [vmem:[#allocation10 + $0x20] sm:$0xff]  ;;  %v5197_v3 = vld [vmem:[#allocation12 + $0x3e8] sm:$0xf0] }
 0x828   :  { %2961 = vmatpush.bf16.msrb.mxu1 %v5064_v57  ;;  %v5092_v57 = vor.u32 %v5670_v37, %v5091_v54  ;;  %v5695_v36 = vld [vmem:[#allocation12 + $0x3e4] sm:$0xf]  ;;  %v5125_v54 = vld [vmem:[#allocation12 + $0x358] sm:$0xf0] }
 0x829   :  { %v5200_v37 = vor.u32 %v5695_v36, %v5197_v3  ;;  %v5706_v3 = vld [vmem:[#allocation13 + $0x38] sm:$0xff] }
 0x82a   :  { %2981 = vmatpush.bf16.msra.mxu2 %v4956_v1 }
 0x82b   :  { %2990 = vmatpush.bf16.msrb.mxu3 %v5060_v60  ;;  %v5083_v60 = vld [vmem:[#allocation12 + $0x300] sm:$0xf] }
 0x82c   :  { %2962 = vmatpush.bf16.msrb.mxu1 %v5056_v13  ;;  %v5084_v1 = vor.u32 %v5668_v62, %v5083_v60  ;;  %v5171_v13 = vld [vmem:[#allocation12 + $0x3b0] sm:$0xf]  ;;  %v5675_v60 = vld [vmem:[#allocation12 + $0x344] sm:$0xf]  ;;  %v5117_v62 = vld [vmem:[#allocation12 + $0x348] sm:$0xf0] }
 0x82d   :  { %2982 = vmatmul.bf16.vlgmr.msra.gmra.mxu2 %v6559_v46  ;;  %4944 = vmatmul.msk.f32.gmra.mxu1 %vm2648_vm13, %v6591_v31  ;;  %v5024_v31 = vor.u32 %v5654_v41, %v5023_v4  ;;  %v5172_v14 = vor.u32 %v5690_v27, %v5171_v13  ;;  %v5141_v4 = vld [vmem:[#allocation12 + $0x378] sm:$0xf0] }
 0x82e   :  { %3254 = vmatpush.bf16.msrb.mxu2 %v5140_v12  ;;  %4948 = vmatmul.msk.f32.gmra.mxu3 %vm2648_vm13, %v6587_v21  ;;  %v5028_v21 = vor.u32 %v5653_v25, %v5025_v20  ;;  %v5180_v12 = vor.u32 %v5692_v61, %v5179_v58  ;;  %v2955_v25 = vpop.f32.mrf.mxu0  ;;  %v5691_v58 = vld [vmem:[#allocation12 + $0x3c4] sm:$0xf]  ;;  %v5181_v61 = vld [vmem:[#allocation12 + $0x3c8] sm:$0xf0]  ;;  %v5109_v13 = vld [vmem:[#allocation12 + $0x338] sm:$0xf0] }
 0x82f   :  { %2991 = vmatpush.bf16.msrb.mxu3 %v5052_v9  ;;  %v5163_v9 = vld [vmem:[#allocation12 + $0x3a0] sm:$0xf]  ;;  %v5184_v27 = vor.u32 %v5691_v58, %v5181_v61  ;;  %v5716_v61 = vld [vmem:[#allocation13 + $0x88] sm:$0xff] }
 0x830   :  { %2963 = vmatpush.bf16.msrb.mxu1 %v5048_v17  ;;  %v5164_v30 = vor.u32 %v5688_v63, %v5163_v9  ;;  %v5147_v17 = vld [vmem:[#allocation12 + $0x380] sm:$0xf]  ;;  %v5689_v9 = vld [vmem:[#allocation12 + $0x3b4] sm:$0xf]  ;;  %v5173_v63 = vld [vmem:[#allocation12 + $0x3b8] sm:$0xf0] }
 0x831   :  { %v5148_v18 = vor.u32 %v5684_v2, %v5147_v17  ;;  %v5687_v2 = vld [vmem:[#allocation12 + $0x3a4] sm:$0xf] }
 0x832   :  { %3255 = vmatpush.bf16.msrb.mxu2 %v5132_v16  ;;  %v5156_v16 = vor.u32 %v5686_v15, %v5155_v39  ;;  %v5101_v39 = vld [vmem:[#allocation12 + $0x328] sm:$0xf0] }
 0x833   :  { %2992 = vmatpush.bf16.msrb.mxu3 %v5044_v53 }
 0x834   :  { %2964 = vmatpush.bf16.msrb.mxu1 %v5040_v5 }
 0x836   :  { %3256 = vmatpush.bf16.msrb.mxu2 %v5124_v24  ;;  %v2957_v34 = vpop.f32.mrf.mxu0 }
 0x837   :  { %2993 = vmatpush.bf16.msrb.mxu3 %v5036_v56 }
 0x838   :  { %2965 = vmatpush.bf16.msrb.mxu1 %v5032_v32 }
 0x83a   :  { %3257 = vmatpush.bf16.msrb.mxu2 %v5116_v29 }
 0x83b   :  { %2994 = vmatpush.bf16.msrb.mxu3 %v5028_v21  ;;  %v5681_v21 = vld [vmem:[#allocation12 + $0x374] sm:$0xf] }
 0x83c   :  { %2966 = vmatpush.bf16.msrb.mxu1 %v5024_v31  ;;  %v5144_v45 = vor.u32 %v5681_v21, %v5141_v4  ;;  %v5697_v31 = vld [vmem:[#allocation12 + $0x3f4] sm:$0xf] }
 0x83e   :  { %3258 = vmatpush.bf16.msrb.mxu2 %v5108_v43 }
 0x83f   :  { %2995 = vmatpush.bf16.msrb.mxu3 %v5020_v49  ;;  %v5679_v49 = vld [vmem:[#allocation12 + $0x364] sm:$0xf] }
 0x840   :  { %2967 = vmatpush.bf16.msrb.mxu1 %v5016_v52  ;;  %v5677_v52 = vld [vmem:[#allocation12 + $0x354] sm:$0xf] }
 0x842   :  { %3259 = vmatpush.bf16.msrb.mxu2 %v5100_v22  ;;  %2996 = vmatmul.bf16.vlgmr.msrb.gmra.mxu3 %v6576_v55  ;;  %v5136_v22 = vor.u32 %v5679_v49, %v5133_v50  ;;  %v5722_v50 = vld [vmem:[#allocation13 + $0xb8] sm:$0xff] }
 0x843   :  { %3268 = vmatpush.bf16.msra.mxu3 %v5204_v51  ;;  %2968 = vmatmul.bf16.vlgmr.msrb.gmra.mxu1 %v6576_v55  ;;  %v5208_v51 = vor.u32 %v5697_v31, %v5205_v47 }
 0x846   :  { %3260 = vmatpush.bf16.msrb.mxu2 %v5092_v57  ;;  %v5128_v57 = vor.u32 %v5677_v52, %v5125_v54 }
 0x847   :  { %3269 = vmatpush.bf16.msra.mxu3 %v5196_v8  ;;  %v3004_v8 = vld [vmem:[#allocation10 + $0x28] sm:$0xff] }
 0x84a   :  { %3261 = vmatpush.bf16.msrb.mxu2 %v5084_v1  ;;  %v5120_v1 = vor.u32 %v5675_v60, %v5117_v62  ;;  %v5717_v60 = vld [vmem:[#allocation13 + $0x90] sm:$0xff] }
 0x84b   :  { %3270 = vmatpush.bf16.msra.mxu3 %v5188_v0  ;;  %v5192_v0 = vor.u32 %v5693_v38, %v5189_v59 }
 0x84d   :  { %3262 = vmatmul.bf16.vlgmr.msrb.gmra.mxu2 %v6559_v46 }
 0x84f   :  { %3271 = vmatpush.bf16.msra.mxu3 %v5180_v12  ;;  %v5673_v12 = vld [vmem:[#allocation12 + $0x334] sm:$0xf] }
 0x853   :  { %3272 = vmatpush.bf16.msra.mxu3 %v5172_v14  ;;  %v5112_v14 = vor.u32 %v5673_v12, %v5109_v13  ;;  %v5703_v12 = vld [vmem:[#allocation13 + $0x20] sm:$0xff] }
 0x857   :  { %3273 = vmatpush.bf16.msra.mxu3 %v5164_v30  ;;  %v5671_v30 = vld [vmem:[#allocation12 + $0x324] sm:$0xf] }
 0x858   :  { %v5104_v17 = vor.u32 %v5671_v30, %v5101_v39  ;;  %v5702_v30 = vld [vmem:[#allocation13 + $0x18] sm:$0xff] }
 0x859   :  { %v5738_v39 = vld [vmem:[#allocation13 + $0x138] sm:$0xff] }
 0x85b   :  { %3274 = vmatpush.bf16.msra.mxu3 %v5156_v16  ;;  %v5176_v16 = vor.u32 %v5689_v9, %v5173_v63  ;;  %v5715_v63 = vld [vmem:[#allocation13 + $0x80] sm:$0xff] }
 0x85f   :  { %3275 = vmatpush.bf16.msra.mxu3 %v5148_v18  ;;  %v5165_v18 = vld [vmem:[#allocation12 + $0x3a8] sm:$0xf0] }
 0x862   :  { %3276 = vmatmul.bf16.vlgmr.msra.gmra.mxu3 %v6576_v55 }
 0x890   :  { %v2724_v53 = vpop.f32.mrf.mxu2 }
 0x898   :  { %v2727_v11 = vpop.f32.mrf.mxu2 }
 0x89a   :  { %v2672_v23 = vpop.f32.mrf.mxu1 }
 0x89b   :  { %v6608_v19 = vadd.f32 %v2724_v53, %v2672_v23  ;;  %v5669_v23 = vld [vmem:[#allocation12 + $0x314] sm:$0xf] }
 0x8a1   :  { %v2675_v33 = vpop.f32.mrf.mxu3 }
 0x8a2   :  { %v6610_v24 = vadd.f32 %v2727_v11, %v2675_v33  ;;  %v2695_v5 = vpop.f32.mrf.mxu1  ;;  %v5093_v11 = vld [vmem:[#allocation12 + $0x318] sm:$0xf0]  ;;  %v5168_v33 = vor.u32 %v5687_v2, %v5165_v18  ;;  %v5701_v18 = vld [vmem:[#allocation13 + $0x10] sm:$0xff] }
 0x8a9   :  { %v2747_v26 = vpop.f32.mrf.mxu3 }
 0x8aa   :  { %v6612_v40 = vadd.f32 %v2747_v26, %v2695_v5  ;;  %v2698_v56 = vpop.f32.mrf.mxu1  ;;  %v5096_v5 = vor.u32 %v5669_v23, %v5093_v11  ;;  %v5685_v26 = vld [vmem:[#allocation12 + $0x394] sm:$0xf] }
 0x8b0   :  { %v2983_v29 = vpop.f32.mrf.mxu2 }
 0x8b1   :  { %v2750_v10 = vpop.f32.mrf.mxu3 }
 0x8b2   :  { %v6614_v28 = vadd.f32 %v2750_v10, %v2698_v56  ;;  %v5157_v56 = vld [vmem:[#allocation12 + $0x398] sm:$0xf0]  ;;  %v5667_v10 = vld [vmem:[#allocation12 + $0x304] sm:$0xf] }
 0x8b8   :  { %v2985_v6 = vpop.f32.mrf.mxu2 }
 0x8c0   :  { %v2969_v20 = vpop.f32.mrf.mxu1 }
 0x8c1   :  { %v2970_v42 = vadd.f32 %v2969_v20, %v2955_v25  ;;  %v5085_v25 = vld [vmem:[#allocation12 + $0x308] sm:$0xf0]  ;;  %v5160_v20 = vor.u32 %v5685_v26, %v5157_v56 }
 0x8c2   :  { %v5700_v26 = vld [vmem:[#allocation13 + $0x8] sm:$0xff] }
 0x8c3   :  { %v5736_v56 = vld [vmem:[#allocation13 + $0x128] sm:$0xff] }
 0x8c5   :  { %v2997_v32 = vpop.f32.mrf.mxu3 }
 0x8c6   :  { %v2998_v7 = vadd.f32 %v2997_v32, %v2983_v29  ;;  %v5088_v29 = vor.u32 %v5667_v10, %v5085_v25  ;;  %v5683_v32 = vld [vmem:[#allocation12 + $0x384] sm:$0xf] }
 0x8c8   :  { %v2971_v35 = vpop.f32.mrf.mxu1 }
 0x8c9   :  { %v2972_v41 = vadd.f32 %v2971_v35, %v2957_v34  ;;  %v5149_v34 = vld [vmem:[#allocation12 + $0x388] sm:$0xf0] }
 0x8cb   :  { %3025 = vmatpush.msra.mxu0 %v2972_v41  ;;  %v5152_v41 = vor.u32 %v5683_v32, %v5149_v34 }
 0x8cd   :  { %v2999_v43 = vpop.f32.mrf.mxu3  ;;  %3026 = vmatpush.msra.mxu0 %v2970_v42  ;;  %v3311_v42 = vld [vmem:[#allocation10 + $0x30] sm:$0xff] }
 0x8ce   :  { %v3000_v48 = vadd.f32 %v2999_v43, %v2985_v6  ;;  %5077 = vmatmul.msk.f32.vlgmr.msra.gmra.mxu0 %vm2648_vm13, %v3003_v44  ;;  %v3312_v43 = vld [vmem:[#allocation10 + $0x38] sm:$0xff] }
 0x8cf   :  { %3282 = vmatpush.bf16.msrb.mxu0 %v5144_v45 }
 0x8d0   :  { %3048 = vmatpush.msra.mxu1 %v3000_v48  ;;  %v3263_v15 = vpop.f32.mrf.mxu2 }
 0x8d2   :  { %3049 = vmatpush.msra.mxu1 %v2998_v7 }
 0x8d3   :  { %5079 = vmatmul.msk.f32.vlgmr.msra.gmra.mxu1 %vm2648_vm13, %v3003_v44  ;;  %3283 = vmatpush.bf16.msrb.mxu0 %v5136_v22  ;;  %v5719_v22 = vld [vmem:[#allocation13 + $0xa0] sm:$0xff] }
 0x8d4   :  { %3296 = vmatpush.bf16.msrb.mxu1 %v5208_v51  ;;  %v5720_v51 = vld [vmem:[#allocation13 + $0xa8] sm:$0xff] }
 0x8d6   :  { %5078 = vmatmul.msk.f32.gmra.mxu0 %vm2648_vm13, %v3004_v8 }
 0x8d7   :  { %3284 = vmatpush.bf16.msrb.mxu0 %v5128_v57 }
 0x8d8   :  { %3297 = vmatpush.bf16.msrb.mxu1 %v5200_v37  ;;  %v3265_v35 = vpop.f32.mrf.mxu2 }
 0x8db   :  { %5080 = vmatmul.msk.f32.gmra.mxu1 %vm2648_vm13, %v3004_v8  ;;  %3285 = vmatpush.bf16.msrb.mxu0 %v5120_v1 }
 0x8dc   :  { %3298 = vmatpush.bf16.msrb.mxu1 %v5192_v0  ;;  %v5704_v0 = vld [vmem:[#allocation13 + $0x28] sm:$0xff] }
 0x8df   :  { %3286 = vmatpush.bf16.msrb.mxu0 %v5112_v14 }
 0x8e0   :  { %3299 = vmatpush.bf16.msrb.mxu1 %v5184_v27 }
 0x8e3   :  { %3287 = vmatpush.bf16.msrb.mxu0 %v5104_v17 }
 0x8e4   :  { %3300 = vmatpush.bf16.msrb.mxu1 %v5176_v16 }
 0x8e5   :  { %v3277_v53 = vpop.f32.mrf.mxu3 }
 0x8e6   :  { %v3278_v6 = vadd.f32 %v3277_v53, %v3263_v15  ;;  %v5737_v53 = vld [vmem:[#allocation13 + $0x130] sm:$0xff] }
 0x8e7   :  { %3288 = vmatpush.bf16.msrb.mxu0 %v5096_v5 }
 0x8e8   :  { %3301 = vmatpush.bf16.msrb.mxu1 %v5168_v33 }
 0x8eb   :  { %3289 = vmatpush.bf16.msrb.mxu0 %v5088_v29 }
 0x8ec   :  { %3302 = vmatpush.bf16.msrb.mxu1 %v5160_v20 }
 0x8ed   :  { %v3279_v21 = vpop.f32.mrf.mxu3 }
 0x8ee   :  { %v3280_v4 = vadd.f32 %v3279_v21, %v3265_v35  ;;  %3290 = vmatmul.bf16.vlgmr.msrb.gmra.mxu0 %v6559_v46  ;;  %v5721_v46 = vld [vmem:[#allocation13 + $0xb0] sm:$0xff]  ;;  %v5699_v35 = vld [vmem:[#allocation13] sm:$0xff] }
 0x8ef   :  { %3603 = vmatpush.bf16.msra.mxu0 %v5706_v3  ;;  %v5735_v21 = vld [vmem:[#allocation13 + $0x120] sm:$0xff] }
 0x8f0   :  { %3333 = vmatpush.msra.mxu2 %v3280_v4  ;;  %3303 = vmatpush.bf16.msrb.mxu1 %v5152_v41 }
 0x8f2   :  { %3334 = vmatpush.msra.mxu2 %v3278_v6  ;;  %v5734_v6 = vld [vmem:[#allocation13 + $0x118] sm:$0xff] }
 0x8f3   :  { %5209 = vmatmul.msk.f32.vlgmr.msra.gmra.mxu2 %vm2648_vm13, %v3311_v42  ;;  %3304 = vmatmul.bf16.vlgmr.msrb.gmra.mxu1 %v6576_v55 }
 0x8f4   :  { %3762 = vmatpush.bf16.msrb.mxu2 %v5722_v50 }
 0x8f8   :  { %3763 = vmatpush.bf16.msrb.mxu2 %v5721_v46 }
 0x8fb   :  { %5210 = vmatmul.msk.f32.gmra.mxu2 %vm2648_vm13, %v3312_v43 }
 0x8fc   :  { %3764 = vmatpush.bf16.msrb.mxu2 %v5720_v51  ;;  %v6649_v51 = vld [vmem:[%s6742_s15] sm:$0x3] }
 0x900   :  { %3765 = vmatpush.bf16.msrb.mxu2 %v5719_v22  ;;  %v6654_v22 = vld [vmem:[%s6743_s16] sm:$0x3] }
 0x94b   :  { %v3028_v48 = vpop.f32.mrf.mxu0 }
 0x94c   :  { %v3057_v37 = vadd.f32 %v3028_v48, %v6608_v19 }
 0x950   :  { %v3051_v44 = vpop.f32.mrf.mxu1 }
 0x951   :  { %v6625_v45 = vadd.f32 %v3051_v44, %v6612_v40  ;;  %v5718_v40 = vld [vmem:[#allocation13 + $0x98] sm:$0xff]  ;;  %v5732_v44 = vld [vmem:[#allocation13 + $0x108] sm:$0xff] }
 0x952   :  { %3766 = vmatpush.bf16.msrb.mxu2 %v5718_v40 }
 0x953   :  { %v3031_v49 = vpop.f32.mrf.mxu0 }
 0x954   :  { %v3059_v57 = vadd.f32 %v3031_v49, %v6610_v24  ;;  %v5731_v49 = vld [vmem:[#allocation13 + $0x100] sm:$0xff] }
 0x956   :  { %3767 = vmatpush.bf16.msrb.mxu2 %v5717_v60 }
 0x958   :  { %v3054_v31 = vpop.f32.mrf.mxu1 }
 0x959   :  { %v6628_v47 = vadd.f32 %v3054_v31, %v6614_v28  ;;  %v5705_v28 = vld [vmem:[#allocation13 + $0x30] sm:$0xff] }
 0x95a   :  { %3604 = vmatpush.bf16.msra.mxu0 %v5705_v28  ;;  %3768 = vmatpush.bf16.msrb.mxu2 %v5716_v61 }
 0x95e   :  { %3605 = vmatpush.bf16.msra.mxu0 %v5704_v0  ;;  %3769 = vmatpush.bf16.msrb.mxu2 %v5715_v63 }
 0x962   :  { %3606 = vmatpush.bf16.msra.mxu0 %v5703_v12  ;;  %3980 = vmatpush.bf16.msra.mxu2 %v5738_v39  ;;  %v5714_v12 = vld [vmem:[#allocation13 + $0x78] sm:$0xff] }
 0x963   :  { %3617 = vmatpush.bf16.msra.mxu1 %v5714_v12 }
 0x966   :  { %3607 = vmatpush.bf16.msra.mxu0 %v5702_v30  ;;  %3981 = vmatpush.bf16.msra.mxu2 %v5737_v53  ;;  %v5712_v30 = vld [vmem:[#allocation13 + $0x68] sm:$0xff] }
 0x96a   :  { %3608 = vmatpush.bf16.msra.mxu0 %v5701_v18  ;;  %3982 = vmatpush.bf16.msra.mxu2 %v5736_v56 }
 0x96b   :  { %v3291_v7 = vpop.f32.mrf.mxu0 }
 0x96e   :  { %3609 = vmatpush.bf16.msra.mxu0 %v5700_v26  ;;  %3983 = vmatpush.bf16.msra.mxu2 %v5735_v21 }
 0x970   :  { %v3305_v55 = vpop.f32.mrf.mxu1 }
 0x971   :  { %v3306_v38 = vadd.f32 %v3305_v55, %v3291_v7 }
 0x972   :  { %3610 = vmatpush.bf16.msra.mxu0 %v5699_v35  ;;  %3984 = vmatpush.bf16.msra.mxu2 %v5734_v6 }
 0x973   :  { %v3293_v52 = vpop.f32.mrf.mxu0 }
 0x976   :  { %v3336_v36 = vpop.f32.mrf.mxu2 }
 0x977   :  { %v6632_v59 = vadd.f32 %v3336_v36, %v3057_v37  ;;  %v3443_v36 = vperm.slane %v6649_v51, 0 }
 0x978   :  { %v3307_v54 = vpop.f32.mrf.mxu1 }
 0x979   :  { %v3308_v8 = vadd.f32 %v3307_v54, %v3293_v52  ;;  %v3385_v19 = vmul.f32 %v6632_v59, %v6632_v59  ;;  %v3453_v54 = vperm.slane %v6654_v22, 0 }
 0x97b   :  { %3356 = vmatpush.msrb.mxu3 %v3308_v8 }
 0x97d   :  { %3357 = vmatpush.msrb.mxu3 %v3306_v38 }
 0x97e   :  { %v3339_v62 = vpop.f32.mrf.mxu2  ;;  %5211 = vmatmul.msk.f32.vlgmr.msrb.gmra.mxu3 %vm2648_vm13, %v3311_v42 }
 0x97f   :  { %v6634_v1 = vadd.f32 %v3339_v62, %v3059_v57 }
 0x981   :  { %v3369_v24 = vadd.f32 %v6634_v1, %v6632_v59  ;;  %v3387_v58 = vmul.f32 %v6634_v1, %v6634_v1 }
 0x983   :  { %v3370_v13 = vrot.slane %v3369_v24, 4  ;;  %v3389_v27 = vadd.f32 %v3387_v58, %v3385_v19  ;;  %v5729_v19 = vld [vmem:[#allocation13 + $0xf0] sm:$0xff]  ;;  %v5727_v58 = vld [vmem:[#allocation13 + $0xe0] sm:$0xff] }
 0x985   :  { %v3371_v14 = vadd.f32 %v3370_v13, %v3369_v24  ;;  %v3390_v9 = vrot.slane %v3389_v27, 4  ;;  %v5728_v24 = vld [vmem:[#allocation13 + $0xe8] sm:$0xff]  ;;  %v5726_v13 = vld [vmem:[#allocation13 + $0xd8] sm:$0xff] }
 0x986   :  { %5212 = vmatmul.msk.f32.gmra.mxu3 %vm2648_vm13, %v3312_v43  ;;  %v5733_v43 = vld [vmem:[#allocation13 + $0x110] sm:$0xff] }
 0x987   :  { %v3372_v15 = vrot.slane %v3371_v14, 2  ;;  %v3391_v16 = vadd.f32 %v3390_v9, %v3389_v27  ;;  %3985 = vmatpush.bf16.msra.mxu2 %v5733_v43  ;;  %v5713_v27 = vld [vmem:[#allocation13 + $0x70] sm:$0xff] }
 0x988   :  { %3618 = vmatpush.bf16.msra.mxu1 %v5713_v27  ;;  %v5725_v9 = vld [vmem:[#allocation13 + $0xd0] sm:$0xff] }
 0x989   :  { %v3373_v17 = vadd.f32 %v3372_v15, %v3371_v14  ;;  %v3392_v2 = vrot.slane %v3391_v16, 2 }
 0x98b   :  { %v3374_v23 = vrot.slane %v3373_v17, 1  ;;  %v3393_v11 = vadd.f32 %v3392_v2, %v3391_v16  ;;  %3986 = vmatpush.bf16.msra.mxu2 %v5732_v44  ;;  %v5724_v2 = vld [vmem:[#allocation13 + $0xc8] sm:$0xff] }
 0x98c   :  { %3619 = vmatpush.bf16.msra.mxu1 %v5712_v30 }
 0x98d   :  { %v3375_v33 = vadd.f32 %v3374_v23, %v3373_v17  ;;  %v3394_v5 = vrot.slane %v3393_v11, 1 }
 0x98f   :  { %v3383_v10 = vmul.f32 0.071428575, %v3375_v33  ;;  %v3395_v25 = vadd.f32 %v3394_v5, %v3393_v11  ;;  %3987 = vmatpush.bf16.msra.mxu2 %v5731_v49  ;;  %v5723_v11 = vld [vmem:[#allocation13 + $0xc0] sm:$0xff]  ;;  %v5710_v33 = vld [vmem:[#allocation13 + $0x58] sm:$0xff] }
 0x990   :  { %v5746_v5 = vld [vmem:[#allocation13 + $0x178] sm:$0xff]  ;;  %v5707_v49 = vld [vmem:[#allocation13 + $0x40] sm:$0xff] }
 0x991   :  { %v3403_v20 = vmul.f32 0.071428575, %v3395_v25  ;;  %v3405_v29 = vmul.f32 %v3383_v10, %v3383_v10  ;;  %v3411_v32 = vsub.f32 %v6632_v59, %v3383_v10  ;;  %v3413_v34 = vsub.f32 %v6634_v1, %v3383_v10  ;;  %v5730_v1 = vld [vmem:[#allocation13 + $0xf8] sm:$0xff] }
 0x992   :  { %3776 = vmatpush.bf16.msra.mxu3 %v5730_v1 }
 0x993   :  { %v3407_v4 = vsub.f32 %v3403_v20, %v3405_v29  ;;  %v5709_v20 = vld [vmem:[#allocation13 + $0x50] sm:$0xff] }
 0x994   :  { %v5745_v29 = vld [vmem:[#allocation13 + $0x170] sm:$0xff] }
 0x995   :  { %v3409_v41 = vmax.f32 %v3407_v4, 0.0  ;;  %v5708_v4 = vld [vmem:[#allocation13 + $0x48] sm:$0xff] }
 0x996   :  { %3777 = vmatpush.bf16.msra.mxu3 %v5729_v19  ;;  %v3454_v19 = vperm.slane %v6654_v22, 1 }
 0x997   :  { %v3415_v42 = vadd.f32 1e-05, %v3409_v41  ;;  %v5744_v41 = vld [vmem:[#allocation13 + $0x168] sm:$0xff] }
 0x999   :  { %5789 = vrsqrt.f32 %v3415_v42  ;;  %vm3423_vm15 = vweird.f32 %v3415_v42 }
 0x99a   :  { %3778 = vmatpush.bf16.msra.mxu3 %v5728_v24 }
 0x99e   :  { %3779 = vmatpush.bf16.msra.mxu3 %v5727_v58 }
 0x99f   :  { %v5790_v31 = vpop.eup %5789 }
 0x9a0   :  { %v3418_v48 = vmul.f32 %v5790_v31, %v3415_v42  ;;  %vm3424_vm14 = vweird.f32 %v5790_v31 }
 0x9a1   :  { %vm3425_vm0 = vmor %vm3423_vm15, %vm3424_vm14 }
 0x9a2   :  { %v3419_v50 = vmul.f32 %v5790_v31, %v3418_v48  ;;  %3780 = vmatpush.bf16.msra.mxu3 %v5726_v13 }
 0x9a4   :  { %v3420_v46 = vmul.f32 0.5, %v3419_v50  ;;  %v5743_v50 = vld [vmem:[#allocation13 + $0x160] sm:$0xff] }
 0x9a6   :  { %v3421_v7 = vsub.f32 1.5, %v3420_v46  ;;  %3781 = vmatpush.bf16.msra.mxu3 %v5725_v9 }
 0x9a8   :  { %v3422_v55 = vmul.f32 %v5790_v31, %v3421_v7 }
 0x9aa   :  { %v3426_v3 = vsel %vm3425_vm0, %v5790_v31, %v3422_v55  ;;  %3782 = vmatpush.bf16.msra.mxu3 %v5724_v2  ;;  %v5742_v55 = vld [vmem:[#allocation13 + $0x158] sm:$0xff] }
 0x9ab   :  { %v3437_v40 = vmul.f32 %v3426_v3, %v3411_v32  ;;  %v3439_v52 = vmul.f32 %v3426_v3, %v3413_v34  ;;  %v5741_v3 = vld [vmem:[#allocation13 + $0x150] sm:$0xff] }
 0x9ad   :  { %v3447_v28 = vmul.f32 %v3443_v36, %v3437_v40  ;;  %v3449_v37 = vmul.f32 %v3443_v36, %v3439_v52  ;;  %v5740_v40 = vld [vmem:[#allocation13 + $0x148] sm:$0xff] }
 0x9ae   :  { %3783 = vmatpush.bf16.msra.mxu3 %v5723_v11 }
 0x9af   :  { %v3457_v8 = vadd.f32 %v3453_v54, %v3447_v28  ;;  %v3459_v57 = vadd.f32 %v3453_v54, %v3449_v37  ;;  %v5739_v28 = vld [vmem:[#allocation13 + $0x140] sm:$0xff] }
 0x9b1   :  { %v3467_v38 = vmul.f32 0.2, %v3459_v57  ;;  %vm3461_vm1 = vcmp.gt.f32.partialorder %v3457_v8, 0.0  ;;  %vm3463_vm2 = vcmp.gt.f32.partialorder %v3459_v57, 0.0  ;;  %v3465_v59 = vmul.f32 0.2, %v3457_v8 }
 0x9b2   :  { %3994 = vmatpush.bf16.msrb.mxu3 %v5746_v5  ;;  %v5341_v5 = vld [vmem:[%s6744_s17 + $0x10] sm:$0xff] }
 0x9b3   :  { %v3469_v60 = vsel %vm3461_vm1, %v3457_v8, %v3465_v59  ;;  %v3471_v62 = vsel %vm3463_vm2, %v3459_v57, %v3467_v38  ;;  %v3444_v59 = vperm.slane %v6649_v51, 1 }
 0x9b4   :  { %v6658_v0 = vpack.c.bf16 %v3471_v62, %v3469_v60 }
 0x9b6   :  { %3611 = vmatmul.bf16.vlgmr.msra.gmra.mxu0 %v6658_v0  ;;  %3770 = vmatmul.bf16.vlgmr.msrb.gmra.mxu2 %v6658_v0 }
 0x9b7   :  { %3995 = vmatpush.bf16.msrb.mxu3 %v5745_v29  ;;  %v5342_v29 = vld [vmem:[%s6744_s17 + $0x18] sm:$0xff] }
 0x9bb   :  { %3996 = vmatpush.bf16.msrb.mxu3 %v5744_v41  ;;  %v5762_v41 = vld [vmem:[#allocation13 + $0x1f8] sm:$0xff] }
 0x9bf   :  { %3997 = vmatpush.bf16.msrb.mxu3 %v5743_v50  ;;  %v5759_v50 = vld [vmem:[#allocation13 + $0x1e0] sm:$0xff] }
 0x9c3   :  { %3998 = vmatpush.bf16.msrb.mxu3 %v5742_v55  ;;  %v5756_v55 = vld [vmem:[#allocation13 + $0x1c8] sm:$0xff] }
 0x9c6   :  { %3988 = vmatmul.bf16.vlgmr.msra.gmra.mxu2 %v6658_v0 }
 0x9c7   :  { %3999 = vmatpush.bf16.msrb.mxu3 %v5741_v3 }
 0x9cb   :  { %4000 = vmatpush.bf16.msrb.mxu3 %v5740_v40 }
 0x9cf   :  { %4001 = vmatpush.bf16.msrb.mxu3 %v5739_v28 }
 0xa01   :  { %v3359_v61 = vpop.f32.mrf.mxu3 }
 0xa02   :  { %v6664_v14 = vadd.f32 %v3359_v61, %v6625_v45  ;;  %v5711_v45 = vld [vmem:[#allocation13 + $0x60] sm:$0xff] }
 0xa03   :  { %3620 = vmatpush.bf16.msra.mxu1 %v5711_v45  ;;  %v5754_v45 = vld [vmem:[#allocation13 + $0x1b8] sm:$0xff] }
 0xa04   :  { %v3386_v15 = vmul.f32 %v6664_v14, %v6664_v14 }
 0xa07   :  { %3621 = vmatpush.bf16.msra.mxu1 %v5710_v33 }
 0xa09   :  { %v3362_v63 = vpop.f32.mrf.mxu3 }
 0xa0a   :  { %v6667_v39 = vadd.f32 %v3362_v63, %v6628_v47 }
 0xa0b   :  { %3622 = vmatpush.bf16.msra.mxu1 %v5709_v20  ;;  %v5751_v20 = vld [vmem:[#allocation13 + $0x1a0] sm:$0xff] }
 0xa0c   :  { %v3376_v16 = vadd.f32 %v6667_v39, %v6664_v14  ;;  %v3388_v17 = vmul.f32 %v6667_v39, %v6667_v39 }
 0xa0e   :  { %v3377_v18 = vrot.slane %v3376_v16, 4  ;;  %v3396_v53 = vadd.f32 %v3388_v17, %v3386_v15 }
 0xa0f   :  { %3623 = vmatpush.bf16.msra.mxu1 %v5708_v4 }
 0xa10   :  { %v3378_v23 = vadd.f32 %v3377_v18, %v3376_v16  ;;  %v3397_v47 = vrot.slane %v3396_v53, 4 }
 0xa12   :  { %v3379_v26 = vrot.slane %v3378_v23, 2  ;;  %v3398_v56 = vadd.f32 %v3397_v47, %v3396_v53  ;;  %v3631_v53 = vld [vmem:[%s6744_s17] sm:$0xff]  ;;  %v5753_v47 = vld [vmem:[#allocation13 + $0x1b0] sm:$0xff] }
 0xa13   :  { %3624 = vmatpush.bf16.msra.mxu1 %v5707_v49  ;;  %v5412_v49 = vld [vmem:[%s6744_s17 + $0x28] sm:$0xff] }
 0xa14   :  { %v3380_v10 = vadd.f32 %v3379_v26, %v3378_v23  ;;  %v3399_v25 = vrot.slane %v3398_v56, 2  ;;  %v5752_v26 = vld [vmem:[#allocation13 + $0x1a8] sm:$0xff] }
 0xa16   :  { %v3381_v32 = vrot.slane %v3380_v10, 1  ;;  %v3400_v34 = vadd.f32 %v3399_v25, %v3398_v56 }
 0xa18   :  { %v3382_v35 = vadd.f32 %v3381_v32, %v3380_v10  ;;  %v3401_v21 = vrot.slane %v3400_v34, 1  ;;  %v3632_v10 = vld [vmem:[%s6744_s17 + $0x8] sm:$0xff]  ;;  %v5750_v32 = vld [vmem:[#allocation13 + $0x198] sm:$0xff] }
 0xa1a   :  { %v3384_v6 = vmul.f32 0.071428575, %v3382_v35  ;;  %v3402_v42 = vadd.f32 %v3401_v21, %v3400_v34  ;;  %v5749_v21 = vld [vmem:[#allocation13 + $0x190] sm:$0xff] }
 0xa1c   :  { %v3404_v43 = vmul.f32 0.071428575, %v3402_v42  ;;  %v3406_v44 = vmul.f32 %v3384_v6, %v3384_v6  ;;  %v3412_v31 = vsub.f32 %v6664_v14, %v3384_v6  ;;  %v3414_v48 = vsub.f32 %v6667_v39, %v3384_v6  ;;  %v5748_v42 = vld [vmem:[#allocation13 + $0x188] sm:$0xff] }
 0xa1e   :  { %v3408_v46 = vsub.f32 %v3404_v43, %v3406_v44  ;;  %v5411_v43 = vld [vmem:[%s6744_s17 + $0x20] sm:$0xff]  ;;  %v5761_v44 = vld [vmem:[#allocation13 + $0x1f0] sm:$0xff] }
 0xa20   :  { %v3410_v7 = vmax.f32 %v3408_v46, 0.0  ;;  %v5758_v46 = vld [vmem:[#allocation13 + $0x1d8] sm:$0xff] }
 0xa22   :  { %v3416_v36 = vadd.f32 1e-05, %v3410_v7  ;;  %v5757_v7 = vld [vmem:[#allocation13 + $0x1d0] sm:$0xff] }
 0xa24   :  { %5791 = vrsqrt.f32 %v3416_v36  ;;  %vm3433_vm4 = vweird.f32 %v3416_v36 }
 0xa2a   :  { %v5792_v52 = vpop.eup %5791 }
 0xa2b   :  { %v3428_v54 = vmul.f32 %v5792_v52, %v3416_v36  ;;  %vm3434_vm3 = vweird.f32 %v5792_v52  ;;  %v5755_v36 = vld [vmem:[#allocation13 + $0x1c0] sm:$0xff] }
 0xa2c   :  { %vm3435_vm5 = vmor %vm3433_vm4, %vm3434_vm3 }
 0xa2d   :  { %v3429_v37 = vmul.f32 %v5792_v52, %v3428_v54 }
 0xa2f   :  { %v3430_v8 = vmul.f32 0.5, %v3429_v37 }
 0xa31   :  { %v3431_v57 = vsub.f32 1.5, %v3430_v8 }
 0xa33   :  { %v3432_v38 = vmul.f32 %v5792_v52, %v3431_v57  ;;  %v3612_v51 = vpop.f32.mrf.mxu0 }
 0xa35   :  { %v3436_v60 = vsel %vm3435_vm5, %v5792_v52, %v3432_v38 }
 0xa36   :  { %v3438_v62 = vmul.f32 %v3436_v60, %v3412_v31  ;;  %v3440_v1 = vmul.f32 %v3436_v60, %v3414_v48  ;;  %v5747_v31 = vld [vmem:[#allocation13 + $0x180] sm:$0xff]  ;;  %v5760_v48 = vld [vmem:[#allocation13 + $0x1e8] sm:$0xff] }
 0xa38   :  { %v3448_v24 = vmul.f32 %v3444_v59, %v3438_v62  ;;  %v3450_v58 = vmul.f32 %v3444_v59, %v3440_v1 }
 0xa39   :  { %v3771_v22 = vpop.f32.mrf.mxu2 }
 0xa3a   :  { %v3458_v61 = vadd.f32 %v3454_v19, %v3448_v24  ;;  %v3460_v12 = vadd.f32 %v3454_v19, %v3450_v58  ;;  %v5479_v58 = vld [vmem:[%s6744_s17 + $0x30] sm:$0xff] }
 0xa3b   :  { %v3614_v15 = vpop.f32.mrf.mxu0 }
 0xa3c   :  { %v3468_v13 = vmul.f32 0.2, %v3460_v12  ;;  %vm3462_vm6 = vcmp.gt.f32.partialorder %v3458_v61, 0.0  ;;  %vm3464_vm7 = vcmp.gt.f32.partialorder %v3460_v12, 0.0  ;;  %v3466_v27 = vmul.f32 0.2, %v3458_v61 }
 0xa3e   :  { %v3470_v14 = vsel %vm3462_vm6, %v3458_v61, %v3466_v27  ;;  %v3472_v9 = vsel %vm3464_vm7, %v3460_v12, %v3468_v13  ;;  %v5480_v61 = vld [vmem:[%s6744_s17 + $0x38] sm:$0xff]  ;;  %v5782_v12 = vld [vmem:[%s6746_s19] ss:$0 sm:$0xff] }
 0xa3f   :  { %v6679_v63 = vpack.c.bf16 %v3472_v9, %v3470_v14 }
 0xa41   :  { %3625 = vmatmul.bf16.vlgmr.msra.gmra.mxu1 %v6679_v63  ;;  %3784 = vmatmul.bf16.vlgmr.msra.gmra.mxu3 %v6679_v63  ;;  %v3773_v2 = vpop.f32.mrf.mxu2 }
 0xa49   :  { %v3989_v56 = vpop.f32.mrf.mxu2 }
 0xa51   :  { %4002 = vmatmul.bf16.vlgmr.msrb.gmra.mxu3 %v6679_v63  ;;  %v3991_v34 = vpop.f32.mrf.mxu2 }
 0xabe   :  { %v3626_v30 = vpop.f32.mrf.mxu1 }
 0xabf   :  { %v3627_v18 = vadd.f32 %v3626_v30, %v3612_v51 }
 0xac4   :  { %v3785_v39 = vpop.f32.mrf.mxu3 }
 0xac5   :  { %v3786_v33 = vadd.f32 %v3785_v39, %v3771_v22 }
 0xac6   :  { %v3628_v16 = vpop.f32.mrf.mxu1 }
 0xac7   :  { %v3629_v17 = vadd.f32 %v3628_v16, %v3614_v15 }
 0xac9   :  { %3842 = vmatpush.msrb.mxu1 %v3629_v17 }
 0xacb   :  { %3843 = vmatpush.msrb.mxu1 %v3627_v18 }
 0xacc   :  { %v3787_v23 = vpop.f32.mrf.mxu3  ;;  %5345 = vmatmul.msk.f32.vlgmr.msrb.gmra.mxu1 %vm2648_vm13, %v3631_v53 }
 0xacd   :  { %4171 = vmatpush.bf16.msra.mxu1 %v5754_v45  ;;  %v3788_v11 = vadd.f32 %v3787_v23, %v3773_v2 }
 0xacf   :  { %3813 = vmatpush.msrb.mxu0 %v3788_v11 }
 0xad1   :  { %4172 = vmatpush.bf16.msra.mxu1 %v5753_v47  ;;  %3814 = vmatpush.msrb.mxu0 %v3786_v33 }
 0xad2   :  { %5343 = vmatmul.msk.f32.vlgmr.msrb.gmra.mxu0 %vm2648_vm13, %v5341_v5 }
 0xad4   :  { %v4003_v25 = vpop.f32.mrf.mxu3  ;;  %5346 = vmatmul.msk.f32.gmra.mxu1 %vm2648_vm13, %v3632_v10 }
 0xad5   :  { %4173 = vmatpush.bf16.msra.mxu1 %v5752_v26  ;;  %v4004_v6 = vadd.f32 %v4003_v25, %v3989_v56 }
 0xad9   :  { %4174 = vmatpush.bf16.msra.mxu1 %v5751_v20 }
 0xada   :  { %5344 = vmatmul.msk.f32.gmra.mxu0 %vm2648_vm13, %v5342_v29 }
 0xadc   :  { %v4005_v35 = vpop.f32.mrf.mxu3 }
 0xadd   :  { %4175 = vmatpush.bf16.msra.mxu1 %v5750_v32  ;;  %v4006_v4 = vadd.f32 %v4005_v35, %v3991_v34 }
 0xadf   :  { %4031 = vmatpush.msra.mxu0 %v4006_v4 }
 0xae1   :  { %4176 = vmatpush.bf16.msra.mxu1 %v5749_v21  ;;  %4032 = vmatpush.msra.mxu0 %v4004_v6 }
 0xae2   :  { %5413 = vmatmul.msk.f32.vlgmr.msra.gmra.mxu0 %vm2648_vm13, %v5411_v43 }
 0xae3   :  { %4185 = vmatpush.bf16.msrb.mxu0 %v5762_v41 }
 0xae5   :  { %4177 = vmatpush.bf16.msra.mxu1 %v5748_v42 }
 0xae7   :  { %4186 = vmatpush.bf16.msrb.mxu0 %v5761_v44 }
 0xae9   :  { %4178 = vmatpush.bf16.msra.mxu1 %v5747_v31 }
 0xaea   :  { %5414 = vmatmul.msk.f32.gmra.mxu0 %vm2648_vm13, %v5412_v49 }
 0xaeb   :  { %4187 = vmatpush.bf16.msrb.mxu0 %v5760_v48 }
 0xaec   :  { %4179 = vmatmul.bf16.vlgmr.msra.gmra.mxu1 %v6658_v0 }
 0xaef   :  { %4188 = vmatpush.bf16.msrb.mxu0 %v5759_v50 }
 0xaf3   :  { %4189 = vmatpush.bf16.msrb.mxu0 %v5758_v46 }
 0xaf7   :  { %4190 = vmatpush.bf16.msrb.mxu0 %v5757_v7 }
 0xafb   :  { %4191 = vmatpush.bf16.msrb.mxu0 %v5756_v55 }
 0xaff   :  { %4192 = vmatpush.bf16.msrb.mxu0 %v5755_v36 }
 0xb02   :  { %4193 = vmatmul.bf16.vlgmr.msrb.gmra.mxu0 %v6679_v63 }
 0xb49   :  { %v3845_v3 = vpop.f32.mrf.mxu1 }
 0xb4f   :  { %v3816_v40 = vpop.f32.mrf.mxu0 }
 0xb50   :  { %v3846_v52 = vadd.f32 %v3845_v3, %v3816_v40 }
 0xb51   :  { %v3848_v54 = vpop.f32.mrf.mxu1 }
 0xb57   :  { %v3819_v28 = vpop.f32.mrf.mxu0 }
 0xb58   :  { %v3849_v37 = vadd.f32 %v3848_v54, %v3819_v28 }
 0xb5f   :  { %v4034_v0 = vpop.f32.mrf.mxu0 }
 0xb60   :  { %v4040_v8 = vadd.f32 %v4034_v0, %v3846_v52 }
 0xb67   :  { %v4037_v57 = vpop.f32.mrf.mxu0 }
 0xb68   :  { %v4041_v38 = vadd.f32 %v4037_v57, %v3849_v37 }
 0xb69   :  { %v4180_v59 = vpop.f32.mrf.mxu1 }
 0xb71   :  { %v4182_v62 = vpop.f32.mrf.mxu1 }
 0xb7f   :  { %v4194_v60 = vpop.f32.mrf.mxu0 }
 0xb80   :  { %v4195_v24 = vadd.f32 %v4194_v60, %v4180_v59 }
 0xb87   :  { %v4196_v1 = vpop.f32.mrf.mxu0 }
 0xb88   :  { %v4197_v19 = vadd.f32 %v4196_v1, %v4182_v62 }
 0xb8a   :  { %4222 = vmatpush.msra.mxu0 %v4197_v19  ;;  %5765 = vmatpush.msrb.mxu2 %v4197_v19 }
 0xb8c   :  { %4223 = vmatpush.msra.mxu0 %v4195_v24  ;;  %5766 = vmatpush.msrb.mxu2 %v4195_v24 }
 0xb8d   :  { %5481 = vmatmul.msk.f32.vlgmr.msra.gmra.mxu0 %vm2648_vm13, %v5479_v58  ;;  %5482 = vmatmul.msk.f32.vlgmr.msrb.gmra.mxu2 %vm2648_vm13, %v5480_v61 }
 0xc0a   :  { %v4225_v13 = vpop.f32.mrf.mxu0 }
 0xc0b   :  { %v4231_v27 = vadd.f32 %v4225_v13, %v4040_v8 }
 0xc0d   :  { %v4237_v14 = vadd.f32 %v5782_v12, %v4231_v27 }
 0xc0f   :  { %4239 = vst [vmem:[%s6748_s21] sm:$0xff] %v4237_v14 }
 0xc10   :  { %v4228_v9 = vpop.f32.mrf.mxu2 }
 0xc11   :  { %v4232_v63 = vadd.f32 %v4228_v9, %v4041_v38 }
 0xc13   :  { %v4238_v51 = vadd.f32 %v5782_v12, %v4232_v63 }
 0xc15   :  { %4240 = vst [vmem:[%s6748_s21 + $0x8] sm:$0xff] %v4238_v51 }
 0xc16   :  { %4245 = vsyncpa [#allocation3], 1 }
 0xc17   :  { %4246 = vsyncpa [#allocation5], 1 }
 0xc18   :  { %4247 = vsyncpa [#allocation8], 1 }
 0xc19   :  { %4248 = vsyncpa [#allocation11], 1 }
 0xc1a   :  { %4249 = vsyncpa [#allocation14], 1 }

</bundles_post_ra>
